<compile_context>
chip_gen: v5e
topology: v5e:2x2
jax: 0.10.0
libtpu: 0.0.40
codegen_flags: <defaults>
</compile_context>

<pallas_src>
import functools

import jax
import jax.numpy as jnp
import numpy as np
from jax import lax
from jax.experimental import pallas as pl
from jax.experimental.pallas import tpu as pltpu


_ROWS_PER_STEP = 256        # requested rows gathered per grid step
_DMA_DEPTH = 16             # outstanding row DMAs kept in flight
_UNROLL = 8                 # steady-state loop unroll factor
_VMEM_TILE_BUDGET = 8 << 20  # bytes for the double-buffered output tile


def _round_up(v, m):
    return -(-v // m) * m


def _gather_chunk(rows, depth, base, perm_ref, x_hbm, out_ref, sems):
    """out_ref[r] <- x_hbm[perm[base + r]] for r in [0, rows).

    One HBM->VMEM row DMA per row, min(depth, rows) copies in flight on a
    DMA-semaphore ring.

    NOTE (row-size invariance): every issued copy is byte-identical in size
    (one full (row_len,) row).  wait_slot() relies on this when it rebuilds
    the wait descriptor from row 0 -- do not issue variable-sized slices here
    or the semaphore byte counts will mismatch.
    """
    d = min(depth, rows)

    def issue(r, src):
        pltpu.make_async_copy(
            x_hbm.at[src], out_ref.at[r], sems.at[r % d]).start()

    def wait_slot(slot):
        # Row 0 only carries the (row_len,) shape for the wait descriptor.
        pltpu.make_async_copy(
            x_hbm.at[0], out_ref.at[0], sems.at[slot]).wait()

    # Prime the ring with d outstanding copies.
    for r in range(d):
        issue(r, perm_ref[base + r])

    # Steady state: read the next permutation index from SMEM *before* the
    # semaphore wait (.wait() breaks sst->sld forwarding), then reuse the slot.
    if rows > d:
        def steady(r, carry):
            src = perm_ref[base + r]
            wait_slot(r % d)
            issue(r, src)
            return carry
        lax.fori_loop(d, rows, steady, 0, unroll=_UNROLL)

    # Drain the remaining in-flight copies (one per used slot).
    for slot in range(d):
        wait_slot(slot)


def _gather_kernel(rows_per_step, tail_rows, depth,
                   perm_ref, x_hbm, out_ref, sems):
    step = pl.program_id(0)
    base = step * rows_per_step

    if tail_rows == rows_per_step:
        # Grid divides the dataset evenly: single code path.
        _gather_chunk(rows_per_step, depth, base, perm_ref, x_hbm,
                      out_ref, sems)
    else:
        last = pl.num_programs(0) - 1

        @pl.when(step != last)
        def _():
            _gather_chunk(rows_per_step, depth, base, perm_ref, x_hbm,
                          out_ref, sems)

        @pl.when(step == last)
        def _():
            # Static-size tail chunk: no wasted duplicate DMAs for padding.
            _gather_chunk(tail_rows, depth, base, perm_ref, x_hbm,
                          out_ref, sems)


def _choose_rows_per_step(n, row_len, itemsize, requested, vmem_budget_bytes):
    """Chunk size that (a) keeps the double-buffered VMEM output tile under
    `vmem_budget_bytes` on every chip generation and (b) yields >=2 grid
    steps for non-tiny datasets so the "parallel" grid axis can be sharded
    across both TensorCores on v7x."""
    vmem_cap = max(8, vmem_budget_bytes // (2 * row_len * itemsize))
    g = max(1, min(requested, n, vmem_cap))
    if g >= n:
        if n < 16:
            return n                      # single step; block dim == full dim
        g = _round_up(_round_up(n, 2) // 2, 8)
        return n if g >= n else g
    g = _round_up(g, 8)                   # multi-step: sublane divisibility
    return n if g >= n else g


def shuffle_gather(x2d, perm, *, rows_per_step=_ROWS_PER_STEP,
                   dma_depth=_DMA_DEPTH,
                   vmem_budget_bytes=_VMEM_TILE_BUDGET):
    """Pallas gather: returns x2d[perm] for a 2-D (N, row_len) array."""
    n, row_len = x2d.shape
    g = _choose_rows_per_step(n, row_len, x2d.dtype.itemsize,
                              rows_per_step, vmem_budget_bytes)
    n_steps = pl.cdiv(n, g)
    n_pad = n_steps * g
    tail = n - (n_steps - 1) * g          # rows in the last chunk (1..g)
    depth = min(dma_depth, g)

    perm = perm.astype(jnp.int32)
    kernel = functools.partial(_gather_kernel, g, tail, depth)

    grid_spec = pltpu.PrefetchScalarGridSpec(
        num_scalar_prefetch=1,                         # perm lands in SMEM
        grid=(n_steps,),
        in_specs=[pl.BlockSpec(memory_space=pl.ANY)],  # x stays in HBM
        # Coalesced write side: the out block is a VMEM tile; Pallas writes
        # each gathered chunk back to HBM with one large pipelined DMA.
        out_specs=pl.BlockSpec((g, row_len), lambda i, perm: (i, 0)),
        scratch_shapes=[pltpu.SemaphoreType.DMA((depth,))],
    )

    bytes_moved = 2 * n * row_len * x2d.dtype.itemsize
    out = pl.pallas_call(
        kernel,
        grid_spec=grid_spec,
        out_shape=jax.ShapeDtypeStruct((n_pad, row_len), x2d.dtype),
        compiler_params=pltpu.CompilerParams(
            dimension_semantics=("parallel",)),        # chunks are independent
        cost_estimate=pl.CostEstimate(
            flops=0, transcendentals=0, bytes_accessed=bytes_moved),
    )(perm, x2d)
    return out[:n] if n_pad != n else out


def classification_word_loader_forward(x, y_true, lengths, batch_size, key,
                                       *, rows_per_step=_ROWS_PER_STEP):
    """Mirrors classificationWordLoader.forward(batchSize).

    Returns zip(xList, lengthList, yList) of shuffled batches.
    """
    n, max_words, emb = x.shape
    perm = jax.random.permutation(key, n).astype(jnp.int32)

    # Hot path: lane-dense 2-D row gather in the Pallas kernel.
    x2d = x.reshape(n, max_words * emb)
    x_shuf = shuffle_gather(x2d, perm,
                            rows_per_step=rows_per_step
                            ).reshape(n, max_words, emb)

    # Tiny metadata gathers stay in plain XLA (per perf review).
    y_shuf = jnp.take(y_true, perm, axis=0)
    len_shuf = jnp.take(lengths, perm, axis=0)

    # torch.Tensor.split(batchSize): chunks of batch_size, last may be smaller.
    starts = list(range(0, n, batch_size))
    x_list = [x_shuf[s:s + batch_size] for s in starts]
    y_list = [y_shuf[s:s + batch_size] for s in starts]
    len_list = [len_shuf[s:s + batch_size] for s in starts]
    return zip(x_list, len_list, y_list)


if __name__ == "__main__":
    # Synthetic deterministic stand-ins for the GloVe-embedded dataset.
    N, MAX_WORDS, EMB = 40, 8, 50     # rows, padded seq length, GloVe dim
    BATCH = 16

    key = jax.random.PRNGKey(0)
    kx, klab, klen, kperm = jax.random.split(key, 4)

    x = jax.random.normal(kx, (N, MAX_WORDS, EMB), dtype=jnp.float32)
    raw_labels = jax.random.randint(klab, (N,), 0, 2)
    y_true = jnp.stack(
        [(raw_labels == 0).astype(jnp.float32),
         (raw_labels == 1).astype(jnp.float32)], axis=1)          # (N, 2)
    lengths = jax.random.randint(klen, (N,), 1, MAX_WORDS + 1).astype(jnp.int32)

    batches = list(classification_word_loader_forward(
        x, y_true, lengths, BATCH, kperm))

    # Pure-JAX reference (same permutation key -> same permutation).
    perm_ref = jax.random.permutation(kperm, N).astype(jnp.int32)
    x_ref = jnp.take(x, perm_ref, axis=0)
    y_ref = jnp.take(y_true, perm_ref, axis=0)
    l_ref = jnp.take(lengths, perm_ref, axis=0)

    x_cat = jnp.concatenate([b[0] for b in batches], axis=0)
    l_cat = jnp.concatenate([b[1] for b in batches], axis=0)
    y_cat = jnp.concatenate([b[2] for b in batches], axis=0)
    jax.block_until_ready((x_cat, l_cat, y_cat))

    assert x_cat.shape == (N, MAX_WORDS, EMB)
    assert y_cat.shape == (N, 2)
    assert l_cat.shape == (N,)
    assert len(batches) == (N + BATCH - 1) // BATCH
    np.testing.assert_allclose(np.asarray(x_cat), np.asarray(x_ref), rtol=0, atol=0)
    np.testing.assert_allclose(np.asarray(y_cat), np.asarray(y_ref), rtol=0, atol=0)
    np.testing.assert_array_equal(np.asarray(l_cat), np.asarray(l_ref))

    # Extra check: evenly-divisible grid (tail == rows_per_step code path).
    x2 = jax.random.normal(kx, (16, 12 * EMB), dtype=jnp.float32)
    p2 = jax.random.permutation(klen, 16).astype(jnp.int32)
    g2 = shuffle_gather(x2, p2, rows_per_step=8)
    jax.block_until_ready(g2)
    np.testing.assert_allclose(np.asarray(g2), np.asarray(x2[p2]), rtol=0, atol=0)

    print("KERNEL_OK")
</pallas_src>

<mosaic_0001>
module attributes {stable_mosaic.version = 11 : i64} {
  func.func @_gather_kernel(%arg0: i32, %arg1: memref<40xi32, #tpu.memory_space<smem>>, %arg2: memref<40x400xf32, #tpu.memory_space<any>>, %arg3: memref<24x400xf32, #tpu.memory_space<vmem>>, %arg4: memref<16x!tpu.dma_semaphore, #tpu.memory_space<semaphore_mem>>) attributes {dimension_semantics = [#tpu.dimension_semantics<parallel>], iteration_bounds = array<i64: 2>, scalar_prefetch = 1 : i64, scratch_operands = 1 : i64, tpu.core_type = #tpu.core_type<tc>, window_params = [{}, {transform_indices = @transform_1, window_bounds = array<i64: 24, 400>}]} {
    %c24_i32 = arith.constant 24 : i32
    %0 = arith.muli %arg0, %c24_i32 : i32
    %c1_i32 = arith.constant 1 : i32
    %1 = arith.cmpi ne, %arg0, %c1_i32 : i32
    %2 = arith.extui %1 : i1 to i32
    %c0_i32 = arith.constant 0 : i32
    %3 = arith.cmpi ne, %2, %c0_i32 : i32
    scf.if %3 {
      %c0_i32_2 = arith.constant 0 : i32
      %7 = arith.addi %0, %c0_i32_2 : i32
      %8 = arith.index_cast %7 : i32 to index
      %9 = memref.load %arg1[%8] : memref<40xi32, #tpu.memory_space<smem>>
      %c0_i32_3 = arith.constant 0 : i32
      %c0_i32_4 = arith.constant 0 : i32
      %c0_i32_5 = arith.constant 0 : i32
      %10 = tpu.memref_slice %arg2[%9, %c0_i32_5] : memref<40x400xf32, #tpu.memory_space<any>> -> memref<1x400xf32, #tpu.memory_space<any>>
      %11 = tpu.memref_squeeze %10 : memref<1x400xf32, #tpu.memory_space<any>> -> memref<400xf32, #tpu.memory_space<any>>
      %c0_i32_6 = arith.constant 0 : i32
      %12 = tpu.memref_slice %arg3[%c0_i32_3, %c0_i32_6] : memref<24x400xf32, #tpu.memory_space<vmem>> -> memref<1x400xf32, #tpu.memory_space<vmem>>
      %13 = tpu.memref_squeeze %12 : memref<1x400xf32, #tpu.memory_space<vmem>> -> memref<400xf32, #tpu.memory_space<vmem>>
      %14 = tpu.memref_slice %arg4[%c0_i32_4] : memref<16x!tpu.dma_semaphore, #tpu.memory_space<semaphore_mem>> -> memref<1x!tpu.dma_semaphore, #tpu.memory_space<semaphore_mem>>
      %15 = tpu.memref_squeeze %14 : memref<1x!tpu.dma_semaphore, #tpu.memory_space<semaphore_mem>> -> memref<!tpu.dma_semaphore, #tpu.memory_space<semaphore_mem>>
      tpu.enqueue_dma source(%11 : memref<400xf32, #tpu.memory_space<any>>) target(%13 : memref<400xf32, #tpu.memory_space<vmem>>) target_semaphore(%15 : memref<!tpu.dma_semaphore, #tpu.memory_space<semaphore_mem>>)
      %c1_i32_7 = arith.constant 1 : i32
      %16 = arith.addi %0, %c1_i32_7 : i32
      %17 = arith.index_cast %16 : i32 to index
      %18 = memref.load %arg1[%17] : memref<40xi32, #tpu.memory_space<smem>>
      %c1_i32_8 = arith.constant 1 : i32
      %c1_i32_9 = arith.constant 1 : i32
      %c0_i32_10 = arith.constant 0 : i32
      %19 = tpu.memref_slice %arg2[%18, %c0_i32_10] : memref<40x400xf32, #tpu.memory_space<any>> -> memref<1x400xf32, #tpu.memory_space<any>>
      %20 = tpu.memref_squeeze %19 : memref<1x400xf32, #tpu.memory_space<any>> -> memref<400xf32, #tpu.memory_space<any>>
      %c0_i32_11 = arith.constant 0 : i32
      %21 = tpu.memref_slice %arg3[%c1_i32_8, %c0_i32_11] : memref<24x400xf32, #tpu.memory_space<vmem>> -> memref<1x400xf32, #tpu.memory_space<vmem>>
      %22 = tpu.memref_squeeze %21 : memref<1x400xf32, #tpu.memory_space<vmem>> -> memref<400xf32, #tpu.memory_space<vmem>>
      %23 = tpu.memref_slice %arg4[%c1_i32_9] : memref<16x!tpu.dma_semaphore, #tpu.memory_space<semaphore_mem>> -> memref<1x!tpu.dma_semaphore, #tpu.memory_space<semaphore_mem>>
      %24 = tpu.memref_squeeze %23 : memref<1x!tpu.dma_semaphore, #tpu.memory_space<semaphore_mem>> -> memref<!tpu.dma_semaphore, #tpu.memory_space<semaphore_mem>>
      tpu.enqueue_dma source(%20 : memref<400xf32, #tpu.memory_space<any>>) target(%22 : memref<400xf32, #tpu.memory_space<vmem>>) target_semaphore(%24 : memref<!tpu.dma_semaphore, #tpu.memory_space<semaphore_mem>>)
      %c2_i32 = arith.constant 2 : i32
      %25 = arith.addi %0, %c2_i32 : i32
      %26 = arith.index_cast %25 : i32 to index
      %27 = memref.load %arg1[%26] : memref<40xi32, #tpu.memory_space<smem>>
      %c2_i32_12 = arith.constant 2 : i32
      %c2_i32_13 = arith.constant 2 : i32
      %c0_i32_14 = arith.constant 0 : i32
      %28 = tpu.memref_slice %arg2[%27, %c0_i32_14] : memref<40x400xf32, #tpu.memory_space<any>> -> memref<1x400xf32, #tpu.memory_space<any>>
      %29 = tpu.memref_squeeze %28 : memref<1x400xf32, #tpu.memory_space<any>> -> memref<400xf32, #tpu.memory_space<any>>
      %c0_i32_15 = arith.constant 0 : i32
      %30 = tpu.memref_slice %arg3[%c2_i32_12, %c0_i32_15] : memref<24x400xf32, #tpu.memory_space<vmem>> -> memref<1x400xf32, #tpu.memory_space<vmem>>
      %31 = tpu.memref_squeeze %30 : memref<1x400xf32, #tpu.memory_space<vmem>> -> memref<400xf32, #tpu.memory_space<vmem>>
      %32 = tpu.memref_slice %arg4[%c2_i32_13] : memref<16x!tpu.dma_semaphore, #tpu.memory_space<semaphore_mem>> -> memref<1x!tpu.dma_semaphore, #tpu.memory_space<semaphore_mem>>
      %33 = tpu.memref_squeeze %32 : memref<1x!tpu.dma_semaphore, #tpu.memory_space<semaphore_mem>> -> memref<!tpu.dma_semaphore, #tpu.memory_space<semaphore_mem>>
      tpu.enqueue_dma source(%29 : memref<400xf32, #tpu.memory_space<any>>) target(%31 : memref<400xf32, #tpu.memory_space<vmem>>) target_semaphore(%33 : memref<!tpu.dma_semaphore, #tpu.memory_space<semaphore_mem>>)
      %c3_i32 = arith.constant 3 : i32
      %34 = arith.addi %0, %c3_i32 : i32
      %35 = arith.index_cast %34 : i32 to index
      %36 = memref.load %arg1[%35] : memref<40xi32, #tpu.memory_space<smem>>
      %c3_i32_16 = arith.constant 3 : i32
      %c3_i32_17 = arith.constant 3 : i32
      %c0_i32_18 = arith.constant 0 : i32
      %37 = tpu.memref_slice %arg2[%36, %c0_i32_18] : memref<40x400xf32, #tpu.memory_space<any>> -> memref<1x400xf32, #tpu.memory_space<any>>
      %38 = tpu.memref_squeeze %37 : memref<1x400xf32, #tpu.memory_space<any>> -> memref<400xf32, #tpu.memory_space<any>>
      %c0_i32_19 = arith.constant 0 : i32
      %39 = tpu.memref_slice %arg3[%c3_i32_16, %c0_i32_19] : memref<24x400xf32, #tpu.memory_space<vmem>> -> memref<1x400xf32, #tpu.memory_space<vmem>>
      %40 = tpu.memref_squeeze %39 : memref<1x400xf32, #tpu.memory_space<vmem>> -> memref<400xf32, #tpu.memory_space<vmem>>
      %41 = tpu.memref_slice %arg4[%c3_i32_17] : memref<16x!tpu.dma_semaphore, #tpu.memory_space<semaphore_mem>> -> memref<1x!tpu.dma_semaphore, #tpu.memory_space<semaphore_mem>>
      %42 = tpu.memref_squeeze %41 : memref<1x!tpu.dma_semaphore, #tpu.memory_space<semaphore_mem>> -> memref<!tpu.dma_semaphore, #tpu.memory_space<semaphore_mem>>
      tpu.enqueue_dma source(%38 : memref<400xf32, #tpu.memory_space<any>>) target(%40 : memref<400xf32, #tpu.memory_space<vmem>>) target_semaphore(%42 : memref<!tpu.dma_semaphore, #tpu.memory_space<semaphore_mem>>)
      %c4_i32 = arith.constant 4 : i32
      %43 = arith.addi %0, %c4_i32 : i32
      %44 = arith.index_cast %43 : i32 to index
      %45 = memref.load %arg1[%44] : memref<40xi32, #tpu.memory_space<smem>>
      %c4_i32_20 = arith.constant 4 : i32
      %c4_i32_21 = arith.constant 4 : i32
      %c0_i32_22 = arith.constant 0 : i32
      %46 = tpu.memref_slice %arg2[%45, %c0_i32_22] : memref<40x400xf32, #tpu.memory_space<any>> -> memref<1x400xf32, #tpu.memory_space<any>>
      %47 = tpu.memref_squeeze %46 : memref<1x400xf32, #tpu.memory_space<any>> -> memref<400xf32, #tpu.memory_space<any>>
      %c0_i32_23 = arith.constant 0 : i32
      %48 = tpu.memref_slice %arg3[%c4_i32_20, %c0_i32_23] : memref<24x400xf32, #tpu.memory_space<vmem>> -> memref<1x400xf32, #tpu.memory_space<vmem>>
      %49 = tpu.memref_squeeze %48 : memref<1x400xf32, #tpu.memory_space<vmem>> -> memref<400xf32, #tpu.memory_space<vmem>>
      %50 = tpu.memref_slice %arg4[%c4_i32_21] : memref<16x!tpu.dma_semaphore, #tpu.memory_space<semaphore_mem>> -> memref<1x!tpu.dma_semaphore, #tpu.memory_space<semaphore_mem>>
      %51 = tpu.memref_squeeze %50 : memref<1x!tpu.dma_semaphore, #tpu.memory_space<semaphore_mem>> -> memref<!tpu.dma_semaphore, #tpu.memory_space<semaphore_mem>>
      tpu.enqueue_dma source(%47 : memref<400xf32, #tpu.memory_space<any>>) target(%49 : memref<400xf32, #tpu.memory_space<vmem>>) target_semaphore(%51 : memref<!tpu.dma_semaphore, #tpu.memory_space<semaphore_mem>>)
      %c5_i32 = arith.constant 5 : i32
      %52 = arith.addi %0, %c5_i32 : i32
      %53 = arith.index_cast %52 : i32 to index
      %54 = memref.load %arg1[%53] : memref<40xi32, #tpu.memory_space<smem>>
      %c5_i32_24 = arith.constant 5 : i32
      %c5_i32_25 = arith.constant 5 : i32
      %c0_i32_26 = arith.constant 0 : i32
      %55 = tpu.memref_slice %arg2[%54, %c0_i32_26] : memref<40x400xf32, #tpu.memory_space<any>> -> memref<1x400xf32, #tpu.memory_space<any>>
      %56 = tpu.memref_squeeze %55 : memref<1x400xf32, #tpu.memory_space<any>> -> memref<400xf32, #tpu.memory_space<any>>
      %c0_i32_27 = arith.constant 0 : i32
      %57 = tpu.memref_slice %arg3[%c5_i32_24, %c0_i32_27] : memref<24x400xf32, #tpu.memory_space<vmem>> -> memref<1x400xf32, #tpu.memory_space<vmem>>
      %58 = tpu.memref_squeeze %57 : memref<1x400xf32, #tpu.memory_space<vmem>> -> memref<400xf32, #tpu.memory_space<vmem>>
      %59 = tpu.memref_slice %arg4[%c5_i32_25] : memref<16x!tpu.dma_semaphore, #tpu.memory_space<semaphore_mem>> -> memref<1x!tpu.dma_semaphore, #tpu.memory_space<semaphore_mem>>
      %60 = tpu.memref_squeeze %59 : memref<1x!tpu.dma_semaphore, #tpu.memory_space<semaphore_mem>> -> memref<!tpu.dma_semaphore, #tpu.memory_space<semaphore_mem>>
      tpu.enqueue_dma source(%56 : memref<400xf32, #tpu.memory_space<any>>) target(%58 : memref<400xf32, #tpu.memory_space<vmem>>) target_semaphore(%60 : memref<!tpu.dma_semaphore, #tpu.memory_space<semaphore_mem>>)
      %c6_i32 = arith.constant 6 : i32
      %61 = arith.addi %0, %c6_i32 : i32
      %62 = arith.index_cast %61 : i32 to index
      %63 = memref.load %arg1[%62] : memref<40xi32, #tpu.memory_space<smem>>
      %c6_i32_28 = arith.constant 6 : i32
      %c6_i32_29 = arith.constant 6 : i32
      %c0_i32_30 = arith.constant 0 : i32
      %64 = tpu.memref_slice %arg2[%63, %c0_i32_30] : memref<40x400xf32, #tpu.memory_space<any>> -> memref<1x400xf32, #tpu.memory_space<any>>
      %65 = tpu.memref_squeeze %64 : memref<1x400xf32, #tpu.memory_space<any>> -> memref<400xf32, #tpu.memory_space<any>>
      %c0_i32_31 = arith.constant 0 : i32
      %66 = tpu.memref_slice %arg3[%c6_i32_28, %c0_i32_31] : memref<24x400xf32, #tpu.memory_space<vmem>> -> memref<1x400xf32, #tpu.memory_space<vmem>>
      %67 = tpu.memref_squeeze %66 : memref<1x400xf32, #tpu.memory_space<vmem>> -> memref<400xf32, #tpu.memory_space<vmem>>
      %68 = tpu.memref_slice %arg4[%c6_i32_29] : memref<16x!tpu.dma_semaphore, #tpu.memory_space<semaphore_mem>> -> memref<1x!tpu.dma_semaphore, #tpu.memory_space<semaphore_mem>>
      %69 = tpu.memref_squeeze %68 : memref<1x!tpu.dma_semaphore, #tpu.memory_space<semaphore_mem>> -> memref<!tpu.dma_semaphore, #tpu.memory_space<semaphore_mem>>
      tpu.enqueue_dma source(%65 : memref<400xf32, #tpu.memory_space<any>>) target(%67 : memref<400xf32, #tpu.memory_space<vmem>>) target_semaphore(%69 : memref<!tpu.dma_semaphore, #tpu.memory_space<semaphore_mem>>)
      %c7_i32 = arith.constant 7 : i32
      %70 = arith.addi %0, %c7_i32 : i32
      %71 = arith.index_cast %70 : i32 to index
      %72 = memref.load %arg1[%71] : memref<40xi32, #tpu.memory_space<smem>>
      %c7_i32_32 = arith.constant 7 : i32
      %c7_i32_33 = arith.constant 7 : i32
      %c0_i32_34 = arith.constant 0 : i32
      %73 = tpu.memref_slice %arg2[%72, %c0_i32_34] : memref<40x400xf32, #tpu.memory_space<any>> -> memref<1x400xf32, #tpu.memory_space<any>>
      %74 = tpu.memref_squeeze %73 : memref<1x400xf32, #tpu.memory_space<any>> -> memref<400xf32, #tpu.memory_space<any>>
      %c0_i32_35 = arith.constant 0 : i32
      %75 = tpu.memref_slice %arg3[%c7_i32_32, %c0_i32_35] : memref<24x400xf32, #tpu.memory_space<vmem>> -> memref<1x400xf32, #tpu.memory_space<vmem>>
      %76 = tpu.memref_squeeze %75 : memref<1x400xf32, #tpu.memory_space<vmem>> -> memref<400xf32, #tpu.memory_space<vmem>>
      %77 = tpu.memref_slice %arg4[%c7_i32_33] : memref<16x!tpu.dma_semaphore, #tpu.memory_space<semaphore_mem>> -> memref<1x!tpu.dma_semaphore, #tpu.memory_space<semaphore_mem>>
      %78 = tpu.memref_squeeze %77 : memref<1x!tpu.dma_semaphore, #tpu.memory_space<semaphore_mem>> -> memref<!tpu.dma_semaphore, #tpu.memory_space<semaphore_mem>>
      tpu.enqueue_dma source(%74 : memref<400xf32, #tpu.memory_space<any>>) target(%76 : memref<400xf32, #tpu.memory_space<vmem>>) target_semaphore(%78 : memref<!tpu.dma_semaphore, #tpu.memory_space<semaphore_mem>>)
      %c8_i32 = arith.constant 8 : i32
      %79 = arith.addi %0, %c8_i32 : i32
      %80 = arith.index_cast %79 : i32 to index
      %81 = memref.load %arg1[%80] : memref<40xi32, #tpu.memory_space<smem>>
      %c8_i32_36 = arith.constant 8 : i32
      %c8_i32_37 = arith.constant 8 : i32
      %c0_i32_38 = arith.constant 0 : i32
      %82 = tpu.memref_slice %arg2[%81, %c0_i32_38] : memref<40x400xf32, #tpu.memory_space<any>> -> memref<1x400xf32, #tpu.memory_space<any>>
      %83 = tpu.memref_squeeze %82 : memref<1x400xf32, #tpu.memory_space<any>> -> memref<400xf32, #tpu.memory_space<any>>
      %c0_i32_39 = arith.constant 0 : i32
      %84 = tpu.memref_slice %arg3[%c8_i32_36, %c0_i32_39] : memref<24x400xf32, #tpu.memory_space<vmem>> -> memref<1x400xf32, #tpu.memory_space<vmem>>
      %85 = tpu.memref_squeeze %84 : memref<1x400xf32, #tpu.memory_space<vmem>> -> memref<400xf32, #tpu.memory_space<vmem>>
      %86 = tpu.memref_slice %arg4[%c8_i32_37] : memref<16x!tpu.dma_semaphore, #tpu.memory_space<semaphore_mem>> -> memref<1x!tpu.dma_semaphore, #tpu.memory_space<semaphore_mem>>
      %87 = tpu.memref_squeeze %86 : memref<1x!tpu.dma_semaphore, #tpu.memory_space<semaphore_mem>> -> memref<!tpu.dma_semaphore, #tpu.memory_space<semaphore_mem>>
      tpu.enqueue_dma source(%83 : memref<400xf32, #tpu.memory_space<any>>) target(%85 : memref<400xf32, #tpu.memory_space<vmem>>) target_semaphore(%87 : memref<!tpu.dma_semaphore, #tpu.memory_space<semaphore_mem>>)
      %c9_i32 = arith.constant 9 : i32
      %88 = arith.addi %0, %c9_i32 : i32
      %89 = arith.index_cast %88 : i32 to index
      %90 = memref.load %arg1[%89] : memref<40xi32, #tpu.memory_space<smem>>
      %c9_i32_40 = arith.constant 9 : i32
      %c9_i32_41 = arith.constant 9 : i32
      %c0_i32_42 = arith.constant 0 : i32
      %91 = tpu.memref_slice %arg2[%90, %c0_i32_42] : memref<40x400xf32, #tpu.memory_space<any>> -> memref<1x400xf32, #tpu.memory_space<any>>
      %92 = tpu.memref_squeeze %91 : memref<1x400xf32, #tpu.memory_space<any>> -> memref<400xf32, #tpu.memory_space<any>>
      %c0_i32_43 = arith.constant 0 : i32
      %93 = tpu.memref_slice %arg3[%c9_i32_40, %c0_i32_43] : memref<24x400xf32, #tpu.memory_space<vmem>> -> memref<1x400xf32, #tpu.memory_space<vmem>>
      %94 = tpu.memref_squeeze %93 : memref<1x400xf32, #tpu.memory_space<vmem>> -> memref<400xf32, #tpu.memory_space<vmem>>
      %95 = tpu.memref_slice %arg4[%c9_i32_41] : memref<16x!tpu.dma_semaphore, #tpu.memory_space<semaphore_mem>> -> memref<1x!tpu.dma_semaphore, #tpu.memory_space<semaphore_mem>>
      %96 = tpu.memref_squeeze %95 : memref<1x!tpu.dma_semaphore, #tpu.memory_space<semaphore_mem>> -> memref<!tpu.dma_semaphore, #tpu.memory_space<semaphore_mem>>
      tpu.enqueue_dma source(%92 : memref<400xf32, #tpu.memory_space<any>>) target(%94 : memref<400xf32, #tpu.memory_space<vmem>>) target_semaphore(%96 : memref<!tpu.dma_semaphore, #tpu.memory_space<semaphore_mem>>)
      %c10_i32 = arith.constant 10 : i32
      %97 = arith.addi %0, %c10_i32 : i32
      %98 = arith.index_cast %97 : i32 to index
      %99 = memref.load %arg1[%98] : memref<40xi32, #tpu.memory_space<smem>>
      %c10_i32_44 = arith.constant 10 : i32
      %c10_i32_45 = arith.constant 10 : i32
      %c0_i32_46 = arith.constant 0 : i32
      %100 = tpu.memref_slice %arg2[%99, %c0_i32_46] : memref<40x400xf32, #tpu.memory_space<any>> -> memref<1x400xf32, #tpu.memory_space<any>>
      %101 = tpu.memref_squeeze %100 : memref<1x400xf32, #tpu.memory_space<any>> -> memref<400xf32, #tpu.memory_space<any>>
      %c0_i32_47 = arith.constant 0 : i32
      %102 = tpu.memref_slice %arg3[%c10_i32_44, %c0_i32_47] : memref<24x400xf32, #tpu.memory_space<vmem>> -> memref<1x400xf32, #tpu.memory_space<vmem>>
      %103 = tpu.memref_squeeze %102 : memref<1x400xf32, #tpu.memory_space<vmem>> -> memref<400xf32, #tpu.memory_space<vmem>>
      %104 = tpu.memref_slice %arg4[%c10_i32_45] : memref<16x!tpu.dma_semaphore, #tpu.memory_space<semaphore_mem>> -> memref<1x!tpu.dma_semaphore, #tpu.memory_space<semaphore_mem>>
      %105 = tpu.memref_squeeze %104 : memref<1x!tpu.dma_semaphore, #tpu.memory_space<semaphore_mem>> -> memref<!tpu.dma_semaphore, #tpu.memory_space<semaphore_mem>>
      tpu.enqueue_dma source(%101 : memref<400xf32, #tpu.memory_space<any>>) target(%103 : memref<400xf32, #tpu.memory_space<vmem>>) target_semaphore(%105 : memref<!tpu.dma_semaphore, #tpu.memory_space<semaphore_mem>>)
      %c11_i32 = arith.constant 11 : i32
      %106 = arith.addi %0, %c11_i32 : i32
      %107 = arith.index_cast %106 : i32 to index
      %108 = memref.load %arg1[%107] : memref<40xi32, #tpu.memory_space<smem>>
      %c11_i32_48 = arith.constant 11 : i32
      %c11_i32_49 = arith.constant 11 : i32
      %c0_i32_50 = arith.constant 0 : i32
      %109 = tpu.memref_slice %arg2[%108, %c0_i32_50] : memref<40x400xf32, #tpu.memory_space<any>> -> memref<1x400xf32, #tpu.memory_space<any>>
      %110 = tpu.memref_squeeze %109 : memref<1x400xf32, #tpu.memory_space<any>> -> memref<400xf32, #tpu.memory_space<any>>
      %c0_i32_51 = arith.constant 0 : i32
      %111 = tpu.memref_slice %arg3[%c11_i32_48, %c0_i32_51] : memref<24x400xf32, #tpu.memory_space<vmem>> -> memref<1x400xf32, #tpu.memory_space<vmem>>
      %112 = tpu.memref_squeeze %111 : memref<1x400xf32, #tpu.memory_space<vmem>> -> memref<400xf32, #tpu.memory_space<vmem>>
      %113 = tpu.memref_slice %arg4[%c11_i32_49] : memref<16x!tpu.dma_semaphore, #tpu.memory_space<semaphore_mem>> -> memref<1x!tpu.dma_semaphore, #tpu.memory_space<semaphore_mem>>
      %114 = tpu.memref_squeeze %113 : memref<1x!tpu.dma_semaphore, #tpu.memory_space<semaphore_mem>> -> memref<!tpu.dma_semaphore, #tpu.memory_space<semaphore_mem>>
      tpu.enqueue_dma source(%110 : memref<400xf32, #tpu.memory_space<any>>) target(%112 : memref<400xf32, #tpu.memory_space<vmem>>) target_semaphore(%114 : memref<!tpu.dma_semaphore, #tpu.memory_space<semaphore_mem>>)
      %c12_i32 = arith.constant 12 : i32
      %115 = arith.addi %0, %c12_i32 : i32
      %116 = arith.index_cast %115 : i32 to index
      %117 = memref.load %arg1[%116] : memref<40xi32, #tpu.memory_space<smem>>
      %c12_i32_52 = arith.constant 12 : i32
      %c12_i32_53 = arith.constant 12 : i32
      %c0_i32_54 = arith.constant 0 : i32
      %118 = tpu.memref_slice %arg2[%117, %c0_i32_54] : memref<40x400xf32, #tpu.memory_space<any>> -> memref<1x400xf32, #tpu.memory_space<any>>
      %119 = tpu.memref_squeeze %118 : memref<1x400xf32, #tpu.memory_space<any>> -> memref<400xf32, #tpu.memory_space<any>>
      %c0_i32_55 = arith.constant 0 : i32
      %120 = tpu.memref_slice %arg3[%c12_i32_52, %c0_i32_55] : memref<24x400xf32, #tpu.memory_space<vmem>> -> memref<1x400xf32, #tpu.memory_space<vmem>>
      %121 = tpu.memref_squeeze %120 : memref<1x400xf32, #tpu.memory_space<vmem>> -> memref<400xf32, #tpu.memory_space<vmem>>
      %122 = tpu.memref_slice %arg4[%c12_i32_53] : memref<16x!tpu.dma_semaphore, #tpu.memory_space<semaphore_mem>> -> memref<1x!tpu.dma_semaphore, #tpu.memory_space<semaphore_mem>>
      %123 = tpu.memref_squeeze %122 : memref<1x!tpu.dma_semaphore, #tpu.memory_space<semaphore_mem>> -> memref<!tpu.dma_semaphore, #tpu.memory_space<semaphore_mem>>
      tpu.enqueue_dma source(%119 : memref<400xf32, #tpu.memory_space<any>>) target(%121 : memref<400xf32, #tpu.memory_space<vmem>>) target_semaphore(%123 : memref<!tpu.dma_semaphore, #tpu.memory_space<semaphore_mem>>)
      %c13_i32 = arith.constant 13 : i32
      %124 = arith.addi %0, %c13_i32 : i32
      %125 = arith.index_cast %124 : i32 to index
      %126 = memref.load %arg1[%125] : memref<40xi32, #tpu.memory_space<smem>>
      %c13_i32_56 = arith.constant 13 : i32
      %c13_i32_57 = arith.constant 13 : i32
      %c0_i32_58 = arith.constant 0 : i32
      %127 = tpu.memref_slice %arg2[%126, %c0_i32_58] : memref<40x400xf32, #tpu.memory_space<any>> -> memref<1x400xf32, #tpu.memory_space<any>>
      %128 = tpu.memref_squeeze %127 : memref<1x400xf32, #tpu.memory_space<any>> -> memref<400xf32, #tpu.memory_space<any>>
      %c0_i32_59 = arith.constant 0 : i32
      %129 = tpu.memref_slice %arg3[%c13_i32_56, %c0_i32_59] : memref<24x400xf32, #tpu.memory_space<vmem>> -> memref<1x400xf32, #tpu.memory_space<vmem>>
      %130 = tpu.memref_squeeze %129 : memref<1x400xf32, #tpu.memory_space<vmem>> -> memref<400xf32, #tpu.memory_space<vmem>>
      %131 = tpu.memref_slice %arg4[%c13_i32_57] : memref<16x!tpu.dma_semaphore, #tpu.memory_space<semaphore_mem>> -> memref<1x!tpu.dma_semaphore, #tpu.memory_space<semaphore_mem>>
      %132 = tpu.memref_squeeze %131 : memref<1x!tpu.dma_semaphore, #tpu.memory_space<semaphore_mem>> -> memref<!tpu.dma_semaphore, #tpu.memory_space<semaphore_mem>>
      tpu.enqueue_dma source(%128 : memref<400xf32, #tpu.memory_space<any>>) target(%130 : memref<400xf32, #tpu.memory_space<vmem>>) target_semaphore(%132 : memref<!tpu.dma_semaphore, #tpu.memory_space<semaphore_mem>>)
      %c14_i32 = arith.constant 14 : i32
      %133 = arith.addi %0, %c14_i32 : i32
      %134 = arith.index_cast %133 : i32 to index
      %135 = memref.load %arg1[%134] : memref<40xi32, #tpu.memory_space<smem>>
      %c14_i32_60 = arith.constant 14 : i32
      %c14_i32_61 = arith.constant 14 : i32
      %c0_i32_62 = arith.constant 0 : i32
      %136 = tpu.memref_slice %arg2[%135, %c0_i32_62] : memref<40x400xf32, #tpu.memory_space<any>> -> memref<1x400xf32, #tpu.memory_space<any>>
      %137 = tpu.memref_squeeze %136 : memref<1x400xf32, #tpu.memory_space<any>> -> memref<400xf32, #tpu.memory_space<any>>
      %c0_i32_63 = arith.constant 0 : i32
      %138 = tpu.memref_slice %arg3[%c14_i32_60, %c0_i32_63] : memref<24x400xf32, #tpu.memory_space<vmem>> -> memref<1x400xf32, #tpu.memory_space<vmem>>
      %139 = tpu.memref_squeeze %138 : memref<1x400xf32, #tpu.memory_space<vmem>> -> memref<400xf32, #tpu.memory_space<vmem>>
      %140 = tpu.memref_slice %arg4[%c14_i32_61] : memref<16x!tpu.dma_semaphore, #tpu.memory_space<semaphore_mem>> -> memref<1x!tpu.dma_semaphore, #tpu.memory_space<semaphore_mem>>
      %141 = tpu.memref_squeeze %140 : memref<1x!tpu.dma_semaphore, #tpu.memory_space<semaphore_mem>> -> memref<!tpu.dma_semaphore, #tpu.memory_space<semaphore_mem>>
      tpu.enqueue_dma source(%137 : memref<400xf32, #tpu.memory_space<any>>) target(%139 : memref<400xf32, #tpu.memory_space<vmem>>) target_semaphore(%141 : memref<!tpu.dma_semaphore, #tpu.memory_space<semaphore_mem>>)
      %c15_i32 = arith.constant 15 : i32
      %142 = arith.addi %0, %c15_i32 : i32
      %143 = arith.index_cast %142 : i32 to index
      %144 = memref.load %arg1[%143] : memref<40xi32, #tpu.memory_space<smem>>
      %c15_i32_64 = arith.constant 15 : i32
      %c15_i32_65 = arith.constant 15 : i32
      %c0_i32_66 = arith.constant 0 : i32
      %145 = tpu.memref_slice %arg2[%144, %c0_i32_66] : memref<40x400xf32, #tpu.memory_space<any>> -> memref<1x400xf32, #tpu.memory_space<any>>
      %146 = tpu.memref_squeeze %145 : memref<1x400xf32, #tpu.memory_space<any>> -> memref<400xf32, #tpu.memory_space<any>>
      %c0_i32_67 = arith.constant 0 : i32
      %147 = tpu.memref_slice %arg3[%c15_i32_64, %c0_i32_67] : memref<24x400xf32, #tpu.memory_space<vmem>> -> memref<1x400xf32, #tpu.memory_space<vmem>>
      %148 = tpu.memref_squeeze %147 : memref<1x400xf32, #tpu.memory_space<vmem>> -> memref<400xf32, #tpu.memory_space<vmem>>
      %149 = tpu.memref_slice %arg4[%c15_i32_65] : memref<16x!tpu.dma_semaphore, #tpu.memory_space<semaphore_mem>> -> memref<1x!tpu.dma_semaphore, #tpu.memory_space<semaphore_mem>>
      %150 = tpu.memref_squeeze %149 : memref<1x!tpu.dma_semaphore, #tpu.memory_space<semaphore_mem>> -> memref<!tpu.dma_semaphore, #tpu.memory_space<semaphore_mem>>
      tpu.enqueue_dma source(%146 : memref<400xf32, #tpu.memory_space<any>>) target(%148 : memref<400xf32, #tpu.memory_space<vmem>>) target_semaphore(%150 : memref<!tpu.dma_semaphore, #tpu.memory_space<semaphore_mem>>)
      %c16_i32 = arith.constant 16 : i32
      %151 = arith.addi %0, %c16_i32 : i32
      %152 = arith.index_cast %151 : i32 to index
      %153 = memref.load %arg1[%152] : memref<40xi32, #tpu.memory_space<smem>>
      %c16_i32_68 = arith.constant 16 : i32
      %c0_i32_69 = arith.constant 0 : i32
      %154 = arith.cmpi eq, %c16_i32_68, %c0_i32_69 : i32
      %c1_i32_70 = arith.constant 1 : i32
      %155 = arith.select %154, %c1_i32_70, %c16_i32_68 : i32
      %156 = arith.remsi %c16_i32, %155 : i32
      %c0_i32_71 = arith.constant 0 : i32
      %157 = arith.cmpi ne, %156, %c0_i32_71 : i32
      %c0_i32_72 = arith.constant 0 : i32
      %158 = arith.cmpi slt, %156, %c0_i32_72 : i32
      %c0_i32_73 = arith.constant 0 : i32
      %159 = arith.cmpi slt, %155, %c0_i32_73 : i32
      %160 = arith.xori %158, %159 : i1
      %161 = arith.andi %160, %157 : i1
      %162 = arith.addi %156, %155 : i32
      %163 = arith.select %161, %162, %156 : i32
      %c0_i32_74 = arith.constant 0 : i32
      %c0_i32_75 = arith.constant 0 : i32
      %c0_i32_76 = arith.constant 0 : i32
      %164 = tpu.memref_slice %arg2[%c0_i32_74, %c0_i32_76] : memref<40x400xf32, #tpu.memory_space<any>> -> memref<1x400xf32, #tpu.memory_space<any>>
      %165 = tpu.memref_squeeze %164 : memref<1x400xf32, #tpu.memory_space<any>> -> memref<400xf32, #tpu.memory_space<any>>
      %c0_i32_77 = arith.constant 0 : i32
      %166 = tpu.memref_slice %arg3[%c0_i32_75, %c0_i32_77] : memref<24x400xf32, #tpu.memory_space<vmem>> -> memref<1x400xf32, #tpu.memory_space<vmem>>
      %167 = tpu.memref_squeeze %166 : memref<1x400xf32, #tpu.memory_space<vmem>> -> memref<400xf32, #tpu.memory_space<vmem>>
      %168 = tpu.memref_slice %arg4[%163] : memref<16x!tpu.dma_semaphore, #tpu.memory_space<semaphore_mem>> -> memref<1x!tpu.dma_semaphore, #tpu.memory_space<semaphore_mem>>
      %169 = tpu.memref_squeeze %168 : memref<1x!tpu.dma_semaphore, #tpu.memory_space<semaphore_mem>> -> memref<!tpu.dma_semaphore, #tpu.memory_space<semaphore_mem>>
      tpu.wait_dma2 semaphore(%169 : memref<!tpu.dma_semaphore, #tpu.memory_space<semaphore_mem>>) src(%165 : memref<400xf32, #tpu.memory_space<any>>) dst(%167 : memref<400xf32, #tpu.memory_space<vmem>>)
      %c16_i32_78 = arith.constant 16 : i32
      %c0_i32_79 = arith.constant 0 : i32
      %170 = arith.cmpi eq, %c16_i32_78, %c0_i32_79 : i32
      %c1_i32_80 = arith.constant 1 : i32
      %171 = arith.select %170, %c1_i32_80, %c16_i32_78 : i32
      %172 = arith.remsi %c16_i32, %171 : i32
      %c0_i32_81 = arith.constant 0 : i32
      %173 = arith.cmpi ne, %172, %c0_i32_81 : i32
      %c0_i32_82 = arith.constant 0 : i32
      %174 = arith.cmpi slt, %172, %c0_i32_82 : i32
      %c0_i32_83 = arith.constant 0 : i32
      %175 = arith.cmpi slt, %171, %c0_i32_83 : i32
      %176 = arith.xori %174, %175 : i1
      %177 = arith.andi %176, %173 : i1
      %178 = arith.addi %172, %171 : i32
      %179 = arith.select %177, %178, %172 : i32
      %c0_i32_84 = arith.constant 0 : i32
      %180 = tpu.memref_slice %arg2[%153, %c0_i32_84] : memref<40x400xf32, #tpu.memory_space<any>> -> memref<1x400xf32, #tpu.memory_space<any>>
      %181 = tpu.memref_squeeze %180 : memref<1x400xf32, #tpu.memory_space<any>> -> memref<400xf32, #tpu.memory_space<any>>
      %c0_i32_85 = arith.constant 0 : i32
      %182 = tpu.memref_slice %arg3[%c16_i32, %c0_i32_85] : memref<24x400xf32, #tpu.memory_space<vmem>> -> memref<1x400xf32, #tpu.memory_space<vmem>>
      %183 = tpu.memref_squeeze %182 : memref<1x400xf32, #tpu.memory_space<vmem>> -> memref<400xf32, #tpu.memory_space<vmem>>
      %184 = tpu.memref_slice %arg4[%179] : memref<16x!tpu.dma_semaphore, #tpu.memory_space<semaphore_mem>> -> memref<1x!tpu.dma_semaphore, #tpu.memory_space<semaphore_mem>>
      %185 = tpu.memref_squeeze %184 : memref<1x!tpu.dma_semaphore, #tpu.memory_space<semaphore_mem>> -> memref<!tpu.dma_semaphore, #tpu.memory_space<semaphore_mem>>
      tpu.enqueue_dma source(%181 : memref<400xf32, #tpu.memory_space<any>>) target(%183 : memref<400xf32, #tpu.memory_space<vmem>>) target_semaphore(%185 : memref<!tpu.dma_semaphore, #tpu.memory_space<semaphore_mem>>)
      %c17_i32 = arith.constant 17 : i32
      %186 = arith.addi %0, %c17_i32 : i32
      %187 = arith.index_cast %186 : i32 to index
      %188 = memref.load %arg1[%187] : memref<40xi32, #tpu.memory_space<smem>>
      %c16_i32_86 = arith.constant 16 : i32
      %c0_i32_87 = arith.constant 0 : i32
      %189 = arith.cmpi eq, %c16_i32_86, %c0_i32_87 : i32
      %c1_i32_88 = arith.constant 1 : i32
      %190 = arith.select %189, %c1_i32_88, %c16_i32_86 : i32
      %191 = arith.remsi %c17_i32, %190 : i32
      %c0_i32_89 = arith.constant 0 : i32
      %192 = arith.cmpi ne, %191, %c0_i32_89 : i32
      %c0_i32_90 = arith.constant 0 : i32
      %193 = arith.cmpi slt, %191, %c0_i32_90 : i32
      %c0_i32_91 = arith.constant 0 : i32
      %194 = arith.cmpi slt, %190, %c0_i32_91 : i32
      %195 = arith.xori %193, %194 : i1
      %196 = arith.andi %195, %192 : i1
      %197 = arith.addi %191, %190 : i32
      %198 = arith.select %196, %197, %191 : i32
      %c0_i32_92 = arith.constant 0 : i32
      %c0_i32_93 = arith.constant 0 : i32
      %c0_i32_94 = arith.constant 0 : i32
      %199 = tpu.memref_slice %arg2[%c0_i32_92, %c0_i32_94] : memref<40x400xf32, #tpu.memory_space<any>> -> memref<1x400xf32, #tpu.memory_space<any>>
      %200 = tpu.memref_squeeze %199 : memref<1x400xf32, #tpu.memory_space<any>> -> memref<400xf32, #tpu.memory_space<any>>
      %c0_i32_95 = arith.constant 0 : i32
      %201 = tpu.memref_slice %arg3[%c0_i32_93, %c0_i32_95] : memref<24x400xf32, #tpu.memory_space<vmem>> -> memref<1x400xf32, #tpu.memory_space<vmem>>
      %202 = tpu.memref_squeeze %201 : memref<1x400xf32, #tpu.memory_space<vmem>> -> memref<400xf32, #tpu.memory_space<vmem>>
      %203 = tpu.memref_slice %arg4[%198] : memref<16x!tpu.dma_semaphore, #tpu.memory_space<semaphore_mem>> -> memref<1x!tpu.dma_semaphore, #tpu.memory_space<semaphore_mem>>
      %204 = tpu.memref_squeeze %203 : memref<1x!tpu.dma_semaphore, #tpu.memory_space<semaphore_mem>> -> memref<!tpu.dma_semaphore, #tpu.memory_space<semaphore_mem>>
      tpu.wait_dma2 semaphore(%204 : memref<!tpu.dma_semaphore, #tpu.memory_space<semaphore_mem>>) src(%200 : memref<400xf32, #tpu.memory_space<any>>) dst(%202 : memref<400xf32, #tpu.memory_space<vmem>>)
      %c16_i32_96 = arith.constant 16 : i32
      %c0_i32_97 = arith.constant 0 : i32
      %205 = arith.cmpi eq, %c16_i32_96, %c0_i32_97 : i32
      %c1_i32_98 = arith.constant 1 : i32
      %206 = arith.select %205, %c1_i32_98, %c16_i32_96 : i32
      %207 = arith.remsi %c17_i32, %206 : i32
      %c0_i32_99 = arith.constant 0 : i32
      %208 = arith.cmpi ne, %207, %c0_i32_99 : i32
      %c0_i32_100 = arith.constant 0 : i32
      %209 = arith.cmpi slt, %207, %c0_i32_100 : i32
      %c0_i32_101 = arith.constant 0 : i32
      %210 = arith.cmpi slt, %206, %c0_i32_101 : i32
      %211 = arith.xori %209, %210 : i1
      %212 = arith.andi %211, %208 : i1
      %213 = arith.addi %207, %206 : i32
      %214 = arith.select %212, %213, %207 : i32
      %c0_i32_102 = arith.constant 0 : i32
      %215 = tpu.memref_slice %arg2[%188, %c0_i32_102] : memref<40x400xf32, #tpu.memory_space<any>> -> memref<1x400xf32, #tpu.memory_space<any>>
      %216 = tpu.memref_squeeze %215 : memref<1x400xf32, #tpu.memory_space<any>> -> memref<400xf32, #tpu.memory_space<any>>
      %c0_i32_103 = arith.constant 0 : i32
      %217 = tpu.memref_slice %arg3[%c17_i32, %c0_i32_103] : memref<24x400xf32, #tpu.memory_space<vmem>> -> memref<1x400xf32, #tpu.memory_space<vmem>>
      %218 = tpu.memref_squeeze %217 : memref<1x400xf32, #tpu.memory_space<vmem>> -> memref<400xf32, #tpu.memory_space<vmem>>
      %219 = tpu.memref_slice %arg4[%214] : memref<16x!tpu.dma_semaphore, #tpu.memory_space<semaphore_mem>> -> memref<1x!tpu.dma_semaphore, #tpu.memory_space<semaphore_mem>>
      %220 = tpu.memref_squeeze %219 : memref<1x!tpu.dma_semaphore, #tpu.memory_space<semaphore_mem>> -> memref<!tpu.dma_semaphore, #tpu.memory_space<semaphore_mem>>
      tpu.enqueue_dma source(%216 : memref<400xf32, #tpu.memory_space<any>>) target(%218 : memref<400xf32, #tpu.memory_space<vmem>>) target_semaphore(%220 : memref<!tpu.dma_semaphore, #tpu.memory_space<semaphore_mem>>)
      %c18_i32 = arith.constant 18 : i32
      %221 = arith.addi %0, %c18_i32 : i32
      %222 = arith.index_cast %221 : i32 to index
      %223 = memref.load %arg1[%222] : memref<40xi32, #tpu.memory_space<smem>>
      %c16_i32_104 = arith.constant 16 : i32
      %c0_i32_105 = arith.constant 0 : i32
      %224 = arith.cmpi eq, %c16_i32_104, %c0_i32_105 : i32
      %c1_i32_106 = arith.constant 1 : i32
      %225 = arith.select %224, %c1_i32_106, %c16_i32_104 : i32
      %226 = arith.remsi %c18_i32, %225 : i32
      %c0_i32_107 = arith.constant 0 : i32
      %227 = arith.cmpi ne, %226, %c0_i32_107 : i32
      %c0_i32_108 = arith.constant 0 : i32
      %228 = arith.cmpi slt, %226, %c0_i32_108 : i32
      %c0_i32_109 = arith.constant 0 : i32
      %229 = arith.cmpi slt, %225, %c0_i32_109 : i32
      %230 = arith.xori %228, %229 : i1
      %231 = arith.andi %230, %227 : i1
      %232 = arith.addi %226, %225 : i32
      %233 = arith.select %231, %232, %226 : i32
      %c0_i32_110 = arith.constant 0 : i32
      %c0_i32_111 = arith.constant 0 : i32
      %c0_i32_112 = arith.constant 0 : i32
      %234 = tpu.memref_slice %arg2[%c0_i32_110, %c0_i32_112] : memref<40x400xf32, #tpu.memory_space<any>> -> memref<1x400xf32, #tpu.memory_space<any>>
      %235 = tpu.memref_squeeze %234 : memref<1x400xf32, #tpu.memory_space<any>> -> memref<400xf32, #tpu.memory_space<any>>
      %c0_i32_113 = arith.constant 0 : i32
      %236 = tpu.memref_slice %arg3[%c0_i32_111, %c0_i32_113] : memref<24x400xf32, #tpu.memory_space<vmem>> -> memref<1x400xf32, #tpu.memory_space<vmem>>
      %237 = tpu.memref_squeeze %236 : memref<1x400xf32, #tpu.memory_space<vmem>> -> memref<400xf32, #tpu.memory_space<vmem>>
      %238 = tpu.memref_slice %arg4[%233] : memref<16x!tpu.dma_semaphore, #tpu.memory_space<semaphore_mem>> -> memref<1x!tpu.dma_semaphore, #tpu.memory_space<semaphore_mem>>
      %239 = tpu.memref_squeeze %238 : memref<1x!tpu.dma_semaphore, #tpu.memory_space<semaphore_mem>> -> memref<!tpu.dma_semaphore, #tpu.memory_space<semaphore_mem>>
      tpu.wait_dma2 semaphore(%239 : memref<!tpu.dma_semaphore, #tpu.memory_space<semaphore_mem>>) src(%235 : memref<400xf32, #tpu.memory_space<any>>) dst(%237 : memref<400xf32, #tpu.memory_space<vmem>>)
      %c16_i32_114 = arith.constant 16 : i32
      %c0_i32_115 = arith.constant 0 : i32
      %240 = arith.cmpi eq, %c16_i32_114, %c0_i32_115 : i32
      %c1_i32_116 = arith.constant 1 : i32
      %241 = arith.select %240, %c1_i32_116, %c16_i32_114 : i32
      %242 = arith.remsi %c18_i32, %241 : i32
      %c0_i32_117 = arith.constant 0 : i32
      %243 = arith.cmpi ne, %242, %c0_i32_117 : i32
      %c0_i32_118 = arith.constant 0 : i32
      %244 = arith.cmpi slt, %242, %c0_i32_118 : i32
      %c0_i32_119 = arith.constant 0 : i32
      %245 = arith.cmpi slt, %241, %c0_i32_119 : i32
      %246 = arith.xori %244, %245 : i1
      %247 = arith.andi %246, %243 : i1
      %248 = arith.addi %242, %241 : i32
      %249 = arith.select %247, %248, %242 : i32
      %c0_i32_120 = arith.constant 0 : i32
      %250 = tpu.memref_slice %arg2[%223, %c0_i32_120] : memref<40x400xf32, #tpu.memory_space<any>> -> memref<1x400xf32, #tpu.memory_space<any>>
      %251 = tpu.memref_squeeze %250 : memref<1x400xf32, #tpu.memory_space<any>> -> memref<400xf32, #tpu.memory_space<any>>
      %c0_i32_121 = arith.constant 0 : i32
      %252 = tpu.memref_slice %arg3[%c18_i32, %c0_i32_121] : memref<24x400xf32, #tpu.memory_space<vmem>> -> memref<1x400xf32, #tpu.memory_space<vmem>>
      %253 = tpu.memref_squeeze %252 : memref<1x400xf32, #tpu.memory_space<vmem>> -> memref<400xf32, #tpu.memory_space<vmem>>
      %254 = tpu.memref_slice %arg4[%249] : memref<16x!tpu.dma_semaphore, #tpu.memory_space<semaphore_mem>> -> memref<1x!tpu.dma_semaphore, #tpu.memory_space<semaphore_mem>>
      %255 = tpu.memref_squeeze %254 : memref<1x!tpu.dma_semaphore, #tpu.memory_space<semaphore_mem>> -> memref<!tpu.dma_semaphore, #tpu.memory_space<semaphore_mem>>
      tpu.enqueue_dma source(%251 : memref<400xf32, #tpu.memory_space<any>>) target(%253 : memref<400xf32, #tpu.memory_space<vmem>>) target_semaphore(%255 : memref<!tpu.dma_semaphore, #tpu.memory_space<semaphore_mem>>)
      %c19_i32 = arith.constant 19 : i32
      %256 = arith.addi %0, %c19_i32 : i32
      %257 = arith.index_cast %256 : i32 to index
      %258 = memref.load %arg1[%257] : memref<40xi32, #tpu.memory_space<smem>>
      %c16_i32_122 = arith.constant 16 : i32
      %c0_i32_123 = arith.constant 0 : i32
      %259 = arith.cmpi eq, %c16_i32_122, %c0_i32_123 : i32
      %c1_i32_124 = arith.constant 1 : i32
      %260 = arith.select %259, %c1_i32_124, %c16_i32_122 : i32
      %261 = arith.remsi %c19_i32, %260 : i32
      %c0_i32_125 = arith.constant 0 : i32
      %262 = arith.cmpi ne, %261, %c0_i32_125 : i32
      %c0_i32_126 = arith.constant 0 : i32
      %263 = arith.cmpi slt, %261, %c0_i32_126 : i32
      %c0_i32_127 = arith.constant 0 : i32
      %264 = arith.cmpi slt, %260, %c0_i32_127 : i32
      %265 = arith.xori %263, %264 : i1
      %266 = arith.andi %265, %262 : i1
      %267 = arith.addi %261, %260 : i32
      %268 = arith.select %266, %267, %261 : i32
      %c0_i32_128 = arith.constant 0 : i32
      %c0_i32_129 = arith.constant 0 : i32
      %c0_i32_130 = arith.constant 0 : i32
      %269 = tpu.memref_slice %arg2[%c0_i32_128, %c0_i32_130] : memref<40x400xf32, #tpu.memory_space<any>> -> memref<1x400xf32, #tpu.memory_space<any>>
      %270 = tpu.memref_squeeze %269 : memref<1x400xf32, #tpu.memory_space<any>> -> memref<400xf32, #tpu.memory_space<any>>
      %c0_i32_131 = arith.constant 0 : i32
      %271 = tpu.memref_slice %arg3[%c0_i32_129, %c0_i32_131] : memref<24x400xf32, #tpu.memory_space<vmem>> -> memref<1x400xf32, #tpu.memory_space<vmem>>
      %272 = tpu.memref_squeeze %271 : memref<1x400xf32, #tpu.memory_space<vmem>> -> memref<400xf32, #tpu.memory_space<vmem>>
      %273 = tpu.memref_slice %arg4[%268] : memref<16x!tpu.dma_semaphore, #tpu.memory_space<semaphore_mem>> -> memref<1x!tpu.dma_semaphore, #tpu.memory_space<semaphore_mem>>
      %274 = tpu.memref_squeeze %273 : memref<1x!tpu.dma_semaphore, #tpu.memory_space<semaphore_mem>> -> memref<!tpu.dma_semaphore, #tpu.memory_space<semaphore_mem>>
      tpu.wait_dma2 semaphore(%274 : memref<!tpu.dma_semaphore, #tpu.memory_space<semaphore_mem>>) src(%270 : memref<400xf32, #tpu.memory_space<any>>) dst(%272 : memref<400xf32, #tpu.memory_space<vmem>>)
      %c16_i32_132 = arith.constant 16 : i32
      %c0_i32_133 = arith.constant 0 : i32
      %275 = arith.cmpi eq, %c16_i32_132, %c0_i32_133 : i32
      %c1_i32_134 = arith.constant 1 : i32
      %276 = arith.select %275, %c1_i32_134, %c16_i32_132 : i32
      %277 = arith.remsi %c19_i32, %276 : i32
      %c0_i32_135 = arith.constant 0 : i32
      %278 = arith.cmpi ne, %277, %c0_i32_135 : i32
      %c0_i32_136 = arith.constant 0 : i32
      %279 = arith.cmpi slt, %277, %c0_i32_136 : i32
      %c0_i32_137 = arith.constant 0 : i32
      %280 = arith.cmpi slt, %276, %c0_i32_137 : i32
      %281 = arith.xori %279, %280 : i1
      %282 = arith.andi %281, %278 : i1
      %283 = arith.addi %277, %276 : i32
      %284 = arith.select %282, %283, %277 : i32
      %c0_i32_138 = arith.constant 0 : i32
      %285 = tpu.memref_slice %arg2[%258, %c0_i32_138] : memref<40x400xf32, #tpu.memory_space<any>> -> memref<1x400xf32, #tpu.memory_space<any>>
      %286 = tpu.memref_squeeze %285 : memref<1x400xf32, #tpu.memory_space<any>> -> memref<400xf32, #tpu.memory_space<any>>
      %c0_i32_139 = arith.constant 0 : i32
      %287 = tpu.memref_slice %arg3[%c19_i32, %c0_i32_139] : memref<24x400xf32, #tpu.memory_space<vmem>> -> memref<1x400xf32, #tpu.memory_space<vmem>>
      %288 = tpu.memref_squeeze %287 : memref<1x400xf32, #tpu.memory_space<vmem>> -> memref<400xf32, #tpu.memory_space<vmem>>
      %289 = tpu.memref_slice %arg4[%284] : memref<16x!tpu.dma_semaphore, #tpu.memory_space<semaphore_mem>> -> memref<1x!tpu.dma_semaphore, #tpu.memory_space<semaphore_mem>>
      %290 = tpu.memref_squeeze %289 : memref<1x!tpu.dma_semaphore, #tpu.memory_space<semaphore_mem>> -> memref<!tpu.dma_semaphore, #tpu.memory_space<semaphore_mem>>
      tpu.enqueue_dma source(%286 : memref<400xf32, #tpu.memory_space<any>>) target(%288 : memref<400xf32, #tpu.memory_space<vmem>>) target_semaphore(%290 : memref<!tpu.dma_semaphore, #tpu.memory_space<semaphore_mem>>)
      %c20_i32 = arith.constant 20 : i32
      %291 = arith.addi %0, %c20_i32 : i32
      %292 = arith.index_cast %291 : i32 to index
      %293 = memref.load %arg1[%292] : memref<40xi32, #tpu.memory_space<smem>>
      %c16_i32_140 = arith.constant 16 : i32
      %c0_i32_141 = arith.constant 0 : i32
      %294 = arith.cmpi eq, %c16_i32_140, %c0_i32_141 : i32
      %c1_i32_142 = arith.constant 1 : i32
      %295 = arith.select %294, %c1_i32_142, %c16_i32_140 : i32
      %296 = arith.remsi %c20_i32, %295 : i32
      %c0_i32_143 = arith.constant 0 : i32
      %297 = arith.cmpi ne, %296, %c0_i32_143 : i32
      %c0_i32_144 = arith.constant 0 : i32
      %298 = arith.cmpi slt, %296, %c0_i32_144 : i32
      %c0_i32_145 = arith.constant 0 : i32
      %299 = arith.cmpi slt, %295, %c0_i32_145 : i32
      %300 = arith.xori %298, %299 : i1
      %301 = arith.andi %300, %297 : i1
      %302 = arith.addi %296, %295 : i32
      %303 = arith.select %301, %302, %296 : i32
      %c0_i32_146 = arith.constant 0 : i32
      %c0_i32_147 = arith.constant 0 : i32
      %c0_i32_148 = arith.constant 0 : i32
      %304 = tpu.memref_slice %arg2[%c0_i32_146, %c0_i32_148] : memref<40x400xf32, #tpu.memory_space<any>> -> memref<1x400xf32, #tpu.memory_space<any>>
      %305 = tpu.memref_squeeze %304 : memref<1x400xf32, #tpu.memory_space<any>> -> memref<400xf32, #tpu.memory_space<any>>
      %c0_i32_149 = arith.constant 0 : i32
      %306 = tpu.memref_slice %arg3[%c0_i32_147, %c0_i32_149] : memref<24x400xf32, #tpu.memory_space<vmem>> -> memref<1x400xf32, #tpu.memory_space<vmem>>
      %307 = tpu.memref_squeeze %306 : memref<1x400xf32, #tpu.memory_space<vmem>> -> memref<400xf32, #tpu.memory_space<vmem>>
      %308 = tpu.memref_slice %arg4[%303] : memref<16x!tpu.dma_semaphore, #tpu.memory_space<semaphore_mem>> -> memref<1x!tpu.dma_semaphore, #tpu.memory_space<semaphore_mem>>
      %309 = tpu.memref_squeeze %308 : memref<1x!tpu.dma_semaphore, #tpu.memory_space<semaphore_mem>> -> memref<!tpu.dma_semaphore, #tpu.memory_space<semaphore_mem>>
      tpu.wait_dma2 semaphore(%309 : memref<!tpu.dma_semaphore, #tpu.memory_space<semaphore_mem>>) src(%305 : memref<400xf32, #tpu.memory_space<any>>) dst(%307 : memref<400xf32, #tpu.memory_space<vmem>>)
      %c16_i32_150 = arith.constant 16 : i32
      %c0_i32_151 = arith.constant 0 : i32
      %310 = arith.cmpi eq, %c16_i32_150, %c0_i32_151 : i32
      %c1_i32_152 = arith.constant 1 : i32
      %311 = arith.select %310, %c1_i32_152, %c16_i32_150 : i32
      %312 = arith.remsi %c20_i32, %311 : i32
      %c0_i32_153 = arith.constant 0 : i32
      %313 = arith.cmpi ne, %312, %c0_i32_153 : i32
      %c0_i32_154 = arith.constant 0 : i32
      %314 = arith.cmpi slt, %312, %c0_i32_154 : i32
      %c0_i32_155 = arith.constant 0 : i32
      %315 = arith.cmpi slt, %311, %c0_i32_155 : i32
      %316 = arith.xori %314, %315 : i1
      %317 = arith.andi %316, %313 : i1
      %318 = arith.addi %312, %311 : i32
      %319 = arith.select %317, %318, %312 : i32
      %c0_i32_156 = arith.constant 0 : i32
      %320 = tpu.memref_slice %arg2[%293, %c0_i32_156] : memref<40x400xf32, #tpu.memory_space<any>> -> memref<1x400xf32, #tpu.memory_space<any>>
      %321 = tpu.memref_squeeze %320 : memref<1x400xf32, #tpu.memory_space<any>> -> memref<400xf32, #tpu.memory_space<any>>
      %c0_i32_157 = arith.constant 0 : i32
      %322 = tpu.memref_slice %arg3[%c20_i32, %c0_i32_157] : memref<24x400xf32, #tpu.memory_space<vmem>> -> memref<1x400xf32, #tpu.memory_space<vmem>>
      %323 = tpu.memref_squeeze %322 : memref<1x400xf32, #tpu.memory_space<vmem>> -> memref<400xf32, #tpu.memory_space<vmem>>
      %324 = tpu.memref_slice %arg4[%319] : memref<16x!tpu.dma_semaphore, #tpu.memory_space<semaphore_mem>> -> memref<1x!tpu.dma_semaphore, #tpu.memory_space<semaphore_mem>>
      %325 = tpu.memref_squeeze %324 : memref<1x!tpu.dma_semaphore, #tpu.memory_space<semaphore_mem>> -> memref<!tpu.dma_semaphore, #tpu.memory_space<semaphore_mem>>
      tpu.enqueue_dma source(%321 : memref<400xf32, #tpu.memory_space<any>>) target(%323 : memref<400xf32, #tpu.memory_space<vmem>>) target_semaphore(%325 : memref<!tpu.dma_semaphore, #tpu.memory_space<semaphore_mem>>)
      %c21_i32 = arith.constant 21 : i32
      %326 = arith.addi %0, %c21_i32 : i32
      %327 = arith.index_cast %326 : i32 to index
      %328 = memref.load %arg1[%327] : memref<40xi32, #tpu.memory_space<smem>>
      %c16_i32_158 = arith.constant 16 : i32
      %c0_i32_159 = arith.constant 0 : i32
      %329 = arith.cmpi eq, %c16_i32_158, %c0_i32_159 : i32
      %c1_i32_160 = arith.constant 1 : i32
      %330 = arith.select %329, %c1_i32_160, %c16_i32_158 : i32
      %331 = arith.remsi %c21_i32, %330 : i32
      %c0_i32_161 = arith.constant 0 : i32
      %332 = arith.cmpi ne, %331, %c0_i32_161 : i32
      %c0_i32_162 = arith.constant 0 : i32
      %333 = arith.cmpi slt, %331, %c0_i32_162 : i32
      %c0_i32_163 = arith.constant 0 : i32
      %334 = arith.cmpi slt, %330, %c0_i32_163 : i32
      %335 = arith.xori %333, %334 : i1
      %336 = arith.andi %335, %332 : i1
      %337 = arith.addi %331, %330 : i32
      %338 = arith.select %336, %337, %331 : i32
      %c0_i32_164 = arith.constant 0 : i32
      %c0_i32_165 = arith.constant 0 : i32
      %c0_i32_166 = arith.constant 0 : i32
      %339 = tpu.memref_slice %arg2[%c0_i32_164, %c0_i32_166] : memref<40x400xf32, #tpu.memory_space<any>> -> memref<1x400xf32, #tpu.memory_space<any>>
      %340 = tpu.memref_squeeze %339 : memref<1x400xf32, #tpu.memory_space<any>> -> memref<400xf32, #tpu.memory_space<any>>
      %c0_i32_167 = arith.constant 0 : i32
      %341 = tpu.memref_slice %arg3[%c0_i32_165, %c0_i32_167] : memref<24x400xf32, #tpu.memory_space<vmem>> -> memref<1x400xf32, #tpu.memory_space<vmem>>
      %342 = tpu.memref_squeeze %341 : memref<1x400xf32, #tpu.memory_space<vmem>> -> memref<400xf32, #tpu.memory_space<vmem>>
      %343 = tpu.memref_slice %arg4[%338] : memref<16x!tpu.dma_semaphore, #tpu.memory_space<semaphore_mem>> -> memref<1x!tpu.dma_semaphore, #tpu.memory_space<semaphore_mem>>
      %344 = tpu.memref_squeeze %343 : memref<1x!tpu.dma_semaphore, #tpu.memory_space<semaphore_mem>> -> memref<!tpu.dma_semaphore, #tpu.memory_space<semaphore_mem>>
      tpu.wait_dma2 semaphore(%344 : memref<!tpu.dma_semaphore, #tpu.memory_space<semaphore_mem>>) src(%340 : memref<400xf32, #tpu.memory_space<any>>) dst(%342 : memref<400xf32, #tpu.memory_space<vmem>>)
      %c16_i32_168 = arith.constant 16 : i32
      %c0_i32_169 = arith.constant 0 : i32
      %345 = arith.cmpi eq, %c16_i32_168, %c0_i32_169 : i32
      %c1_i32_170 = arith.constant 1 : i32
      %346 = arith.select %345, %c1_i32_170, %c16_i32_168 : i32
      %347 = arith.remsi %c21_i32, %346 : i32
      %c0_i32_171 = arith.constant 0 : i32
      %348 = arith.cmpi ne, %347, %c0_i32_171 : i32
      %c0_i32_172 = arith.constant 0 : i32
      %349 = arith.cmpi slt, %347, %c0_i32_172 : i32
      %c0_i32_173 = arith.constant 0 : i32
      %350 = arith.cmpi slt, %346, %c0_i32_173 : i32
      %351 = arith.xori %349, %350 : i1
      %352 = arith.andi %351, %348 : i1
      %353 = arith.addi %347, %346 : i32
      %354 = arith.select %352, %353, %347 : i32
      %c0_i32_174 = arith.constant 0 : i32
      %355 = tpu.memref_slice %arg2[%328, %c0_i32_174] : memref<40x400xf32, #tpu.memory_space<any>> -> memref<1x400xf32, #tpu.memory_space<any>>
      %356 = tpu.memref_squeeze %355 : memref<1x400xf32, #tpu.memory_space<any>> -> memref<400xf32, #tpu.memory_space<any>>
      %c0_i32_175 = arith.constant 0 : i32
      %357 = tpu.memref_slice %arg3[%c21_i32, %c0_i32_175] : memref<24x400xf32, #tpu.memory_space<vmem>> -> memref<1x400xf32, #tpu.memory_space<vmem>>
      %358 = tpu.memref_squeeze %357 : memref<1x400xf32, #tpu.memory_space<vmem>> -> memref<400xf32, #tpu.memory_space<vmem>>
      %359 = tpu.memref_slice %arg4[%354] : memref<16x!tpu.dma_semaphore, #tpu.memory_space<semaphore_mem>> -> memref<1x!tpu.dma_semaphore, #tpu.memory_space<semaphore_mem>>
      %360 = tpu.memref_squeeze %359 : memref<1x!tpu.dma_semaphore, #tpu.memory_space<semaphore_mem>> -> memref<!tpu.dma_semaphore, #tpu.memory_space<semaphore_mem>>
      tpu.enqueue_dma source(%356 : memref<400xf32, #tpu.memory_space<any>>) target(%358 : memref<400xf32, #tpu.memory_space<vmem>>) target_semaphore(%360 : memref<!tpu.dma_semaphore, #tpu.memory_space<semaphore_mem>>)
      %c22_i32 = arith.constant 22 : i32
      %361 = arith.addi %0, %c22_i32 : i32
      %362 = arith.index_cast %361 : i32 to index
      %363 = memref.load %arg1[%362] : memref<40xi32, #tpu.memory_space<smem>>
      %c16_i32_176 = arith.constant 16 : i32
      %c0_i32_177 = arith.constant 0 : i32
      %364 = arith.cmpi eq, %c16_i32_176, %c0_i32_177 : i32
      %c1_i32_178 = arith.constant 1 : i32
      %365 = arith.select %364, %c1_i32_178, %c16_i32_176 : i32
      %366 = arith.remsi %c22_i32, %365 : i32
      %c0_i32_179 = arith.constant 0 : i32
      %367 = arith.cmpi ne, %366, %c0_i32_179 : i32
      %c0_i32_180 = arith.constant 0 : i32
      %368 = arith.cmpi slt, %366, %c0_i32_180 : i32
      %c0_i32_181 = arith.constant 0 : i32
      %369 = arith.cmpi slt, %365, %c0_i32_181 : i32
      %370 = arith.xori %368, %369 : i1
      %371 = arith.andi %370, %367 : i1
      %372 = arith.addi %366, %365 : i32
      %373 = arith.select %371, %372, %366 : i32
      %c0_i32_182 = arith.constant 0 : i32
      %c0_i32_183 = arith.constant 0 : i32
      %c0_i32_184 = arith.constant 0 : i32
      %374 = tpu.memref_slice %arg2[%c0_i32_182, %c0_i32_184] : memref<40x400xf32, #tpu.memory_space<any>> -> memref<1x400xf32, #tpu.memory_space<any>>
      %375 = tpu.memref_squeeze %374 : memref<1x400xf32, #tpu.memory_space<any>> -> memref<400xf32, #tpu.memory_space<any>>
      %c0_i32_185 = arith.constant 0 : i32
      %376 = tpu.memref_slice %arg3[%c0_i32_183, %c0_i32_185] : memref<24x400xf32, #tpu.memory_space<vmem>> -> memref<1x400xf32, #tpu.memory_space<vmem>>
      %377 = tpu.memref_squeeze %376 : memref<1x400xf32, #tpu.memory_space<vmem>> -> memref<400xf32, #tpu.memory_space<vmem>>
      %378 = tpu.memref_slice %arg4[%373] : memref<16x!tpu.dma_semaphore, #tpu.memory_space<semaphore_mem>> -> memref<1x!tpu.dma_semaphore, #tpu.memory_space<semaphore_mem>>
      %379 = tpu.memref_squeeze %378 : memref<1x!tpu.dma_semaphore, #tpu.memory_space<semaphore_mem>> -> memref<!tpu.dma_semaphore, #tpu.memory_space<semaphore_mem>>
      tpu.wait_dma2 semaphore(%379 : memref<!tpu.dma_semaphore, #tpu.memory_space<semaphore_mem>>) src(%375 : memref<400xf32, #tpu.memory_space<any>>) dst(%377 : memref<400xf32, #tpu.memory_space<vmem>>)
      %c16_i32_186 = arith.constant 16 : i32
      %c0_i32_187 = arith.constant 0 : i32
      %380 = arith.cmpi eq, %c16_i32_186, %c0_i32_187 : i32
      %c1_i32_188 = arith.constant 1 : i32
      %381 = arith.select %380, %c1_i32_188, %c16_i32_186 : i32
      %382 = arith.remsi %c22_i32, %381 : i32
      %c0_i32_189 = arith.constant 0 : i32
      %383 = arith.cmpi ne, %382, %c0_i32_189 : i32
      %c0_i32_190 = arith.constant 0 : i32
      %384 = arith.cmpi slt, %382, %c0_i32_190 : i32
      %c0_i32_191 = arith.constant 0 : i32
      %385 = arith.cmpi slt, %381, %c0_i32_191 : i32
      %386 = arith.xori %384, %385 : i1
      %387 = arith.andi %386, %383 : i1
      %388 = arith.addi %382, %381 : i32
      %389 = arith.select %387, %388, %382 : i32
      %c0_i32_192 = arith.constant 0 : i32
      %390 = tpu.memref_slice %arg2[%363, %c0_i32_192] : memref<40x400xf32, #tpu.memory_space<any>> -> memref<1x400xf32, #tpu.memory_space<any>>
      %391 = tpu.memref_squeeze %390 : memref<1x400xf32, #tpu.memory_space<any>> -> memref<400xf32, #tpu.memory_space<any>>
      %c0_i32_193 = arith.constant 0 : i32
      %392 = tpu.memref_slice %arg3[%c22_i32, %c0_i32_193] : memref<24x400xf32, #tpu.memory_space<vmem>> -> memref<1x400xf32, #tpu.memory_space<vmem>>
      %393 = tpu.memref_squeeze %392 : memref<1x400xf32, #tpu.memory_space<vmem>> -> memref<400xf32, #tpu.memory_space<vmem>>
      %394 = tpu.memref_slice %arg4[%389] : memref<16x!tpu.dma_semaphore, #tpu.memory_space<semaphore_mem>> -> memref<1x!tpu.dma_semaphore, #tpu.memory_space<semaphore_mem>>
      %395 = tpu.memref_squeeze %394 : memref<1x!tpu.dma_semaphore, #tpu.memory_space<semaphore_mem>> -> memref<!tpu.dma_semaphore, #tpu.memory_space<semaphore_mem>>
      tpu.enqueue_dma source(%391 : memref<400xf32, #tpu.memory_space<any>>) target(%393 : memref<400xf32, #tpu.memory_space<vmem>>) target_semaphore(%395 : memref<!tpu.dma_semaphore, #tpu.memory_space<semaphore_mem>>)
      %c23_i32 = arith.constant 23 : i32
      %396 = arith.addi %0, %c23_i32 : i32
      %397 = arith.index_cast %396 : i32 to index
      %398 = memref.load %arg1[%397] : memref<40xi32, #tpu.memory_space<smem>>
      %c16_i32_194 = arith.constant 16 : i32
      %c0_i32_195 = arith.constant 0 : i32
      %399 = arith.cmpi eq, %c16_i32_194, %c0_i32_195 : i32
      %c1_i32_196 = arith.constant 1 : i32
      %400 = arith.select %399, %c1_i32_196, %c16_i32_194 : i32
      %401 = arith.remsi %c23_i32, %400 : i32
      %c0_i32_197 = arith.constant 0 : i32
      %402 = arith.cmpi ne, %401, %c0_i32_197 : i32
      %c0_i32_198 = arith.constant 0 : i32
      %403 = arith.cmpi slt, %401, %c0_i32_198 : i32
      %c0_i32_199 = arith.constant 0 : i32
      %404 = arith.cmpi slt, %400, %c0_i32_199 : i32
      %405 = arith.xori %403, %404 : i1
      %406 = arith.andi %405, %402 : i1
      %407 = arith.addi %401, %400 : i32
      %408 = arith.select %406, %407, %401 : i32
      %c0_i32_200 = arith.constant 0 : i32
      %c0_i32_201 = arith.constant 0 : i32
      %c0_i32_202 = arith.constant 0 : i32
      %409 = tpu.memref_slice %arg2[%c0_i32_200, %c0_i32_202] : memref<40x400xf32, #tpu.memory_space<any>> -> memref<1x400xf32, #tpu.memory_space<any>>
      %410 = tpu.memref_squeeze %409 : memref<1x400xf32, #tpu.memory_space<any>> -> memref<400xf32, #tpu.memory_space<any>>
      %c0_i32_203 = arith.constant 0 : i32
      %411 = tpu.memref_slice %arg3[%c0_i32_201, %c0_i32_203] : memref<24x400xf32, #tpu.memory_space<vmem>> -> memref<1x400xf32, #tpu.memory_space<vmem>>
      %412 = tpu.memref_squeeze %411 : memref<1x400xf32, #tpu.memory_space<vmem>> -> memref<400xf32, #tpu.memory_space<vmem>>
      %413 = tpu.memref_slice %arg4[%408] : memref<16x!tpu.dma_semaphore, #tpu.memory_space<semaphore_mem>> -> memref<1x!tpu.dma_semaphore, #tpu.memory_space<semaphore_mem>>
      %414 = tpu.memref_squeeze %413 : memref<1x!tpu.dma_semaphore, #tpu.memory_space<semaphore_mem>> -> memref<!tpu.dma_semaphore, #tpu.memory_space<semaphore_mem>>
      tpu.wait_dma2 semaphore(%414 : memref<!tpu.dma_semaphore, #tpu.memory_space<semaphore_mem>>) src(%410 : memref<400xf32, #tpu.memory_space<any>>) dst(%412 : memref<400xf32, #tpu.memory_space<vmem>>)
      %c16_i32_204 = arith.constant 16 : i32
      %c0_i32_205 = arith.constant 0 : i32
      %415 = arith.cmpi eq, %c16_i32_204, %c0_i32_205 : i32
      %c1_i32_206 = arith.constant 1 : i32
      %416 = arith.select %415, %c1_i32_206, %c16_i32_204 : i32
      %417 = arith.remsi %c23_i32, %416 : i32
      %c0_i32_207 = arith.constant 0 : i32
      %418 = arith.cmpi ne, %417, %c0_i32_207 : i32
      %c0_i32_208 = arith.constant 0 : i32
      %419 = arith.cmpi slt, %417, %c0_i32_208 : i32
      %c0_i32_209 = arith.constant 0 : i32
      %420 = arith.cmpi slt, %416, %c0_i32_209 : i32
      %421 = arith.xori %419, %420 : i1
      %422 = arith.andi %421, %418 : i1
      %423 = arith.addi %417, %416 : i32
      %424 = arith.select %422, %423, %417 : i32
      %c0_i32_210 = arith.constant 0 : i32
      %425 = tpu.memref_slice %arg2[%398, %c0_i32_210] : memref<40x400xf32, #tpu.memory_space<any>> -> memref<1x400xf32, #tpu.memory_space<any>>
      %426 = tpu.memref_squeeze %425 : memref<1x400xf32, #tpu.memory_space<any>> -> memref<400xf32, #tpu.memory_space<any>>
      %c0_i32_211 = arith.constant 0 : i32
      %427 = tpu.memref_slice %arg3[%c23_i32, %c0_i32_211] : memref<24x400xf32, #tpu.memory_space<vmem>> -> memref<1x400xf32, #tpu.memory_space<vmem>>
      %428 = tpu.memref_squeeze %427 : memref<1x400xf32, #tpu.memory_space<vmem>> -> memref<400xf32, #tpu.memory_space<vmem>>
      %429 = tpu.memref_slice %arg4[%424] : memref<16x!tpu.dma_semaphore, #tpu.memory_space<semaphore_mem>> -> memref<1x!tpu.dma_semaphore, #tpu.memory_space<semaphore_mem>>
      %430 = tpu.memref_squeeze %429 : memref<1x!tpu.dma_semaphore, #tpu.memory_space<semaphore_mem>> -> memref<!tpu.dma_semaphore, #tpu.memory_space<semaphore_mem>>
      tpu.enqueue_dma source(%426 : memref<400xf32, #tpu.memory_space<any>>) target(%428 : memref<400xf32, #tpu.memory_space<vmem>>) target_semaphore(%430 : memref<!tpu.dma_semaphore, #tpu.memory_space<semaphore_mem>>)
      %c8_i32_212 = arith.constant 8 : i32
      %c0_i32_213 = arith.constant 0 : i32
      %c0_i32_214 = arith.constant 0 : i32
      %c0_i32_215 = arith.constant 0 : i32
      %c0_i32_216 = arith.constant 0 : i32
      %431 = tpu.memref_slice %arg2[%c0_i32_213, %c0_i32_216] : memref<40x400xf32, #tpu.memory_space<any>> -> memref<1x400xf32, #tpu.memory_space<any>>
      %432 = tpu.memref_squeeze %431 : memref<1x400xf32, #tpu.memory_space<any>> -> memref<400xf32, #tpu.memory_space<any>>
      %c0_i32_217 = arith.constant 0 : i32
      %433 = tpu.memref_slice %arg3[%c0_i32_214, %c0_i32_217] : memref<24x400xf32, #tpu.memory_space<vmem>> -> memref<1x400xf32, #tpu.memory_space<vmem>>
      %434 = tpu.memref_squeeze %433 : memref<1x400xf32, #tpu.memory_space<vmem>> -> memref<400xf32, #tpu.memory_space<vmem>>
      %435 = tpu.memref_slice %arg4[%c0_i32_215] : memref<16x!tpu.dma_semaphore, #tpu.memory_space<semaphore_mem>> -> memref<1x!tpu.dma_semaphore, #tpu.memory_space<semaphore_mem>>
      %436 = tpu.memref_squeeze %435 : memref<1x!tpu.dma_semaphore, #tpu.memory_space<semaphore_mem>> -> memref<!tpu.dma_semaphore, #tpu.memory_space<semaphore_mem>>
      tpu.wait_dma2 semaphore(%436 : memref<!tpu.dma_semaphore, #tpu.memory_space<semaphore_mem>>) src(%432 : memref<400xf32, #tpu.memory_space<any>>) dst(%434 : memref<400xf32, #tpu.memory_space<vmem>>)
      %c0_i32_218 = arith.constant 0 : i32
      %c0_i32_219 = arith.constant 0 : i32
      %c1_i32_220 = arith.constant 1 : i32
      %c0_i32_221 = arith.constant 0 : i32
      %437 = tpu.memref_slice %arg2[%c0_i32_218, %c0_i32_221] : memref<40x400xf32, #tpu.memory_space<any>> -> memref<1x400xf32, #tpu.memory_space<any>>
      %438 = tpu.memref_squeeze %437 : memref<1x400xf32, #tpu.memory_space<any>> -> memref<400xf32, #tpu.memory_space<any>>
      %c0_i32_222 = arith.constant 0 : i32
      %439 = tpu.memref_slice %arg3[%c0_i32_219, %c0_i32_222] : memref<24x400xf32, #tpu.memory_space<vmem>> -> memref<1x400xf32, #tpu.memory_space<vmem>>
      %440 = tpu.memref_squeeze %439 : memref<1x400xf32, #tpu.memory_space<vmem>> -> memref<400xf32, #tpu.memory_space<vmem>>
      %441 = tpu.memref_slice %arg4[%c1_i32_220] : memref<16x!tpu.dma_semaphore, #tpu.memory_space<semaphore_mem>> -> memref<1x!tpu.dma_semaphore, #tpu.memory_space<semaphore_mem>>
      %442 = tpu.memref_squeeze %441 : memref<1x!tpu.dma_semaphore, #tpu.memory_space<semaphore_mem>> -> memref<!tpu.dma_semaphore, #tpu.memory_space<semaphore_mem>>
      tpu.wait_dma2 semaphore(%442 : memref<!tpu.dma_semaphore, #tpu.memory_space<semaphore_mem>>) src(%438 : memref<400xf32, #tpu.memory_space<any>>) dst(%440 : memref<400xf32, #tpu.memory_space<vmem>>)
      %c0_i32_223 = arith.constant 0 : i32
      %c0_i32_224 = arith.constant 0 : i32
      %c2_i32_225 = arith.constant 2 : i32
      %c0_i32_226 = arith.constant 0 : i32
      %443 = tpu.memref_slice %arg2[%c0_i32_223, %c0_i32_226] : memref<40x400xf32, #tpu.memory_space<any>> -> memref<1x400xf32, #tpu.memory_space<any>>
      %444 = tpu.memref_squeeze %443 : memref<1x400xf32, #tpu.memory_space<any>> -> memref<400xf32, #tpu.memory_space<any>>
      %c0_i32_227 = arith.constant 0 : i32
      %445 = tpu.memref_slice %arg3[%c0_i32_224, %c0_i32_227] : memref<24x400xf32, #tpu.memory_space<vmem>> -> memref<1x400xf32, #tpu.memory_space<vmem>>
      %446 = tpu.memref_squeeze %445 : memref<1x400xf32, #tpu.memory_space<vmem>> -> memref<400xf32, #tpu.memory_space<vmem>>
      %447 = tpu.memref_slice %arg4[%c2_i32_225] : memref<16x!tpu.dma_semaphore, #tpu.memory_space<semaphore_mem>> -> memref<1x!tpu.dma_semaphore, #tpu.memory_space<semaphore_mem>>
      %448 = tpu.memref_squeeze %447 : memref<1x!tpu.dma_semaphore, #tpu.memory_space<semaphore_mem>> -> memref<!tpu.dma_semaphore, #tpu.memory_space<semaphore_mem>>
      tpu.wait_dma2 semaphore(%448 : memref<!tpu.dma_semaphore, #tpu.memory_space<semaphore_mem>>) src(%444 : memref<400xf32, #tpu.memory_space<any>>) dst(%446 : memref<400xf32, #tpu.memory_space<vmem>>)
      %c0_i32_228 = arith.constant 0 : i32
      %c0_i32_229 = arith.constant 0 : i32
      %c3_i32_230 = arith.constant 3 : i32
      %c0_i32_231 = arith.constant 0 : i32
      %449 = tpu.memref_slice %arg2[%c0_i32_228, %c0_i32_231] : memref<40x400xf32, #tpu.memory_space<any>> -> memref<1x400xf32, #tpu.memory_space<any>>
      %450 = tpu.memref_squeeze %449 : memref<1x400xf32, #tpu.memory_space<any>> -> memref<400xf32, #tpu.memory_space<any>>
      %c0_i32_232 = arith.constant 0 : i32
      %451 = tpu.memref_slice %arg3[%c0_i32_229, %c0_i32_232] : memref<24x400xf32, #tpu.memory_space<vmem>> -> memref<1x400xf32, #tpu.memory_space<vmem>>
      %452 = tpu.memref_squeeze %451 : memref<1x400xf32, #tpu.memory_space<vmem>> -> memref<400xf32, #tpu.memory_space<vmem>>
      %453 = tpu.memref_slice %arg4[%c3_i32_230] : memref<16x!tpu.dma_semaphore, #tpu.memory_space<semaphore_mem>> -> memref<1x!tpu.dma_semaphore, #tpu.memory_space<semaphore_mem>>
      %454 = tpu.memref_squeeze %453 : memref<1x!tpu.dma_semaphore, #tpu.memory_space<semaphore_mem>> -> memref<!tpu.dma_semaphore, #tpu.memory_space<semaphore_mem>>
      tpu.wait_dma2 semaphore(%454 : memref<!tpu.dma_semaphore, #tpu.memory_space<semaphore_mem>>) src(%450 : memref<400xf32, #tpu.memory_space<any>>) dst(%452 : memref<400xf32, #tpu.memory_space<vmem>>)
      %c0_i32_233 = arith.constant 0 : i32
      %c0_i32_234 = arith.constant 0 : i32
      %c4_i32_235 = arith.constant 4 : i32
      %c0_i32_236 = arith.constant 0 : i32
      %455 = tpu.memref_slice %arg2[%c0_i32_233, %c0_i32_236] : memref<40x400xf32, #tpu.memory_space<any>> -> memref<1x400xf32, #tpu.memory_space<any>>
      %456 = tpu.memref_squeeze %455 : memref<1x400xf32, #tpu.memory_space<any>> -> memref<400xf32, #tpu.memory_space<any>>
      %c0_i32_237 = arith.constant 0 : i32
      %457 = tpu.memref_slice %arg3[%c0_i32_234, %c0_i32_237] : memref<24x400xf32, #tpu.memory_space<vmem>> -> memref<1x400xf32, #tpu.memory_space<vmem>>
      %458 = tpu.memref_squeeze %457 : memref<1x400xf32, #tpu.memory_space<vmem>> -> memref<400xf32, #tpu.memory_space<vmem>>
      %459 = tpu.memref_slice %arg4[%c4_i32_235] : memref<16x!tpu.dma_semaphore, #tpu.memory_space<semaphore_mem>> -> memref<1x!tpu.dma_semaphore, #tpu.memory_space<semaphore_mem>>
      %460 = tpu.memref_squeeze %459 : memref<1x!tpu.dma_semaphore, #tpu.memory_space<semaphore_mem>> -> memref<!tpu.dma_semaphore, #tpu.memory_space<semaphore_mem>>
      tpu.wait_dma2 semaphore(%460 : memref<!tpu.dma_semaphore, #tpu.memory_space<semaphore_mem>>) src(%456 : memref<400xf32, #tpu.memory_space<any>>) dst(%458 : memref<400xf32, #tpu.memory_space<vmem>>)
      %c0_i32_238 = arith.constant 0 : i32
      %c0_i32_239 = arith.constant 0 : i32
      %c5_i32_240 = arith.constant 5 : i32
      %c0_i32_241 = arith.constant 0 : i32
      %461 = tpu.memref_slice %arg2[%c0_i32_238, %c0_i32_241] : memref<40x400xf32, #tpu.memory_space<any>> -> memref<1x400xf32, #tpu.memory_space<any>>
      %462 = tpu.memref_squeeze %461 : memref<1x400xf32, #tpu.memory_space<any>> -> memref<400xf32, #tpu.memory_space<any>>
      %c0_i32_242 = arith.constant 0 : i32
      %463 = tpu.memref_slice %arg3[%c0_i32_239, %c0_i32_242] : memref<24x400xf32, #tpu.memory_space<vmem>> -> memref<1x400xf32, #tpu.memory_space<vmem>>
      %464 = tpu.memref_squeeze %463 : memref<1x400xf32, #tpu.memory_space<vmem>> -> memref<400xf32, #tpu.memory_space<vmem>>
      %465 = tpu.memref_slice %arg4[%c5_i32_240] : memref<16x!tpu.dma_semaphore, #tpu.memory_space<semaphore_mem>> -> memref<1x!tpu.dma_semaphore, #tpu.memory_space<semaphore_mem>>
      %466 = tpu.memref_squeeze %465 : memref<1x!tpu.dma_semaphore, #tpu.memory_space<semaphore_mem>> -> memref<!tpu.dma_semaphore, #tpu.memory_space<semaphore_mem>>
      tpu.wait_dma2 semaphore(%466 : memref<!tpu.dma_semaphore, #tpu.memory_space<semaphore_mem>>) src(%462 : memref<400xf32, #tpu.memory_space<any>>) dst(%464 : memref<400xf32, #tpu.memory_space<vmem>>)
      %c0_i32_243 = arith.constant 0 : i32
      %c0_i32_244 = arith.constant 0 : i32
      %c6_i32_245 = arith.constant 6 : i32
      %c0_i32_246 = arith.constant 0 : i32
      %467 = tpu.memref_slice %arg2[%c0_i32_243, %c0_i32_246] : memref<40x400xf32, #tpu.memory_space<any>> -> memref<1x400xf32, #tpu.memory_space<any>>
      %468 = tpu.memref_squeeze %467 : memref<1x400xf32, #tpu.memory_space<any>> -> memref<400xf32, #tpu.memory_space<any>>
      %c0_i32_247 = arith.constant 0 : i32
      %469 = tpu.memref_slice %arg3[%c0_i32_244, %c0_i32_247] : memref<24x400xf32, #tpu.memory_space<vmem>> -> memref<1x400xf32, #tpu.memory_space<vmem>>
      %470 = tpu.memref_squeeze %469 : memref<1x400xf32, #tpu.memory_space<vmem>> -> memref<400xf32, #tpu.memory_space<vmem>>
      %471 = tpu.memref_slice %arg4[%c6_i32_245] : memref<16x!tpu.dma_semaphore, #tpu.memory_space<semaphore_mem>> -> memref<1x!tpu.dma_semaphore, #tpu.memory_space<semaphore_mem>>
      %472 = tpu.memref_squeeze %471 : memref<1x!tpu.dma_semaphore, #tpu.memory_space<semaphore_mem>> -> memref<!tpu.dma_semaphore, #tpu.memory_space<semaphore_mem>>
      tpu.wait_dma2 semaphore(%472 : memref<!tpu.dma_semaphore, #tpu.memory_space<semaphore_mem>>) src(%468 : memref<400xf32, #tpu.memory_space<any>>) dst(%470 : memref<400xf32, #tpu.memory_space<vmem>>)
      %c0_i32_248 = arith.constant 0 : i32
      %c0_i32_249 = arith.constant 0 : i32
      %c7_i32_250 = arith.constant 7 : i32
      %c0_i32_251 = arith.constant 0 : i32
      %473 = tpu.memref_slice %arg2[%c0_i32_248, %c0_i32_251] : memref<40x400xf32, #tpu.memory_space<any>> -> memref<1x400xf32, #tpu.memory_space<any>>
      %474 = tpu.memref_squeeze %473 : memref<1x400xf32, #tpu.memory_space<any>> -> memref<400xf32, #tpu.memory_space<any>>
      %c0_i32_252 = arith.constant 0 : i32
      %475 = tpu.memref_slice %arg3[%c0_i32_249, %c0_i32_252] : memref<24x400xf32, #tpu.memory_space<vmem>> -> memref<1x400xf32, #tpu.memory_space<vmem>>
      %476 = tpu.memref_squeeze %475 : memref<1x400xf32, #tpu.memory_space<vmem>> -> memref<400xf32, #tpu.memory_space<vmem>>
      %477 = tpu.memref_slice %arg4[%c7_i32_250] : memref<16x!tpu.dma_semaphore, #tpu.memory_space<semaphore_mem>> -> memref<1x!tpu.dma_semaphore, #tpu.memory_space<semaphore_mem>>
      %478 = tpu.memref_squeeze %477 : memref<1x!tpu.dma_semaphore, #tpu.memory_space<semaphore_mem>> -> memref<!tpu.dma_semaphore, #tpu.memory_space<semaphore_mem>>
      tpu.wait_dma2 semaphore(%478 : memref<!tpu.dma_semaphore, #tpu.memory_space<semaphore_mem>>) src(%474 : memref<400xf32, #tpu.memory_space<any>>) dst(%476 : memref<400xf32, #tpu.memory_space<vmem>>)
      %c0_i32_253 = arith.constant 0 : i32
      %c0_i32_254 = arith.constant 0 : i32
      %c8_i32_255 = arith.constant 8 : i32
      %c0_i32_256 = arith.constant 0 : i32
      %479 = tpu.memref_slice %arg2[%c0_i32_253, %c0_i32_256] : memref<40x400xf32, #tpu.memory_space<any>> -> memref<1x400xf32, #tpu.memory_space<any>>
      %480 = tpu.memref_squeeze %479 : memref<1x400xf32, #tpu.memory_space<any>> -> memref<400xf32, #tpu.memory_space<any>>
      %c0_i32_257 = arith.constant 0 : i32
      %481 = tpu.memref_slice %arg3[%c0_i32_254, %c0_i32_257] : memref<24x400xf32, #tpu.memory_space<vmem>> -> memref<1x400xf32, #tpu.memory_space<vmem>>
      %482 = tpu.memref_squeeze %481 : memref<1x400xf32, #tpu.memory_space<vmem>> -> memref<400xf32, #tpu.memory_space<vmem>>
      %483 = tpu.memref_slice %arg4[%c8_i32_255] : memref<16x!tpu.dma_semaphore, #tpu.memory_space<semaphore_mem>> -> memref<1x!tpu.dma_semaphore, #tpu.memory_space<semaphore_mem>>
      %484 = tpu.memref_squeeze %483 : memref<1x!tpu.dma_semaphore, #tpu.memory_space<semaphore_mem>> -> memref<!tpu.dma_semaphore, #tpu.memory_space<semaphore_mem>>
      tpu.wait_dma2 semaphore(%484 : memref<!tpu.dma_semaphore, #tpu.memory_space<semaphore_mem>>) src(%480 : memref<400xf32, #tpu.memory_space<any>>) dst(%482 : memref<400xf32, #tpu.memory_space<vmem>>)
      %c0_i32_258 = arith.constant 0 : i32
      %c0_i32_259 = arith.constant 0 : i32
      %c9_i32_260 = arith.constant 9 : i32
      %c0_i32_261 = arith.constant 0 : i32
      %485 = tpu.memref_slice %arg2[%c0_i32_258, %c0_i32_261] : memref<40x400xf32, #tpu.memory_space<any>> -> memref<1x400xf32, #tpu.memory_space<any>>
      %486 = tpu.memref_squeeze %485 : memref<1x400xf32, #tpu.memory_space<any>> -> memref<400xf32, #tpu.memory_space<any>>
      %c0_i32_262 = arith.constant 0 : i32
      %487 = tpu.memref_slice %arg3[%c0_i32_259, %c0_i32_262] : memref<24x400xf32, #tpu.memory_space<vmem>> -> memref<1x400xf32, #tpu.memory_space<vmem>>
      %488 = tpu.memref_squeeze %487 : memref<1x400xf32, #tpu.memory_space<vmem>> -> memref<400xf32, #tpu.memory_space<vmem>>
      %489 = tpu.memref_slice %arg4[%c9_i32_260] : memref<16x!tpu.dma_semaphore, #tpu.memory_space<semaphore_mem>> -> memref<1x!tpu.dma_semaphore, #tpu.memory_space<semaphore_mem>>
      %490 = tpu.memref_squeeze %489 : memref<1x!tpu.dma_semaphore, #tpu.memory_space<semaphore_mem>> -> memref<!tpu.dma_semaphore, #tpu.memory_space<semaphore_mem>>
      tpu.wait_dma2 semaphore(%490 : memref<!tpu.dma_semaphore, #tpu.memory_space<semaphore_mem>>) src(%486 : memref<400xf32, #tpu.memory_space<any>>) dst(%488 : memref<400xf32, #tpu.memory_space<vmem>>)
      %c0_i32_263 = arith.constant 0 : i32
      %c0_i32_264 = arith.constant 0 : i32
      %c10_i32_265 = arith.constant 10 : i32
      %c0_i32_266 = arith.constant 0 : i32
      %491 = tpu.memref_slice %arg2[%c0_i32_263, %c0_i32_266] : memref<40x400xf32, #tpu.memory_space<any>> -> memref<1x400xf32, #tpu.memory_space<any>>
      %492 = tpu.memref_squeeze %491 : memref<1x400xf32, #tpu.memory_space<any>> -> memref<400xf32, #tpu.memory_space<any>>
      %c0_i32_267 = arith.constant 0 : i32
      %493 = tpu.memref_slice %arg3[%c0_i32_264, %c0_i32_267] : memref<24x400xf32, #tpu.memory_space<vmem>> -> memref<1x400xf32, #tpu.memory_space<vmem>>
      %494 = tpu.memref_squeeze %493 : memref<1x400xf32, #tpu.memory_space<vmem>> -> memref<400xf32, #tpu.memory_space<vmem>>
      %495 = tpu.memref_slice %arg4[%c10_i32_265] : memref<16x!tpu.dma_semaphore, #tpu.memory_space<semaphore_mem>> -> memref<1x!tpu.dma_semaphore, #tpu.memory_space<semaphore_mem>>
      %496 = tpu.memref_squeeze %495 : memref<1x!tpu.dma_semaphore, #tpu.memory_space<semaphore_mem>> -> memref<!tpu.dma_semaphore, #tpu.memory_space<semaphore_mem>>
      tpu.wait_dma2 semaphore(%496 : memref<!tpu.dma_semaphore, #tpu.memory_space<semaphore_mem>>) src(%492 : memref<400xf32, #tpu.memory_space<any>>) dst(%494 : memref<400xf32, #tpu.memory_space<vmem>>)
      %c0_i32_268 = arith.constant 0 : i32
      %c0_i32_269 = arith.constant 0 : i32
      %c11_i32_270 = arith.constant 11 : i32
      %c0_i32_271 = arith.constant 0 : i32
      %497 = tpu.memref_slice %arg2[%c0_i32_268, %c0_i32_271] : memref<40x400xf32, #tpu.memory_space<any>> -> memref<1x400xf32, #tpu.memory_space<any>>
      %498 = tpu.memref_squeeze %497 : memref<1x400xf32, #tpu.memory_space<any>> -> memref<400xf32, #tpu.memory_space<any>>
      %c0_i32_272 = arith.constant 0 : i32
      %499 = tpu.memref_slice %arg3[%c0_i32_269, %c0_i32_272] : memref<24x400xf32, #tpu.memory_space<vmem>> -> memref<1x400xf32, #tpu.memory_space<vmem>>
      %500 = tpu.memref_squeeze %499 : memref<1x400xf32, #tpu.memory_space<vmem>> -> memref<400xf32, #tpu.memory_space<vmem>>
      %501 = tpu.memref_slice %arg4[%c11_i32_270] : memref<16x!tpu.dma_semaphore, #tpu.memory_space<semaphore_mem>> -> memref<1x!tpu.dma_semaphore, #tpu.memory_space<semaphore_mem>>
      %502 = tpu.memref_squeeze %501 : memref<1x!tpu.dma_semaphore, #tpu.memory_space<semaphore_mem>> -> memref<!tpu.dma_semaphore, #tpu.memory_space<semaphore_mem>>
      tpu.wait_dma2 semaphore(%502 : memref<!tpu.dma_semaphore, #tpu.memory_space<semaphore_mem>>) src(%498 : memref<400xf32, #tpu.memory_space<any>>) dst(%500 : memref<400xf32, #tpu.memory_space<vmem>>)
      %c0_i32_273 = arith.constant 0 : i32
      %c0_i32_274 = arith.constant 0 : i32
      %c12_i32_275 = arith.constant 12 : i32
      %c0_i32_276 = arith.constant 0 : i32
      %503 = tpu.memref_slice %arg2[%c0_i32_273, %c0_i32_276] : memref<40x400xf32, #tpu.memory_space<any>> -> memref<1x400xf32, #tpu.memory_space<any>>
      %504 = tpu.memref_squeeze %503 : memref<1x400xf32, #tpu.memory_space<any>> -> memref<400xf32, #tpu.memory_space<any>>
      %c0_i32_277 = arith.constant 0 : i32
      %505 = tpu.memref_slice %arg3[%c0_i32_274, %c0_i32_277] : memref<24x400xf32, #tpu.memory_space<vmem>> -> memref<1x400xf32, #tpu.memory_space<vmem>>
      %506 = tpu.memref_squeeze %505 : memref<1x400xf32, #tpu.memory_space<vmem>> -> memref<400xf32, #tpu.memory_space<vmem>>
      %507 = tpu.memref_slice %arg4[%c12_i32_275] : memref<16x!tpu.dma_semaphore, #tpu.memory_space<semaphore_mem>> -> memref<1x!tpu.dma_semaphore, #tpu.memory_space<semaphore_mem>>
      %508 = tpu.memref_squeeze %507 : memref<1x!tpu.dma_semaphore, #tpu.memory_space<semaphore_mem>> -> memref<!tpu.dma_semaphore, #tpu.memory_space<semaphore_mem>>
      tpu.wait_dma2 semaphore(%508 : memref<!tpu.dma_semaphore, #tpu.memory_space<semaphore_mem>>) src(%504 : memref<400xf32, #tpu.memory_space<any>>) dst(%506 : memref<400xf32, #tpu.memory_space<vmem>>)
      %c0_i32_278 = arith.constant 0 : i32
      %c0_i32_279 = arith.constant 0 : i32
      %c13_i32_280 = arith.constant 13 : i32
      %c0_i32_281 = arith.constant 0 : i32
      %509 = tpu.memref_slice %arg2[%c0_i32_278, %c0_i32_281] : memref<40x400xf32, #tpu.memory_space<any>> -> memref<1x400xf32, #tpu.memory_space<any>>
      %510 = tpu.memref_squeeze %509 : memref<1x400xf32, #tpu.memory_space<any>> -> memref<400xf32, #tpu.memory_space<any>>
      %c0_i32_282 = arith.constant 0 : i32
      %511 = tpu.memref_slice %arg3[%c0_i32_279, %c0_i32_282] : memref<24x400xf32, #tpu.memory_space<vmem>> -> memref<1x400xf32, #tpu.memory_space<vmem>>
      %512 = tpu.memref_squeeze %511 : memref<1x400xf32, #tpu.memory_space<vmem>> -> memref<400xf32, #tpu.memory_space<vmem>>
      %513 = tpu.memref_slice %arg4[%c13_i32_280] : memref<16x!tpu.dma_semaphore, #tpu.memory_space<semaphore_mem>> -> memref<1x!tpu.dma_semaphore, #tpu.memory_space<semaphore_mem>>
      %514 = tpu.memref_squeeze %513 : memref<1x!tpu.dma_semaphore, #tpu.memory_space<semaphore_mem>> -> memref<!tpu.dma_semaphore, #tpu.memory_space<semaphore_mem>>
      tpu.wait_dma2 semaphore(%514 : memref<!tpu.dma_semaphore, #tpu.memory_space<semaphore_mem>>) src(%510 : memref<400xf32, #tpu.memory_space<any>>) dst(%512 : memref<400xf32, #tpu.memory_space<vmem>>)
      %c0_i32_283 = arith.constant 0 : i32
      %c0_i32_284 = arith.constant 0 : i32
      %c14_i32_285 = arith.constant 14 : i32
      %c0_i32_286 = arith.constant 0 : i32
      %515 = tpu.memref_slice %arg2[%c0_i32_283, %c0_i32_286] : memref<40x400xf32, #tpu.memory_space<any>> -> memref<1x400xf32, #tpu.memory_space<any>>
      %516 = tpu.memref_squeeze %515 : memref<1x400xf32, #tpu.memory_space<any>> -> memref<400xf32, #tpu.memory_space<any>>
      %c0_i32_287 = arith.constant 0 : i32
      %517 = tpu.memref_slice %arg3[%c0_i32_284, %c0_i32_287] : memref<24x400xf32, #tpu.memory_space<vmem>> -> memref<1x400xf32, #tpu.memory_space<vmem>>
      %518 = tpu.memref_squeeze %517 : memref<1x400xf32, #tpu.memory_space<vmem>> -> memref<400xf32, #tpu.memory_space<vmem>>
      %519 = tpu.memref_slice %arg4[%c14_i32_285] : memref<16x!tpu.dma_semaphore, #tpu.memory_space<semaphore_mem>> -> memref<1x!tpu.dma_semaphore, #tpu.memory_space<semaphore_mem>>
      %520 = tpu.memref_squeeze %519 : memref<1x!tpu.dma_semaphore, #tpu.memory_space<semaphore_mem>> -> memref<!tpu.dma_semaphore, #tpu.memory_space<semaphore_mem>>
      tpu.wait_dma2 semaphore(%520 : memref<!tpu.dma_semaphore, #tpu.memory_space<semaphore_mem>>) src(%516 : memref<400xf32, #tpu.memory_space<any>>) dst(%518 : memref<400xf32, #tpu.memory_space<vmem>>)
      %c0_i32_288 = arith.constant 0 : i32
      %c0_i32_289 = arith.constant 0 : i32
      %c15_i32_290 = arith.constant 15 : i32
      %c0_i32_291 = arith.constant 0 : i32
      %521 = tpu.memref_slice %arg2[%c0_i32_288, %c0_i32_291] : memref<40x400xf32, #tpu.memory_space<any>> -> memref<1x400xf32, #tpu.memory_space<any>>
      %522 = tpu.memref_squeeze %521 : memref<1x400xf32, #tpu.memory_space<any>> -> memref<400xf32, #tpu.memory_space<any>>
      %c0_i32_292 = arith.constant 0 : i32
      %523 = tpu.memref_slice %arg3[%c0_i32_289, %c0_i32_292] : memref<24x400xf32, #tpu.memory_space<vmem>> -> memref<1x400xf32, #tpu.memory_space<vmem>>
      %524 = tpu.memref_squeeze %523 : memref<1x400xf32, #tpu.memory_space<vmem>> -> memref<400xf32, #tpu.memory_space<vmem>>
      %525 = tpu.memref_slice %arg4[%c15_i32_290] : memref<16x!tpu.dma_semaphore, #tpu.memory_space<semaphore_mem>> -> memref<1x!tpu.dma_semaphore, #tpu.memory_space<semaphore_mem>>
      %526 = tpu.memref_squeeze %525 : memref<1x!tpu.dma_semaphore, #tpu.memory_space<semaphore_mem>> -> memref<!tpu.dma_semaphore, #tpu.memory_space<semaphore_mem>>
      tpu.wait_dma2 semaphore(%526 : memref<!tpu.dma_semaphore, #tpu.memory_space<semaphore_mem>>) src(%522 : memref<400xf32, #tpu.memory_space<any>>) dst(%524 : memref<400xf32, #tpu.memory_space<vmem>>)
    } else {
    }
    %c1_i32_0 = arith.constant 1 : i32
    %4 = arith.cmpi eq, %arg0, %c1_i32_0 : i32
    %5 = arith.extui %4 : i1 to i32
    %c0_i32_1 = arith.constant 0 : i32
    %6 = arith.cmpi ne, %5, %c0_i32_1 : i32
    scf.if %6 {
      %c0_i32_2 = arith.constant 0 : i32
      %7 = arith.addi %0, %c0_i32_2 : i32
      %8 = arith.index_cast %7 : i32 to index
      %9 = memref.load %arg1[%8] : memref<40xi32, #tpu.memory_space<smem>>
      %c0_i32_3 = arith.constant 0 : i32
      %c0_i32_4 = arith.constant 0 : i32
      %c0_i32_5 = arith.constant 0 : i32
      %10 = tpu.memref_slice %arg2[%9, %c0_i32_5] : memref<40x400xf32, #tpu.memory_space<any>> -> memref<1x400xf32, #tpu.memory_space<any>>
      %11 = tpu.memref_squeeze %10 : memref<1x400xf32, #tpu.memory_space<any>> -> memref<400xf32, #tpu.memory_space<any>>
      %c0_i32_6 = arith.constant 0 : i32
      %12 = tpu.memref_slice %arg3[%c0_i32_3, %c0_i32_6] : memref<24x400xf32, #tpu.memory_space<vmem>> -> memref<1x400xf32, #tpu.memory_space<vmem>>
      %13 = tpu.memref_squeeze %12 : memref<1x400xf32, #tpu.memory_space<vmem>> -> memref<400xf32, #tpu.memory_space<vmem>>
      %14 = tpu.memref_slice %arg4[%c0_i32_4] : memref<16x!tpu.dma_semaphore, #tpu.memory_space<semaphore_mem>> -> memref<1x!tpu.dma_semaphore, #tpu.memory_space<semaphore_mem>>
      %15 = tpu.memref_squeeze %14 : memref<1x!tpu.dma_semaphore, #tpu.memory_space<semaphore_mem>> -> memref<!tpu.dma_semaphore, #tpu.memory_space<semaphore_mem>>
      tpu.enqueue_dma source(%11 : memref<400xf32, #tpu.memory_space<any>>) target(%13 : memref<400xf32, #tpu.memory_space<vmem>>) target_semaphore(%15 : memref<!tpu.dma_semaphore, #tpu.memory_space<semaphore_mem>>)
      %c1_i32_7 = arith.constant 1 : i32
      %16 = arith.addi %0, %c1_i32_7 : i32
      %17 = arith.index_cast %16 : i32 to index
      %18 = memref.load %arg1[%17] : memref<40xi32, #tpu.memory_space<smem>>
      %c1_i32_8 = arith.constant 1 : i32
      %c1_i32_9 = arith.constant 1 : i32
      %c0_i32_10 = arith.constant 0 : i32
      %19 = tpu.memref_slice %arg2[%18, %c0_i32_10] : memref<40x400xf32, #tpu.memory_space<any>> -> memref<1x400xf32, #tpu.memory_space<any>>
      %20 = tpu.memref_squeeze %19 : memref<1x400xf32, #tpu.memory_space<any>> -> memref<400xf32, #tpu.memory_space<any>>
      %c0_i32_11 = arith.constant 0 : i32
      %21 = tpu.memref_slice %arg3[%c1_i32_8, %c0_i32_11] : memref<24x400xf32, #tpu.memory_space<vmem>> -> memref<1x400xf32, #tpu.memory_space<vmem>>
      %22 = tpu.memref_squeeze %21 : memref<1x400xf32, #tpu.memory_space<vmem>> -> memref<400xf32, #tpu.memory_space<vmem>>
      %23 = tpu.memref_slice %arg4[%c1_i32_9] : memref<16x!tpu.dma_semaphore, #tpu.memory_space<semaphore_mem>> -> memref<1x!tpu.dma_semaphore, #tpu.memory_space<semaphore_mem>>
      %24 = tpu.memref_squeeze %23 : memref<1x!tpu.dma_semaphore, #tpu.memory_space<semaphore_mem>> -> memref<!tpu.dma_semaphore, #tpu.memory_space<semaphore_mem>>
      tpu.enqueue_dma source(%20 : memref<400xf32, #tpu.memory_space<any>>) target(%22 : memref<400xf32, #tpu.memory_space<vmem>>) target_semaphore(%24 : memref<!tpu.dma_semaphore, #tpu.memory_space<semaphore_mem>>)
      %c2_i32 = arith.constant 2 : i32
      %25 = arith.addi %0, %c2_i32 : i32
      %26 = arith.index_cast %25 : i32 to index
      %27 = memref.load %arg1[%26] : memref<40xi32, #tpu.memory_space<smem>>
      %c2_i32_12 = arith.constant 2 : i32
      %c2_i32_13 = arith.constant 2 : i32
      %c0_i32_14 = arith.constant 0 : i32
      %28 = tpu.memref_slice %arg2[%27, %c0_i32_14] : memref<40x400xf32, #tpu.memory_space<any>> -> memref<1x400xf32, #tpu.memory_space<any>>
      %29 = tpu.memref_squeeze %28 : memref<1x400xf32, #tpu.memory_space<any>> -> memref<400xf32, #tpu.memory_space<any>>
      %c0_i32_15 = arith.constant 0 : i32
      %30 = tpu.memref_slice %arg3[%c2_i32_12, %c0_i32_15] : memref<24x400xf32, #tpu.memory_space<vmem>> -> memref<1x400xf32, #tpu.memory_space<vmem>>
      %31 = tpu.memref_squeeze %30 : memref<1x400xf32, #tpu.memory_space<vmem>> -> memref<400xf32, #tpu.memory_space<vmem>>
      %32 = tpu.memref_slice %arg4[%c2_i32_13] : memref<16x!tpu.dma_semaphore, #tpu.memory_space<semaphore_mem>> -> memref<1x!tpu.dma_semaphore, #tpu.memory_space<semaphore_mem>>
      %33 = tpu.memref_squeeze %32 : memref<1x!tpu.dma_semaphore, #tpu.memory_space<semaphore_mem>> -> memref<!tpu.dma_semaphore, #tpu.memory_space<semaphore_mem>>
      tpu.enqueue_dma source(%29 : memref<400xf32, #tpu.memory_space<any>>) target(%31 : memref<400xf32, #tpu.memory_space<vmem>>) target_semaphore(%33 : memref<!tpu.dma_semaphore, #tpu.memory_space<semaphore_mem>>)
      %c3_i32 = arith.constant 3 : i32
      %34 = arith.addi %0, %c3_i32 : i32
      %35 = arith.index_cast %34 : i32 to index
      %36 = memref.load %arg1[%35] : memref<40xi32, #tpu.memory_space<smem>>
      %c3_i32_16 = arith.constant 3 : i32
      %c3_i32_17 = arith.constant 3 : i32
      %c0_i32_18 = arith.constant 0 : i32
      %37 = tpu.memref_slice %arg2[%36, %c0_i32_18] : memref<40x400xf32, #tpu.memory_space<any>> -> memref<1x400xf32, #tpu.memory_space<any>>
      %38 = tpu.memref_squeeze %37 : memref<1x400xf32, #tpu.memory_space<any>> -> memref<400xf32, #tpu.memory_space<any>>
      %c0_i32_19 = arith.constant 0 : i32
      %39 = tpu.memref_slice %arg3[%c3_i32_16, %c0_i32_19] : memref<24x400xf32, #tpu.memory_space<vmem>> -> memref<1x400xf32, #tpu.memory_space<vmem>>
      %40 = tpu.memref_squeeze %39 : memref<1x400xf32, #tpu.memory_space<vmem>> -> memref<400xf32, #tpu.memory_space<vmem>>
      %41 = tpu.memref_slice %arg4[%c3_i32_17] : memref<16x!tpu.dma_semaphore, #tpu.memory_space<semaphore_mem>> -> memref<1x!tpu.dma_semaphore, #tpu.memory_space<semaphore_mem>>
      %42 = tpu.memref_squeeze %41 : memref<1x!tpu.dma_semaphore, #tpu.memory_space<semaphore_mem>> -> memref<!tpu.dma_semaphore, #tpu.memory_space<semaphore_mem>>
      tpu.enqueue_dma source(%38 : memref<400xf32, #tpu.memory_space<any>>) target(%40 : memref<400xf32, #tpu.memory_space<vmem>>) target_semaphore(%42 : memref<!tpu.dma_semaphore, #tpu.memory_space<semaphore_mem>>)
      %c4_i32 = arith.constant 4 : i32
      %43 = arith.addi %0, %c4_i32 : i32
      %44 = arith.index_cast %43 : i32 to index
      %45 = memref.load %arg1[%44] : memref<40xi32, #tpu.memory_space<smem>>
      %c4_i32_20 = arith.constant 4 : i32
      %c4_i32_21 = arith.constant 4 : i32
      %c0_i32_22 = arith.constant 0 : i32
      %46 = tpu.memref_slice %arg2[%45, %c0_i32_22] : memref<40x400xf32, #tpu.memory_space<any>> -> memref<1x400xf32, #tpu.memory_space<any>>
      %47 = tpu.memref_squeeze %46 : memref<1x400xf32, #tpu.memory_space<any>> -> memref<400xf32, #tpu.memory_space<any>>
      %c0_i32_23 = arith.constant 0 : i32
      %48 = tpu.memref_slice %arg3[%c4_i32_20, %c0_i32_23] : memref<24x400xf32, #tpu.memory_space<vmem>> -> memref<1x400xf32, #tpu.memory_space<vmem>>
      %49 = tpu.memref_squeeze %48 : memref<1x400xf32, #tpu.memory_space<vmem>> -> memref<400xf32, #tpu.memory_space<vmem>>
      %50 = tpu.memref_slice %arg4[%c4_i32_21] : memref<16x!tpu.dma_semaphore, #tpu.memory_space<semaphore_mem>> -> memref<1x!tpu.dma_semaphore, #tpu.memory_space<semaphore_mem>>
      %51 = tpu.memref_squeeze %50 : memref<1x!tpu.dma_semaphore, #tpu.memory_space<semaphore_mem>> -> memref<!tpu.dma_semaphore, #tpu.memory_space<semaphore_mem>>
      tpu.enqueue_dma source(%47 : memref<400xf32, #tpu.memory_space<any>>) target(%49 : memref<400xf32, #tpu.memory_space<vmem>>) target_semaphore(%51 : memref<!tpu.dma_semaphore, #tpu.memory_space<semaphore_mem>>)
      %c5_i32 = arith.constant 5 : i32
      %52 = arith.addi %0, %c5_i32 : i32
      %53 = arith.index_cast %52 : i32 to index
      %54 = memref.load %arg1[%53] : memref<40xi32, #tpu.memory_space<smem>>
      %c5_i32_24 = arith.constant 5 : i32
      %c5_i32_25 = arith.constant 5 : i32
      %c0_i32_26 = arith.constant 0 : i32
      %55 = tpu.memref_slice %arg2[%54, %c0_i32_26] : memref<40x400xf32, #tpu.memory_space<any>> -> memref<1x400xf32, #tpu.memory_space<any>>
      %56 = tpu.memref_squeeze %55 : memref<1x400xf32, #tpu.memory_space<any>> -> memref<400xf32, #tpu.memory_space<any>>
      %c0_i32_27 = arith.constant 0 : i32
      %57 = tpu.memref_slice %arg3[%c5_i32_24, %c0_i32_27] : memref<24x400xf32, #tpu.memory_space<vmem>> -> memref<1x400xf32, #tpu.memory_space<vmem>>
      %58 = tpu.memref_squeeze %57 : memref<1x400xf32, #tpu.memory_space<vmem>> -> memref<400xf32, #tpu.memory_space<vmem>>
      %59 = tpu.memref_slice %arg4[%c5_i32_25] : memref<16x!tpu.dma_semaphore, #tpu.memory_space<semaphore_mem>> -> memref<1x!tpu.dma_semaphore, #tpu.memory_space<semaphore_mem>>
      %60 = tpu.memref_squeeze %59 : memref<1x!tpu.dma_semaphore, #tpu.memory_space<semaphore_mem>> -> memref<!tpu.dma_semaphore, #tpu.memory_space<semaphore_mem>>
      tpu.enqueue_dma source(%56 : memref<400xf32, #tpu.memory_space<any>>) target(%58 : memref<400xf32, #tpu.memory_space<vmem>>) target_semaphore(%60 : memref<!tpu.dma_semaphore, #tpu.memory_space<semaphore_mem>>)
      %c6_i32 = arith.constant 6 : i32
      %61 = arith.addi %0, %c6_i32 : i32
      %62 = arith.index_cast %61 : i32 to index
      %63 = memref.load %arg1[%62] : memref<40xi32, #tpu.memory_space<smem>>
      %c6_i32_28 = arith.constant 6 : i32
      %c6_i32_29 = arith.constant 6 : i32
      %c0_i32_30 = arith.constant 0 : i32
      %64 = tpu.memref_slice %arg2[%63, %c0_i32_30] : memref<40x400xf32, #tpu.memory_space<any>> -> memref<1x400xf32, #tpu.memory_space<any>>
      %65 = tpu.memref_squeeze %64 : memref<1x400xf32, #tpu.memory_space<any>> -> memref<400xf32, #tpu.memory_space<any>>
      %c0_i32_31 = arith.constant 0 : i32
      %66 = tpu.memref_slice %arg3[%c6_i32_28, %c0_i32_31] : memref<24x400xf32, #tpu.memory_space<vmem>> -> memref<1x400xf32, #tpu.memory_space<vmem>>
      %67 = tpu.memref_squeeze %66 : memref<1x400xf32, #tpu.memory_space<vmem>> -> memref<400xf32, #tpu.memory_space<vmem>>
      %68 = tpu.memref_slice %arg4[%c6_i32_29] : memref<16x!tpu.dma_semaphore, #tpu.memory_space<semaphore_mem>> -> memref<1x!tpu.dma_semaphore, #tpu.memory_space<semaphore_mem>>
      %69 = tpu.memref_squeeze %68 : memref<1x!tpu.dma_semaphore, #tpu.memory_space<semaphore_mem>> -> memref<!tpu.dma_semaphore, #tpu.memory_space<semaphore_mem>>
      tpu.enqueue_dma source(%65 : memref<400xf32, #tpu.memory_space<any>>) target(%67 : memref<400xf32, #tpu.memory_space<vmem>>) target_semaphore(%69 : memref<!tpu.dma_semaphore, #tpu.memory_space<semaphore_mem>>)
      %c7_i32 = arith.constant 7 : i32
      %70 = arith.addi %0, %c7_i32 : i32
      %71 = arith.index_cast %70 : i32 to index
      %72 = memref.load %arg1[%71] : memref<40xi32, #tpu.memory_space<smem>>
      %c7_i32_32 = arith.constant 7 : i32
      %c7_i32_33 = arith.constant 7 : i32
      %c0_i32_34 = arith.constant 0 : i32
      %73 = tpu.memref_slice %arg2[%72, %c0_i32_34] : memref<40x400xf32, #tpu.memory_space<any>> -> memref<1x400xf32, #tpu.memory_space<any>>
      %74 = tpu.memref_squeeze %73 : memref<1x400xf32, #tpu.memory_space<any>> -> memref<400xf32, #tpu.memory_space<any>>
      %c0_i32_35 = arith.constant 0 : i32
      %75 = tpu.memref_slice %arg3[%c7_i32_32, %c0_i32_35] : memref<24x400xf32, #tpu.memory_space<vmem>> -> memref<1x400xf32, #tpu.memory_space<vmem>>
      %76 = tpu.memref_squeeze %75 : memref<1x400xf32, #tpu.memory_space<vmem>> -> memref<400xf32, #tpu.memory_space<vmem>>
      %77 = tpu.memref_slice %arg4[%c7_i32_33] : memref<16x!tpu.dma_semaphore, #tpu.memory_space<semaphore_mem>> -> memref<1x!tpu.dma_semaphore, #tpu.memory_space<semaphore_mem>>
      %78 = tpu.memref_squeeze %77 : memref<1x!tpu.dma_semaphore, #tpu.memory_space<semaphore_mem>> -> memref<!tpu.dma_semaphore, #tpu.memory_space<semaphore_mem>>
      tpu.enqueue_dma source(%74 : memref<400xf32, #tpu.memory_space<any>>) target(%76 : memref<400xf32, #tpu.memory_space<vmem>>) target_semaphore(%78 : memref<!tpu.dma_semaphore, #tpu.memory_space<semaphore_mem>>)
      %c8_i32 = arith.constant 8 : i32
      %79 = arith.addi %0, %c8_i32 : i32
      %80 = arith.index_cast %79 : i32 to index
      %81 = memref.load %arg1[%80] : memref<40xi32, #tpu.memory_space<smem>>
      %c8_i32_36 = arith.constant 8 : i32
      %c8_i32_37 = arith.constant 8 : i32
      %c0_i32_38 = arith.constant 0 : i32
      %82 = tpu.memref_slice %arg2[%81, %c0_i32_38] : memref<40x400xf32, #tpu.memory_space<any>> -> memref<1x400xf32, #tpu.memory_space<any>>
      %83 = tpu.memref_squeeze %82 : memref<1x400xf32, #tpu.memory_space<any>> -> memref<400xf32, #tpu.memory_space<any>>
      %c0_i32_39 = arith.constant 0 : i32
      %84 = tpu.memref_slice %arg3[%c8_i32_36, %c0_i32_39] : memref<24x400xf32, #tpu.memory_space<vmem>> -> memref<1x400xf32, #tpu.memory_space<vmem>>
      %85 = tpu.memref_squeeze %84 : memref<1x400xf32, #tpu.memory_space<vmem>> -> memref<400xf32, #tpu.memory_space<vmem>>
      %86 = tpu.memref_slice %arg4[%c8_i32_37] : memref<16x!tpu.dma_semaphore, #tpu.memory_space<semaphore_mem>> -> memref<1x!tpu.dma_semaphore, #tpu.memory_space<semaphore_mem>>
      %87 = tpu.memref_squeeze %86 : memref<1x!tpu.dma_semaphore, #tpu.memory_space<semaphore_mem>> -> memref<!tpu.dma_semaphore, #tpu.memory_space<semaphore_mem>>
      tpu.enqueue_dma source(%83 : memref<400xf32, #tpu.memory_space<any>>) target(%85 : memref<400xf32, #tpu.memory_space<vmem>>) target_semaphore(%87 : memref<!tpu.dma_semaphore, #tpu.memory_space<semaphore_mem>>)
      %c9_i32 = arith.constant 9 : i32
      %88 = arith.addi %0, %c9_i32 : i32
      %89 = arith.index_cast %88 : i32 to index
      %90 = memref.load %arg1[%89] : memref<40xi32, #tpu.memory_space<smem>>
      %c9_i32_40 = arith.constant 9 : i32
      %c9_i32_41 = arith.constant 9 : i32
      %c0_i32_42 = arith.constant 0 : i32
      %91 = tpu.memref_slice %arg2[%90, %c0_i32_42] : memref<40x400xf32, #tpu.memory_space<any>> -> memref<1x400xf32, #tpu.memory_space<any>>
      %92 = tpu.memref_squeeze %91 : memref<1x400xf32, #tpu.memory_space<any>> -> memref<400xf32, #tpu.memory_space<any>>
      %c0_i32_43 = arith.constant 0 : i32
      %93 = tpu.memref_slice %arg3[%c9_i32_40, %c0_i32_43] : memref<24x400xf32, #tpu.memory_space<vmem>> -> memref<1x400xf32, #tpu.memory_space<vmem>>
      %94 = tpu.memref_squeeze %93 : memref<1x400xf32, #tpu.memory_space<vmem>> -> memref<400xf32, #tpu.memory_space<vmem>>
      %95 = tpu.memref_slice %arg4[%c9_i32_41] : memref<16x!tpu.dma_semaphore, #tpu.memory_space<semaphore_mem>> -> memref<1x!tpu.dma_semaphore, #tpu.memory_space<semaphore_mem>>
      %96 = tpu.memref_squeeze %95 : memref<1x!tpu.dma_semaphore, #tpu.memory_space<semaphore_mem>> -> memref<!tpu.dma_semaphore, #tpu.memory_space<semaphore_mem>>
      tpu.enqueue_dma source(%92 : memref<400xf32, #tpu.memory_space<any>>) target(%94 : memref<400xf32, #tpu.memory_space<vmem>>) target_semaphore(%96 : memref<!tpu.dma_semaphore, #tpu.memory_space<semaphore_mem>>)
      %c10_i32 = arith.constant 10 : i32
      %97 = arith.addi %0, %c10_i32 : i32
      %98 = arith.index_cast %97 : i32 to index
      %99 = memref.load %arg1[%98] : memref<40xi32, #tpu.memory_space<smem>>
      %c10_i32_44 = arith.constant 10 : i32
      %c10_i32_45 = arith.constant 10 : i32
      %c0_i32_46 = arith.constant 0 : i32
      %100 = tpu.memref_slice %arg2[%99, %c0_i32_46] : memref<40x400xf32, #tpu.memory_space<any>> -> memref<1x400xf32, #tpu.memory_space<any>>
      %101 = tpu.memref_squeeze %100 : memref<1x400xf32, #tpu.memory_space<any>> -> memref<400xf32, #tpu.memory_space<any>>
      %c0_i32_47 = arith.constant 0 : i32
      %102 = tpu.memref_slice %arg3[%c10_i32_44, %c0_i32_47] : memref<24x400xf32, #tpu.memory_space<vmem>> -> memref<1x400xf32, #tpu.memory_space<vmem>>
      %103 = tpu.memref_squeeze %102 : memref<1x400xf32, #tpu.memory_space<vmem>> -> memref<400xf32, #tpu.memory_space<vmem>>
      %104 = tpu.memref_slice %arg4[%c10_i32_45] : memref<16x!tpu.dma_semaphore, #tpu.memory_space<semaphore_mem>> -> memref<1x!tpu.dma_semaphore, #tpu.memory_space<semaphore_mem>>
      %105 = tpu.memref_squeeze %104 : memref<1x!tpu.dma_semaphore, #tpu.memory_space<semaphore_mem>> -> memref<!tpu.dma_semaphore, #tpu.memory_space<semaphore_mem>>
      tpu.enqueue_dma source(%101 : memref<400xf32, #tpu.memory_space<any>>) target(%103 : memref<400xf32, #tpu.memory_space<vmem>>) target_semaphore(%105 : memref<!tpu.dma_semaphore, #tpu.memory_space<semaphore_mem>>)
      %c11_i32 = arith.constant 11 : i32
      %106 = arith.addi %0, %c11_i32 : i32
      %107 = arith.index_cast %106 : i32 to index
      %108 = memref.load %arg1[%107] : memref<40xi32, #tpu.memory_space<smem>>
      %c11_i32_48 = arith.constant 11 : i32
      %c11_i32_49 = arith.constant 11 : i32
      %c0_i32_50 = arith.constant 0 : i32
      %109 = tpu.memref_slice %arg2[%108, %c0_i32_50] : memref<40x400xf32, #tpu.memory_space<any>> -> memref<1x400xf32, #tpu.memory_space<any>>
      %110 = tpu.memref_squeeze %109 : memref<1x400xf32, #tpu.memory_space<any>> -> memref<400xf32, #tpu.memory_space<any>>
      %c0_i32_51 = arith.constant 0 : i32
      %111 = tpu.memref_slice %arg3[%c11_i32_48, %c0_i32_51] : memref<24x400xf32, #tpu.memory_space<vmem>> -> memref<1x400xf32, #tpu.memory_space<vmem>>
      %112 = tpu.memref_squeeze %111 : memref<1x400xf32, #tpu.memory_space<vmem>> -> memref<400xf32, #tpu.memory_space<vmem>>
      %113 = tpu.memref_slice %arg4[%c11_i32_49] : memref<16x!tpu.dma_semaphore, #tpu.memory_space<semaphore_mem>> -> memref<1x!tpu.dma_semaphore, #tpu.memory_space<semaphore_mem>>
      %114 = tpu.memref_squeeze %113 : memref<1x!tpu.dma_semaphore, #tpu.memory_space<semaphore_mem>> -> memref<!tpu.dma_semaphore, #tpu.memory_space<semaphore_mem>>
      tpu.enqueue_dma source(%110 : memref<400xf32, #tpu.memory_space<any>>) target(%112 : memref<400xf32, #tpu.memory_space<vmem>>) target_semaphore(%114 : memref<!tpu.dma_semaphore, #tpu.memory_space<semaphore_mem>>)
      %c12_i32 = arith.constant 12 : i32
      %115 = arith.addi %0, %c12_i32 : i32
      %116 = arith.index_cast %115 : i32 to index
      %117 = memref.load %arg1[%116] : memref<40xi32, #tpu.memory_space<smem>>
      %c12_i32_52 = arith.constant 12 : i32
      %c12_i32_53 = arith.constant 12 : i32
      %c0_i32_54 = arith.constant 0 : i32
      %118 = tpu.memref_slice %arg2[%117, %c0_i32_54] : memref<40x400xf32, #tpu.memory_space<any>> -> memref<1x400xf32, #tpu.memory_space<any>>
      %119 = tpu.memref_squeeze %118 : memref<1x400xf32, #tpu.memory_space<any>> -> memref<400xf32, #tpu.memory_space<any>>
      %c0_i32_55 = arith.constant 0 : i32
      %120 = tpu.memref_slice %arg3[%c12_i32_52, %c0_i32_55] : memref<24x400xf32, #tpu.memory_space<vmem>> -> memref<1x400xf32, #tpu.memory_space<vmem>>
      %121 = tpu.memref_squeeze %120 : memref<1x400xf32, #tpu.memory_space<vmem>> -> memref<400xf32, #tpu.memory_space<vmem>>
      %122 = tpu.memref_slice %arg4[%c12_i32_53] : memref<16x!tpu.dma_semaphore, #tpu.memory_space<semaphore_mem>> -> memref<1x!tpu.dma_semaphore, #tpu.memory_space<semaphore_mem>>
      %123 = tpu.memref_squeeze %122 : memref<1x!tpu.dma_semaphore, #tpu.memory_space<semaphore_mem>> -> memref<!tpu.dma_semaphore, #tpu.memory_space<semaphore_mem>>
      tpu.enqueue_dma source(%119 : memref<400xf32, #tpu.memory_space<any>>) target(%121 : memref<400xf32, #tpu.memory_space<vmem>>) target_semaphore(%123 : memref<!tpu.dma_semaphore, #tpu.memory_space<semaphore_mem>>)
      %c13_i32 = arith.constant 13 : i32
      %124 = arith.addi %0, %c13_i32 : i32
      %125 = arith.index_cast %124 : i32 to index
      %126 = memref.load %arg1[%125] : memref<40xi32, #tpu.memory_space<smem>>
      %c13_i32_56 = arith.constant 13 : i32
      %c13_i32_57 = arith.constant 13 : i32
      %c0_i32_58 = arith.constant 0 : i32
      %127 = tpu.memref_slice %arg2[%126, %c0_i32_58] : memref<40x400xf32, #tpu.memory_space<any>> -> memref<1x400xf32, #tpu.memory_space<any>>
      %128 = tpu.memref_squeeze %127 : memref<1x400xf32, #tpu.memory_space<any>> -> memref<400xf32, #tpu.memory_space<any>>
      %c0_i32_59 = arith.constant 0 : i32
      %129 = tpu.memref_slice %arg3[%c13_i32_56, %c0_i32_59] : memref<24x400xf32, #tpu.memory_space<vmem>> -> memref<1x400xf32, #tpu.memory_space<vmem>>
      %130 = tpu.memref_squeeze %129 : memref<1x400xf32, #tpu.memory_space<vmem>> -> memref<400xf32, #tpu.memory_space<vmem>>
      %131 = tpu.memref_slice %arg4[%c13_i32_57] : memref<16x!tpu.dma_semaphore, #tpu.memory_space<semaphore_mem>> -> memref<1x!tpu.dma_semaphore, #tpu.memory_space<semaphore_mem>>
      %132 = tpu.memref_squeeze %131 : memref<1x!tpu.dma_semaphore, #tpu.memory_space<semaphore_mem>> -> memref<!tpu.dma_semaphore, #tpu.memory_space<semaphore_mem>>
      tpu.enqueue_dma source(%128 : memref<400xf32, #tpu.memory_space<any>>) target(%130 : memref<400xf32, #tpu.memory_space<vmem>>) target_semaphore(%132 : memref<!tpu.dma_semaphore, #tpu.memory_space<semaphore_mem>>)
      %c14_i32 = arith.constant 14 : i32
      %133 = arith.addi %0, %c14_i32 : i32
      %134 = arith.index_cast %133 : i32 to index
      %135 = memref.load %arg1[%134] : memref<40xi32, #tpu.memory_space<smem>>
      %c14_i32_60 = arith.constant 14 : i32
      %c14_i32_61 = arith.constant 14 : i32
      %c0_i32_62 = arith.constant 0 : i32
      %136 = tpu.memref_slice %arg2[%135, %c0_i32_62] : memref<40x400xf32, #tpu.memory_space<any>> -> memref<1x400xf32, #tpu.memory_space<any>>
      %137 = tpu.memref_squeeze %136 : memref<1x400xf32, #tpu.memory_space<any>> -> memref<400xf32, #tpu.memory_space<any>>
      %c0_i32_63 = arith.constant 0 : i32
      %138 = tpu.memref_slice %arg3[%c14_i32_60, %c0_i32_63] : memref<24x400xf32, #tpu.memory_space<vmem>> -> memref<1x400xf32, #tpu.memory_space<vmem>>
      %139 = tpu.memref_squeeze %138 : memref<1x400xf32, #tpu.memory_space<vmem>> -> memref<400xf32, #tpu.memory_space<vmem>>
      %140 = tpu.memref_slice %arg4[%c14_i32_61] : memref<16x!tpu.dma_semaphore, #tpu.memory_space<semaphore_mem>> -> memref<1x!tpu.dma_semaphore, #tpu.memory_space<semaphore_mem>>
      %141 = tpu.memref_squeeze %140 : memref<1x!tpu.dma_semaphore, #tpu.memory_space<semaphore_mem>> -> memref<!tpu.dma_semaphore, #tpu.memory_space<semaphore_mem>>
      tpu.enqueue_dma source(%137 : memref<400xf32, #tpu.memory_space<any>>) target(%139 : memref<400xf32, #tpu.memory_space<vmem>>) target_semaphore(%141 : memref<!tpu.dma_semaphore, #tpu.memory_space<semaphore_mem>>)
      %c15_i32 = arith.constant 15 : i32
      %142 = arith.addi %0, %c15_i32 : i32
      %143 = arith.index_cast %142 : i32 to index
      %144 = memref.load %arg1[%143] : memref<40xi32, #tpu.memory_space<smem>>
      %c15_i32_64 = arith.constant 15 : i32
      %c15_i32_65 = arith.constant 15 : i32
      %c0_i32_66 = arith.constant 0 : i32
      %145 = tpu.memref_slice %arg2[%144, %c0_i32_66] : memref<40x400xf32, #tpu.memory_space<any>> -> memref<1x400xf32, #tpu.memory_space<any>>
      %146 = tpu.memref_squeeze %145 : memref<1x400xf32, #tpu.memory_space<any>> -> memref<400xf32, #tpu.memory_space<any>>
      %c0_i32_67 = arith.constant 0 : i32
      %147 = tpu.memref_slice %arg3[%c15_i32_64, %c0_i32_67] : memref<24x400xf32, #tpu.memory_space<vmem>> -> memref<1x400xf32, #tpu.memory_space<vmem>>
      %148 = tpu.memref_squeeze %147 : memref<1x400xf32, #tpu.memory_space<vmem>> -> memref<400xf32, #tpu.memory_space<vmem>>
      %149 = tpu.memref_slice %arg4[%c15_i32_65] : memref<16x!tpu.dma_semaphore, #tpu.memory_space<semaphore_mem>> -> memref<1x!tpu.dma_semaphore, #tpu.memory_space<semaphore_mem>>
      %150 = tpu.memref_squeeze %149 : memref<1x!tpu.dma_semaphore, #tpu.memory_space<semaphore_mem>> -> memref<!tpu.dma_semaphore, #tpu.memory_space<semaphore_mem>>
      tpu.enqueue_dma source(%146 : memref<400xf32, #tpu.memory_space<any>>) target(%148 : memref<400xf32, #tpu.memory_space<vmem>>) target_semaphore(%150 : memref<!tpu.dma_semaphore, #tpu.memory_space<semaphore_mem>>)
      %c0_i32_68 = arith.constant 0 : i32
      %c0_i32_69 = arith.constant 0 : i32
      %c0_i32_70 = arith.constant 0 : i32
      %c0_i32_71 = arith.constant 0 : i32
      %151 = tpu.memref_slice %arg2[%c0_i32_68, %c0_i32_71] : memref<40x400xf32, #tpu.memory_space<any>> -> memref<1x400xf32, #tpu.memory_space<any>>
      %152 = tpu.memref_squeeze %151 : memref<1x400xf32, #tpu.memory_space<any>> -> memref<400xf32, #tpu.memory_space<any>>
      %c0_i32_72 = arith.constant 0 : i32
      %153 = tpu.memref_slice %arg3[%c0_i32_69, %c0_i32_72] : memref<24x400xf32, #tpu.memory_space<vmem>> -> memref<1x400xf32, #tpu.memory_space<vmem>>
      %154 = tpu.memref_squeeze %153 : memref<1x400xf32, #tpu.memory_space<vmem>> -> memref<400xf32, #tpu.memory_space<vmem>>
      %155 = tpu.memref_slice %arg4[%c0_i32_70] : memref<16x!tpu.dma_semaphore, #tpu.memory_space<semaphore_mem>> -> memref<1x!tpu.dma_semaphore, #tpu.memory_space<semaphore_mem>>
      %156 = tpu.memref_squeeze %155 : memref<1x!tpu.dma_semaphore, #tpu.memory_space<semaphore_mem>> -> memref<!tpu.dma_semaphore, #tpu.memory_space<semaphore_mem>>
      tpu.wait_dma2 semaphore(%156 : memref<!tpu.dma_semaphore, #tpu.memory_space<semaphore_mem>>) src(%152 : memref<400xf32, #tpu.memory_space<any>>) dst(%154 : memref<400xf32, #tpu.memory_space<vmem>>)
      %c0_i32_73 = arith.constant 0 : i32
      %c0_i32_74 = arith.constant 0 : i32
      %c1_i32_75 = arith.constant 1 : i32
      %c0_i32_76 = arith.constant 0 : i32
      %157 = tpu.memref_slice %arg2[%c0_i32_73, %c0_i32_76] : memref<40x400xf32, #tpu.memory_space<any>> -> memref<1x400xf32, #tpu.memory_space<any>>
      %158 = tpu.memref_squeeze %157 : memref<1x400xf32, #tpu.memory_space<any>> -> memref<400xf32, #tpu.memory_space<any>>
      %c0_i32_77 = arith.constant 0 : i32
      %159 = tpu.memref_slice %arg3[%c0_i32_74, %c0_i32_77] : memref<24x400xf32, #tpu.memory_space<vmem>> -> memref<1x400xf32, #tpu.memory_space<vmem>>
      %160 = tpu.memref_squeeze %159 : memref<1x400xf32, #tpu.memory_space<vmem>> -> memref<400xf32, #tpu.memory_space<vmem>>
      %161 = tpu.memref_slice %arg4[%c1_i32_75] : memref<16x!tpu.dma_semaphore, #tpu.memory_space<semaphore_mem>> -> memref<1x!tpu.dma_semaphore, #tpu.memory_space<semaphore_mem>>
      %162 = tpu.memref_squeeze %161 : memref<1x!tpu.dma_semaphore, #tpu.memory_space<semaphore_mem>> -> memref<!tpu.dma_semaphore, #tpu.memory_space<semaphore_mem>>
      tpu.wait_dma2 semaphore(%162 : memref<!tpu.dma_semaphore, #tpu.memory_space<semaphore_mem>>) src(%158 : memref<400xf32, #tpu.memory_space<any>>) dst(%160 : memref<400xf32, #tpu.memory_space<vmem>>)
      %c0_i32_78 = arith.constant 0 : i32
      %c0_i32_79 = arith.constant 0 : i32
      %c2_i32_80 = arith.constant 2 : i32
      %c0_i32_81 = arith.constant 0 : i32
      %163 = tpu.memref_slice %arg2[%c0_i32_78, %c0_i32_81] : memref<40x400xf32, #tpu.memory_space<any>> -> memref<1x400xf32, #tpu.memory_space<any>>
      %164 = tpu.memref_squeeze %163 : memref<1x400xf32, #tpu.memory_space<any>> -> memref<400xf32, #tpu.memory_space<any>>
      %c0_i32_82 = arith.constant 0 : i32
      %165 = tpu.memref_slice %arg3[%c0_i32_79, %c0_i32_82] : memref<24x400xf32, #tpu.memory_space<vmem>> -> memref<1x400xf32, #tpu.memory_space<vmem>>
      %166 = tpu.memref_squeeze %165 : memref<1x400xf32, #tpu.memory_space<vmem>> -> memref<400xf32, #tpu.memory_space<vmem>>
      %167 = tpu.memref_slice %arg4[%c2_i32_80] : memref<16x!tpu.dma_semaphore, #tpu.memory_space<semaphore_mem>> -> memref<1x!tpu.dma_semaphore, #tpu.memory_space<semaphore_mem>>
      %168 = tpu.memref_squeeze %167 : memref<1x!tpu.dma_semaphore, #tpu.memory_space<semaphore_mem>> -> memref<!tpu.dma_semaphore, #tpu.memory_space<semaphore_mem>>
      tpu.wait_dma2 semaphore(%168 : memref<!tpu.dma_semaphore, #tpu.memory_space<semaphore_mem>>) src(%164 : memref<400xf32, #tpu.memory_space<any>>) dst(%166 : memref<400xf32, #tpu.memory_space<vmem>>)
      %c0_i32_83 = arith.constant 0 : i32
      %c0_i32_84 = arith.constant 0 : i32
      %c3_i32_85 = arith.constant 3 : i32
      %c0_i32_86 = arith.constant 0 : i32
      %169 = tpu.memref_slice %arg2[%c0_i32_83, %c0_i32_86] : memref<40x400xf32, #tpu.memory_space<any>> -> memref<1x400xf32, #tpu.memory_space<any>>
      %170 = tpu.memref_squeeze %169 : memref<1x400xf32, #tpu.memory_space<any>> -> memref<400xf32, #tpu.memory_space<any>>
      %c0_i32_87 = arith.constant 0 : i32
      %171 = tpu.memref_slice %arg3[%c0_i32_84, %c0_i32_87] : memref<24x400xf32, #tpu.memory_space<vmem>> -> memref<1x400xf32, #tpu.memory_space<vmem>>
      %172 = tpu.memref_squeeze %171 : memref<1x400xf32, #tpu.memory_space<vmem>> -> memref<400xf32, #tpu.memory_space<vmem>>
      %173 = tpu.memref_slice %arg4[%c3_i32_85] : memref<16x!tpu.dma_semaphore, #tpu.memory_space<semaphore_mem>> -> memref<1x!tpu.dma_semaphore, #tpu.memory_space<semaphore_mem>>
      %174 = tpu.memref_squeeze %173 : memref<1x!tpu.dma_semaphore, #tpu.memory_space<semaphore_mem>> -> memref<!tpu.dma_semaphore, #tpu.memory_space<semaphore_mem>>
      tpu.wait_dma2 semaphore(%174 : memref<!tpu.dma_semaphore, #tpu.memory_space<semaphore_mem>>) src(%170 : memref<400xf32, #tpu.memory_space<any>>) dst(%172 : memref<400xf32, #tpu.memory_space<vmem>>)
      %c0_i32_88 = arith.constant 0 : i32
      %c0_i32_89 = arith.constant 0 : i32
      %c4_i32_90 = arith.constant 4 : i32
      %c0_i32_91 = arith.constant 0 : i32
      %175 = tpu.memref_slice %arg2[%c0_i32_88, %c0_i32_91] : memref<40x400xf32, #tpu.memory_space<any>> -> memref<1x400xf32, #tpu.memory_space<any>>
      %176 = tpu.memref_squeeze %175 : memref<1x400xf32, #tpu.memory_space<any>> -> memref<400xf32, #tpu.memory_space<any>>
      %c0_i32_92 = arith.constant 0 : i32
      %177 = tpu.memref_slice %arg3[%c0_i32_89, %c0_i32_92] : memref<24x400xf32, #tpu.memory_space<vmem>> -> memref<1x400xf32, #tpu.memory_space<vmem>>
      %178 = tpu.memref_squeeze %177 : memref<1x400xf32, #tpu.memory_space<vmem>> -> memref<400xf32, #tpu.memory_space<vmem>>
      %179 = tpu.memref_slice %arg4[%c4_i32_90] : memref<16x!tpu.dma_semaphore, #tpu.memory_space<semaphore_mem>> -> memref<1x!tpu.dma_semaphore, #tpu.memory_space<semaphore_mem>>
      %180 = tpu.memref_squeeze %179 : memref<1x!tpu.dma_semaphore, #tpu.memory_space<semaphore_mem>> -> memref<!tpu.dma_semaphore, #tpu.memory_space<semaphore_mem>>
      tpu.wait_dma2 semaphore(%180 : memref<!tpu.dma_semaphore, #tpu.memory_space<semaphore_mem>>) src(%176 : memref<400xf32, #tpu.memory_space<any>>) dst(%178 : memref<400xf32, #tpu.memory_space<vmem>>)
      %c0_i32_93 = arith.constant 0 : i32
      %c0_i32_94 = arith.constant 0 : i32
      %c5_i32_95 = arith.constant 5 : i32
      %c0_i32_96 = arith.constant 0 : i32
      %181 = tpu.memref_slice %arg2[%c0_i32_93, %c0_i32_96] : memref<40x400xf32, #tpu.memory_space<any>> -> memref<1x400xf32, #tpu.memory_space<any>>
      %182 = tpu.memref_squeeze %181 : memref<1x400xf32, #tpu.memory_space<any>> -> memref<400xf32, #tpu.memory_space<any>>
      %c0_i32_97 = arith.constant 0 : i32
      %183 = tpu.memref_slice %arg3[%c0_i32_94, %c0_i32_97] : memref<24x400xf32, #tpu.memory_space<vmem>> -> memref<1x400xf32, #tpu.memory_space<vmem>>
      %184 = tpu.memref_squeeze %183 : memref<1x400xf32, #tpu.memory_space<vmem>> -> memref<400xf32, #tpu.memory_space<vmem>>
      %185 = tpu.memref_slice %arg4[%c5_i32_95] : memref<16x!tpu.dma_semaphore, #tpu.memory_space<semaphore_mem>> -> memref<1x!tpu.dma_semaphore, #tpu.memory_space<semaphore_mem>>
      %186 = tpu.memref_squeeze %185 : memref<1x!tpu.dma_semaphore, #tpu.memory_space<semaphore_mem>> -> memref<!tpu.dma_semaphore, #tpu.memory_space<semaphore_mem>>
      tpu.wait_dma2 semaphore(%186 : memref<!tpu.dma_semaphore, #tpu.memory_space<semaphore_mem>>) src(%182 : memref<400xf32, #tpu.memory_space<any>>) dst(%184 : memref<400xf32, #tpu.memory_space<vmem>>)
      %c0_i32_98 = arith.constant 0 : i32
      %c0_i32_99 = arith.constant 0 : i32
      %c6_i32_100 = arith.constant 6 : i32
      %c0_i32_101 = arith.constant 0 : i32
      %187 = tpu.memref_slice %arg2[%c0_i32_98, %c0_i32_101] : memref<40x400xf32, #tpu.memory_space<any>> -> memref<1x400xf32, #tpu.memory_space<any>>
      %188 = tpu.memref_squeeze %187 : memref<1x400xf32, #tpu.memory_space<any>> -> memref<400xf32, #tpu.memory_space<any>>
      %c0_i32_102 = arith.constant 0 : i32
      %189 = tpu.memref_slice %arg3[%c0_i32_99, %c0_i32_102] : memref<24x400xf32, #tpu.memory_space<vmem>> -> memref<1x400xf32, #tpu.memory_space<vmem>>
      %190 = tpu.memref_squeeze %189 : memref<1x400xf32, #tpu.memory_space<vmem>> -> memref<400xf32, #tpu.memory_space<vmem>>
      %191 = tpu.memref_slice %arg4[%c6_i32_100] : memref<16x!tpu.dma_semaphore, #tpu.memory_space<semaphore_mem>> -> memref<1x!tpu.dma_semaphore, #tpu.memory_space<semaphore_mem>>
      %192 = tpu.memref_squeeze %191 : memref<1x!tpu.dma_semaphore, #tpu.memory_space<semaphore_mem>> -> memref<!tpu.dma_semaphore, #tpu.memory_space<semaphore_mem>>
      tpu.wait_dma2 semaphore(%192 : memref<!tpu.dma_semaphore, #tpu.memory_space<semaphore_mem>>) src(%188 : memref<400xf32, #tpu.memory_space<any>>) dst(%190 : memref<400xf32, #tpu.memory_space<vmem>>)
      %c0_i32_103 = arith.constant 0 : i32
      %c0_i32_104 = arith.constant 0 : i32
      %c7_i32_105 = arith.constant 7 : i32
      %c0_i32_106 = arith.constant 0 : i32
      %193 = tpu.memref_slice %arg2[%c0_i32_103, %c0_i32_106] : memref<40x400xf32, #tpu.memory_space<any>> -> memref<1x400xf32, #tpu.memory_space<any>>
      %194 = tpu.memref_squeeze %193 : memref<1x400xf32, #tpu.memory_space<any>> -> memref<400xf32, #tpu.memory_space<any>>
      %c0_i32_107 = arith.constant 0 : i32
      %195 = tpu.memref_slice %arg3[%c0_i32_104, %c0_i32_107] : memref<24x400xf32, #tpu.memory_space<vmem>> -> memref<1x400xf32, #tpu.memory_space<vmem>>
      %196 = tpu.memref_squeeze %195 : memref<1x400xf32, #tpu.memory_space<vmem>> -> memref<400xf32, #tpu.memory_space<vmem>>
      %197 = tpu.memref_slice %arg4[%c7_i32_105] : memref<16x!tpu.dma_semaphore, #tpu.memory_space<semaphore_mem>> -> memref<1x!tpu.dma_semaphore, #tpu.memory_space<semaphore_mem>>
      %198 = tpu.memref_squeeze %197 : memref<1x!tpu.dma_semaphore, #tpu.memory_space<semaphore_mem>> -> memref<!tpu.dma_semaphore, #tpu.memory_space<semaphore_mem>>
      tpu.wait_dma2 semaphore(%198 : memref<!tpu.dma_semaphore, #tpu.memory_space<semaphore_mem>>) src(%194 : memref<400xf32, #tpu.memory_space<any>>) dst(%196 : memref<400xf32, #tpu.memory_space<vmem>>)
      %c0_i32_108 = arith.constant 0 : i32
      %c0_i32_109 = arith.constant 0 : i32
      %c8_i32_110 = arith.constant 8 : i32
      %c0_i32_111 = arith.constant 0 : i32
      %199 = tpu.memref_slice %arg2[%c0_i32_108, %c0_i32_111] : memref<40x400xf32, #tpu.memory_space<any>> -> memref<1x400xf32, #tpu.memory_space<any>>
      %200 = tpu.memref_squeeze %199 : memref<1x400xf32, #tpu.memory_space<any>> -> memref<400xf32, #tpu.memory_space<any>>
      %c0_i32_112 = arith.constant 0 : i32
      %201 = tpu.memref_slice %arg3[%c0_i32_109, %c0_i32_112] : memref<24x400xf32, #tpu.memory_space<vmem>> -> memref<1x400xf32, #tpu.memory_space<vmem>>
      %202 = tpu.memref_squeeze %201 : memref<1x400xf32, #tpu.memory_space<vmem>> -> memref<400xf32, #tpu.memory_space<vmem>>
      %203 = tpu.memref_slice %arg4[%c8_i32_110] : memref<16x!tpu.dma_semaphore, #tpu.memory_space<semaphore_mem>> -> memref<1x!tpu.dma_semaphore, #tpu.memory_space<semaphore_mem>>
      %204 = tpu.memref_squeeze %203 : memref<1x!tpu.dma_semaphore, #tpu.memory_space<semaphore_mem>> -> memref<!tpu.dma_semaphore, #tpu.memory_space<semaphore_mem>>
      tpu.wait_dma2 semaphore(%204 : memref<!tpu.dma_semaphore, #tpu.memory_space<semaphore_mem>>) src(%200 : memref<400xf32, #tpu.memory_space<any>>) dst(%202 : memref<400xf32, #tpu.memory_space<vmem>>)
      %c0_i32_113 = arith.constant 0 : i32
      %c0_i32_114 = arith.constant 0 : i32
      %c9_i32_115 = arith.constant 9 : i32
      %c0_i32_116 = arith.constant 0 : i32
      %205 = tpu.memref_slice %arg2[%c0_i32_113, %c0_i32_116] : memref<40x400xf32, #tpu.memory_space<any>> -> memref<1x400xf32, #tpu.memory_space<any>>
      %206 = tpu.memref_squeeze %205 : memref<1x400xf32, #tpu.memory_space<any>> -> memref<400xf32, #tpu.memory_space<any>>
      %c0_i32_117 = arith.constant 0 : i32
      %207 = tpu.memref_slice %arg3[%c0_i32_114, %c0_i32_117] : memref<24x400xf32, #tpu.memory_space<vmem>> -> memref<1x400xf32, #tpu.memory_space<vmem>>
      %208 = tpu.memref_squeeze %207 : memref<1x400xf32, #tpu.memory_space<vmem>> -> memref<400xf32, #tpu.memory_space<vmem>>
      %209 = tpu.memref_slice %arg4[%c9_i32_115] : memref<16x!tpu.dma_semaphore, #tpu.memory_space<semaphore_mem>> -> memref<1x!tpu.dma_semaphore, #tpu.memory_space<semaphore_mem>>
      %210 = tpu.memref_squeeze %209 : memref<1x!tpu.dma_semaphore, #tpu.memory_space<semaphore_mem>> -> memref<!tpu.dma_semaphore, #tpu.memory_space<semaphore_mem>>
      tpu.wait_dma2 semaphore(%210 : memref<!tpu.dma_semaphore, #tpu.memory_space<semaphore_mem>>) src(%206 : memref<400xf32, #tpu.memory_space<any>>) dst(%208 : memref<400xf32, #tpu.memory_space<vmem>>)
      %c0_i32_118 = arith.constant 0 : i32
      %c0_i32_119 = arith.constant 0 : i32
      %c10_i32_120 = arith.constant 10 : i32
      %c0_i32_121 = arith.constant 0 : i32
      %211 = tpu.memref_slice %arg2[%c0_i32_118, %c0_i32_121] : memref<40x400xf32, #tpu.memory_space<any>> -> memref<1x400xf32, #tpu.memory_space<any>>
      %212 = tpu.memref_squeeze %211 : memref<1x400xf32, #tpu.memory_space<any>> -> memref<400xf32, #tpu.memory_space<any>>
      %c0_i32_122 = arith.constant 0 : i32
      %213 = tpu.memref_slice %arg3[%c0_i32_119, %c0_i32_122] : memref<24x400xf32, #tpu.memory_space<vmem>> -> memref<1x400xf32, #tpu.memory_space<vmem>>
      %214 = tpu.memref_squeeze %213 : memref<1x400xf32, #tpu.memory_space<vmem>> -> memref<400xf32, #tpu.memory_space<vmem>>
      %215 = tpu.memref_slice %arg4[%c10_i32_120] : memref<16x!tpu.dma_semaphore, #tpu.memory_space<semaphore_mem>> -> memref<1x!tpu.dma_semaphore, #tpu.memory_space<semaphore_mem>>
      %216 = tpu.memref_squeeze %215 : memref<1x!tpu.dma_semaphore, #tpu.memory_space<semaphore_mem>> -> memref<!tpu.dma_semaphore, #tpu.memory_space<semaphore_mem>>
      tpu.wait_dma2 semaphore(%216 : memref<!tpu.dma_semaphore, #tpu.memory_space<semaphore_mem>>) src(%212 : memref<400xf32, #tpu.memory_space<any>>) dst(%214 : memref<400xf32, #tpu.memory_space<vmem>>)
      %c0_i32_123 = arith.constant 0 : i32
      %c0_i32_124 = arith.constant 0 : i32
      %c11_i32_125 = arith.constant 11 : i32
      %c0_i32_126 = arith.constant 0 : i32
      %217 = tpu.memref_slice %arg2[%c0_i32_123, %c0_i32_126] : memref<40x400xf32, #tpu.memory_space<any>> -> memref<1x400xf32, #tpu.memory_space<any>>
      %218 = tpu.memref_squeeze %217 : memref<1x400xf32, #tpu.memory_space<any>> -> memref<400xf32, #tpu.memory_space<any>>
      %c0_i32_127 = arith.constant 0 : i32
      %219 = tpu.memref_slice %arg3[%c0_i32_124, %c0_i32_127] : memref<24x400xf32, #tpu.memory_space<vmem>> -> memref<1x400xf32, #tpu.memory_space<vmem>>
      %220 = tpu.memref_squeeze %219 : memref<1x400xf32, #tpu.memory_space<vmem>> -> memref<400xf32, #tpu.memory_space<vmem>>
      %221 = tpu.memref_slice %arg4[%c11_i32_125] : memref<16x!tpu.dma_semaphore, #tpu.memory_space<semaphore_mem>> -> memref<1x!tpu.dma_semaphore, #tpu.memory_space<semaphore_mem>>
      %222 = tpu.memref_squeeze %221 : memref<1x!tpu.dma_semaphore, #tpu.memory_space<semaphore_mem>> -> memref<!tpu.dma_semaphore, #tpu.memory_space<semaphore_mem>>
      tpu.wait_dma2 semaphore(%222 : memref<!tpu.dma_semaphore, #tpu.memory_space<semaphore_mem>>) src(%218 : memref<400xf32, #tpu.memory_space<any>>) dst(%220 : memref<400xf32, #tpu.memory_space<vmem>>)
      %c0_i32_128 = arith.constant 0 : i32
      %c0_i32_129 = arith.constant 0 : i32
      %c12_i32_130 = arith.constant 12 : i32
      %c0_i32_131 = arith.constant 0 : i32
      %223 = tpu.memref_slice %arg2[%c0_i32_128, %c0_i32_131] : memref<40x400xf32, #tpu.memory_space<any>> -> memref<1x400xf32, #tpu.memory_space<any>>
      %224 = tpu.memref_squeeze %223 : memref<1x400xf32, #tpu.memory_space<any>> -> memref<400xf32, #tpu.memory_space<any>>
      %c0_i32_132 = arith.constant 0 : i32
      %225 = tpu.memref_slice %arg3[%c0_i32_129, %c0_i32_132] : memref<24x400xf32, #tpu.memory_space<vmem>> -> memref<1x400xf32, #tpu.memory_space<vmem>>
      %226 = tpu.memref_squeeze %225 : memref<1x400xf32, #tpu.memory_space<vmem>> -> memref<400xf32, #tpu.memory_space<vmem>>
      %227 = tpu.memref_slice %arg4[%c12_i32_130] : memref<16x!tpu.dma_semaphore, #tpu.memory_space<semaphore_mem>> -> memref<1x!tpu.dma_semaphore, #tpu.memory_space<semaphore_mem>>
      %228 = tpu.memref_squeeze %227 : memref<1x!tpu.dma_semaphore, #tpu.memory_space<semaphore_mem>> -> memref<!tpu.dma_semaphore, #tpu.memory_space<semaphore_mem>>
      tpu.wait_dma2 semaphore(%228 : memref<!tpu.dma_semaphore, #tpu.memory_space<semaphore_mem>>) src(%224 : memref<400xf32, #tpu.memory_space<any>>) dst(%226 : memref<400xf32, #tpu.memory_space<vmem>>)
      %c0_i32_133 = arith.constant 0 : i32
      %c0_i32_134 = arith.constant 0 : i32
      %c13_i32_135 = arith.constant 13 : i32
      %c0_i32_136 = arith.constant 0 : i32
      %229 = tpu.memref_slice %arg2[%c0_i32_133, %c0_i32_136] : memref<40x400xf32, #tpu.memory_space<any>> -> memref<1x400xf32, #tpu.memory_space<any>>
      %230 = tpu.memref_squeeze %229 : memref<1x400xf32, #tpu.memory_space<any>> -> memref<400xf32, #tpu.memory_space<any>>
      %c0_i32_137 = arith.constant 0 : i32
      %231 = tpu.memref_slice %arg3[%c0_i32_134, %c0_i32_137] : memref<24x400xf32, #tpu.memory_space<vmem>> -> memref<1x400xf32, #tpu.memory_space<vmem>>
      %232 = tpu.memref_squeeze %231 : memref<1x400xf32, #tpu.memory_space<vmem>> -> memref<400xf32, #tpu.memory_space<vmem>>
      %233 = tpu.memref_slice %arg4[%c13_i32_135] : memref<16x!tpu.dma_semaphore, #tpu.memory_space<semaphore_mem>> -> memref<1x!tpu.dma_semaphore, #tpu.memory_space<semaphore_mem>>
      %234 = tpu.memref_squeeze %233 : memref<1x!tpu.dma_semaphore, #tpu.memory_space<semaphore_mem>> -> memref<!tpu.dma_semaphore, #tpu.memory_space<semaphore_mem>>
      tpu.wait_dma2 semaphore(%234 : memref<!tpu.dma_semaphore, #tpu.memory_space<semaphore_mem>>) src(%230 : memref<400xf32, #tpu.memory_space<any>>) dst(%232 : memref<400xf32, #tpu.memory_space<vmem>>)
      %c0_i32_138 = arith.constant 0 : i32
      %c0_i32_139 = arith.constant 0 : i32
      %c14_i32_140 = arith.constant 14 : i32
      %c0_i32_141 = arith.constant 0 : i32
      %235 = tpu.memref_slice %arg2[%c0_i32_138, %c0_i32_141] : memref<40x400xf32, #tpu.memory_space<any>> -> memref<1x400xf32, #tpu.memory_space<any>>
      %236 = tpu.memref_squeeze %235 : memref<1x400xf32, #tpu.memory_space<any>> -> memref<400xf32, #tpu.memory_space<any>>
      %c0_i32_142 = arith.constant 0 : i32
      %237 = tpu.memref_slice %arg3[%c0_i32_139, %c0_i32_142] : memref<24x400xf32, #tpu.memory_space<vmem>> -> memref<1x400xf32, #tpu.memory_space<vmem>>
      %238 = tpu.memref_squeeze %237 : memref<1x400xf32, #tpu.memory_space<vmem>> -> memref<400xf32, #tpu.memory_space<vmem>>
      %239 = tpu.memref_slice %arg4[%c14_i32_140] : memref<16x!tpu.dma_semaphore, #tpu.memory_space<semaphore_mem>> -> memref<1x!tpu.dma_semaphore, #tpu.memory_space<semaphore_mem>>
      %240 = tpu.memref_squeeze %239 : memref<1x!tpu.dma_semaphore, #tpu.memory_space<semaphore_mem>> -> memref<!tpu.dma_semaphore, #tpu.memory_space<semaphore_mem>>
      tpu.wait_dma2 semaphore(%240 : memref<!tpu.dma_semaphore, #tpu.memory_space<semaphore_mem>>) src(%236 : memref<400xf32, #tpu.memory_space<any>>) dst(%238 : memref<400xf32, #tpu.memory_space<vmem>>)
      %c0_i32_143 = arith.constant 0 : i32
      %c0_i32_144 = arith.constant 0 : i32
      %c15_i32_145 = arith.constant 15 : i32
      %c0_i32_146 = arith.constant 0 : i32
      %241 = tpu.memref_slice %arg2[%c0_i32_143, %c0_i32_146] : memref<40x400xf32, #tpu.memory_space<any>> -> memref<1x400xf32, #tpu.memory_space<any>>
      %242 = tpu.memref_squeeze %241 : memref<1x400xf32, #tpu.memory_space<any>> -> memref<400xf32, #tpu.memory_space<any>>
      %c0_i32_147 = arith.constant 0 : i32
      %243 = tpu.memref_slice %arg3[%c0_i32_144, %c0_i32_147] : memref<24x400xf32, #tpu.memory_space<vmem>> -> memref<1x400xf32, #tpu.memory_space<vmem>>
      %244 = tpu.memref_squeeze %243 : memref<1x400xf32, #tpu.memory_space<vmem>> -> memref<400xf32, #tpu.memory_space<vmem>>
      %245 = tpu.memref_slice %arg4[%c15_i32_145] : memref<16x!tpu.dma_semaphore, #tpu.memory_space<semaphore_mem>> -> memref<1x!tpu.dma_semaphore, #tpu.memory_space<semaphore_mem>>
      %246 = tpu.memref_squeeze %245 : memref<1x!tpu.dma_semaphore, #tpu.memory_space<semaphore_mem>> -> memref<!tpu.dma_semaphore, #tpu.memory_space<semaphore_mem>>
      tpu.wait_dma2 semaphore(%246 : memref<!tpu.dma_semaphore, #tpu.memory_space<semaphore_mem>>) src(%242 : memref<400xf32, #tpu.memory_space<any>>) dst(%244 : memref<400xf32, #tpu.memory_space<vmem>>)
    } else {
    }
    return
  }
  func.func @transform_1(%arg0: i32, %arg1: memref<40xi32, #tpu.memory_space<smem>>) -> (i32, i32) {
    %c0_i32 = arith.constant 0 : i32
    %c0_i32_0 = arith.constant 0 : i32
    return %arg0, %c0_i32 : i32, i32
  }
}

</mosaic_0001>

<bundles_post_ra>
// kernel: tpu_custom_call.1
= control target key start
LH: loop header
LB: loop body
LE: loop exit
PB: predicated region body
PF: predicated region fallthrough
CT: control target
= control target key end

     0   :  { %s2323_s12 = smov [#allocation4]   ;;  %s3109_s0 = inlined_call_operand.hbm [shape: s32[40], index: 0, kind: input, shape index: {}]   ;;  %s3110_s1 = inlined_call_operand.hbm [shape: f32[40,400], index: 1, kind: input, shape index: {}]   ;;  %s3111_s2 = inlined_call_operand.hbm [shape: f32[48,400], index: 2, kind: output, shape index: {}]  }
   0x1   :  { %s8_s11 = sshll.u32 %s3109_s0, 4  ;;  %s9_s11 = int_to_ptr.hbm [resolvable:$true] %s8_s11 }
   0x2   :  { %11 = dma.hbm_to_smem %s9_s11, 16, %s2323_s12, [#allocation3] }
   0x3   :  { %2225 = dma.done.wait [#allocation3], 16 }
   0x4   :  { %2226 = vsyncadd [#allocation3], 4294967280 }
   0x5   :  { %14 = sfence }
   0x6   :  { %15 = vsyncpa [#allocation6], 0 }
   0x7   :  { %17 = vsyncpa [#allocation6 + $0x1], 0  ;;  %s2348_s13 = smov 0   ;;  %s2350_s14 = smov 0  }
   0x8   :  { %s2352_s15 = smov 0  }
   0x9 LB: > { %s1106_s0 = sadd.s32 4294967295, %s2321_s15   ;;  %s2365_s16 = sadd.s32 1, %s2321_s15   ;;  %s2321_s15 = sphi %s2352_s15, %s3133_s15   ;;  %s2317_s14 = sphi %s2350_s14, %s3136_s14   ;;  %s2313_s13 = sphi %s2348_s13, %s3135_s13  }
   0xa   : > { %3121 = sst [smem:[#allocation89_spill]] %s2365_s16  ;;  %s26_s17 = ssub.s32 %s2321_s15, %s2365_s16 }
   0xb   : > { %s29_s18 = sadd.s32 1, %s2317_s14  ;;  %p27_p0 = scmp.eq.s32.totalorder %s26_s17, 0 }
   0xc   : > { %p1107_p1 = scmp.ne.s32.totalorder %s26_s17, 0  ;;  %p33_p2 = scmp.eq.s32.totalorder %s2321_s15, 1 }
   0xd   : > { %p38_p3 = scmp.ne.s32.totalorder %s2317_s14, %s2313_s13  ;;  %p39_p5 = scmp.eq.s32.totalorder %s1106_s0, 1 }
   0xe   : > { %s2374_s19 = scalar_select %p27_p0, %s2317_s14, %s29_s18  }
   0xf   : > { %p2376_p4 = por %p1107_p1, %p33_p2  ;;  %p2380_p6 = por %p39_p5, %p38_p3 }
  0x10   : > { %3122 = sst [smem:[#allocation90_spill]] %s2374_s19  ;;  %p1108_p7 = scmp.ge.s32.totalorder %s2321_s15, 2 }
  0x11   : > { %s3124_s21 = scalar_select %p2380_p6, 1, 0 }
  0x12   : > { %48 = sbr.rel (%p1108_p7) target bundleno = 733 (0x2dd), region = 12  ;;  %s3112_s22 = sand.u32 (!%p1108_p7), 1, %s2317_s14  }
  0x13   : > { %3125 = sst [smem:[#allocation91_spill]] %s3124_s21  ;;  %s2387_s23 = smul.u32 (!%p1108_p7), 24, %s2321_s15 }
  0x14   : > { %s1174_s24 = smul.u32 (!%p1108_p7), 96, %s3112_s22 }
  0x16   : > { %s2391_s25 = scalar_lea.vmem (!%p1108_p7), [#allocation5], %s1174_s24 }
  0x17   : > { %61 = sbr.rel (%p33_p2) target bundleno = 440 (0x1b8), region = 16 }
  0x1c   : > { %s62_s26 = sld [smem:[#allocation4 + %s2387_s23]]  ;;  %s70_s27 = sshll.u32 %s2391_s25, 4  ;;  %s2395_s27 = int_to_ptr.vmem [resolvable:$true] %s70_s27 }
  0x1d   : > { %s76_s28 = sadd.s32 1, %s2387_s23  ;;  %s83_s30 = scalar_lea.vmem %s2391_s25, 1 [#allocation5] }
  0x1e   : > { %s2398_s29 = sld [smem:[#allocation4 + %s76_s28]]  ;;  %s2401_s3 = sshll.u32 %s83_s30, 4 }
  0x1f   : > { %3126 = sst [smem:[#allocation92_spill]] %s2401_s3  ;;  %s93_s4 = sadd.s32 2, %s2387_s23 }
  0x20   : > { %s2405_s5 = sld [smem:[#allocation4 + %s93_s4]]  ;;  %s100_s9 = scalar_lea.vmem %s2391_s25, 2 [#allocation5] }
  0x21   : > { %s2408_s11 = sshll.u32 %s100_s9, 4  ;;  %s105_s11 = int_to_ptr.vmem [resolvable:$true] %s2408_s11 }
  0x22   : > { %s63_s6 = sshrl.u32 %s62_s26, 3  ;;  %s64_s7 = sand.u32 7, %s62_s26  }
  0x23   : > { %s1110_s8 = sshll.u32 %s63_s6, 5  ;;  %s2418_s6 = scalar_lea.hbm %s3110_s1, 160 }
  0x24   : > { %s66_s10 = sadd.s32 %s1110_s8, %s64_s7  ;;  %s78_s18 = sshrl.u32 %s2398_s29, 3 }
  0x25   : > { %s67_s17 = scalar_lea.hbm %s3110_s1, %s66_s10  ;;  %s79_s28 = sand.u32 7, %s2398_s29  }
  0x26   : > { %s68_s24 = sshll.u32 %s67_s17, 4  ;;  %s1111_s30 = sshll.u32 %s78_s18, 5  ;;  %s69_s24 = int_to_ptr.hbm [resolvable:$true] %s68_s24 }
  0x27   : > { %s1225_s22 = sshra.s32 %s69_s24, 4  ;;  %s1226_s22 = int_to_ptr.hbm [resolvable:$true] %s1225_s22 }
  0x28   : > { %s1227_s4 = scalar_lea.hbm %s1226_s22, 4  ;;  %p1230_p9 = scmp.lt.s32.totalorder %s1226_s22, %s3110_s1 }
  0x29   : > { %p1228_p8 = scmp.ne.s32.totalorder %s1226_s22, %s1227_s4  ;;  %p1231_p10 = scmp.lt.s32.totalorder %s2418_s6, %s1227_s4 }
  0x2b   : > { %p1232_p11 = por %p1231_p10, %p1230_p9 }
  0x2d   : > { %p1233_p12 = pnand %p1232_p11, %p1228_p8 }
  0x2f   : > { %1236 = shalt.err (!%p1233_p12)  }
  0x30   : > { %s3116_s29 = smov 128   ;;  %s3118_s9 = smov 1  }
  0x31   : > { %75 = dma.hbm_to_vmem [thread:$0]  %s69_s24, 64, %s2395_s27, [#allocation2], %s3116_s29, %s3116_s29, %s3118_s9 }
  0x32   : > { %s81_s3 = sadd.s32 %s1111_s30, %s79_s28  ;;  %s95_s10 = sshrl.u32 %s2405_s5, 3 }
  0x33   : > { %s82_s22 = scalar_lea.hbm %s3110_s1, %s81_s3  ;;  %s96_s17 = sand.u32 7, %s2405_s5  }
  0x34   : > { %s85_s18 = sshll.u32 %s82_s22, 4  ;;  %s1112_s4 = sshll.u32 %s95_s10, 5  ;;  %s86_s18 = int_to_ptr.hbm [resolvable:$true] %s85_s18 }
  0x35   : > { %s98_s26 = sadd.s32 %s1112_s4, %s96_s17  ;;  %s1249_s7 = sshra.s32 %s86_s18, 4  ;;  %s1250_s7 = int_to_ptr.hbm [resolvable:$true] %s1249_s7 }
  0x36   : > { %s1251_s8 = scalar_lea.hbm %s1250_s7, 4  ;;  %p1254_p0 = scmp.lt.s32.totalorder %s1250_s7, %s3110_s1 }
  0x37   : > { %p1252_p13 = scmp.ne.s32.totalorder %s1250_s7, %s1251_s8  ;;  %p1255_p1 = scmp.lt.s32.totalorder %s2418_s6, %s1251_s8 }
  0x39   : > { %p1256_p2 = por %p1255_p1, %p1254_p0 }
  0x3b   : > { %p1257_p3 = pnand %p1256_p2, %p1252_p13 }
  0x3d   : > { %1260 = shalt.err (!%p1257_p3)  }
  0x3e   : > { %s3127_s27 = sld [smem:[#allocation92_spill]]  ;;  %s99_s30 = scalar_lea.hbm %s3110_s1, %s98_s26 }
  0x3f   : > { %s102_s16 = sshll.u32 %s99_s30, 4  ;;  %s110_s19 = sadd.s32 3, %s2387_s23  ;;  %s103_s16 = int_to_ptr.hbm [resolvable:$true] %s102_s16 }
  0x40   : > { %s111_s3 = sld [smem:[#allocation4 + %s110_s19]]  ;;  %s1273_s10 = sshra.s32 %s103_s16, 4  ;;  %s1274_s10 = int_to_ptr.hbm [resolvable:$true] %s1273_s10 }
  0x41   : > { %s1275_s12 = scalar_lea.hbm %s1274_s10, 4  ;;  %p1278_p7 = scmp.lt.s32.totalorder %s1274_s10, %s3110_s1 }
  0x42   : > { %p1276_p5 = scmp.ne.s32.totalorder %s1274_s10, %s1275_s12  ;;  %p1279_p8 = scmp.lt.s32.totalorder %s2418_s6, %s1275_s12 }
  0x44   : > { %s3128_s5 = int_to_ptr.vmem [resolvable:$true] %s3127_s27  ;;  %p1280_p9 = por %p1279_p8, %p1278_p7 }
  0x45   : > { %92 = dma.hbm_to_vmem [thread:$0]  %s86_s18, 64, %s3128_s5, [#allocation2 + $0x1], %s3116_s29, %s3116_s29, %s3118_s9 }
  0x46   : > { %p1281_p10 = pnand %p1280_p9, %p1276_p5 }
  0x48   : > { %1284 = shalt.err (!%p1281_p10)  }
  0x49   : > { %109 = dma.hbm_to_vmem [thread:$0]  %s103_s16, 64, %s105_s11, [#allocation2 + $0x2], %s3116_s29, %s3116_s29, %s3118_s9 }
  0x4a   : > { %s117_s17 = scalar_lea.vmem %s2391_s25, 3 [#allocation5]  ;;  %s127_s18 = sadd.s32 4, %s2387_s23 }
  0x4b   : > { %s2456_s4 = sshll.u32 %s117_s17, 4  ;;  %s2458_s26 = sld [smem:[#allocation4 + %s127_s18]]  ;;  %s122_s4 = int_to_ptr.vmem [resolvable:$true] %s2456_s4 }
  0x4c   : > { %s134_s7 = scalar_lea.vmem %s2391_s25, 4 [#allocation5]  ;;  %s144_s27 = sadd.s32 5, %s2387_s23 }
  0x4d   : > { %s2462_s8 = sshll.u32 %s134_s7, 4  ;;  %s112_s5 = sshrl.u32 %s111_s3, 3  ;;  %s139_s8 = int_to_ptr.vmem [resolvable:$true] %s2462_s8 }
  0x4e   : > { %s113_s24 = sand.u32 7, %s111_s3   ;;  %s1113_s28 = sshll.u32 %s112_s5, 5 }
  0x4f   : > { %s115_s11 = sadd.s32 %s1113_s28, %s113_s24  ;;  %s2466_s30 = sld [smem:[#allocation4 + %s144_s27]] }
  0x50   : > { %s116_s10 = scalar_lea.hbm %s3110_s1, %s115_s11 }
  0x51   : > { %s129_s12 = sshrl.u32 %s2458_s26, 3  ;;  %s119_s0 = sshll.u32 %s116_s10, 4  ;;  %s120_s0 = int_to_ptr.hbm [resolvable:$true] %s119_s0 }
  0x52   : > { %s130_s22 = sand.u32 7, %s2458_s26   ;;  %s1114_s17 = sshll.u32 %s129_s12, 5 }
  0x53   : > { %s1297_s18 = sshra.s32 %s120_s0, 4  ;;  %s1298_s18 = int_to_ptr.hbm [resolvable:$true] %s1297_s18 }
  0x54   : > { %s1299_s7 = scalar_lea.hbm %s1298_s18, 4  ;;  %p1302_p12 = scmp.lt.s32.totalorder %s1298_s18, %s3110_s1 }
  0x55   : > { %p1300_p11 = scmp.ne.s32.totalorder %s1298_s18, %s1299_s7  ;;  %p1303_p13 = scmp.lt.s32.totalorder %s2418_s6, %s1299_s7 }
  0x57   : > { %p1304_p0 = por %p1303_p13, %p1302_p12 }
  0x59   : > { %p1305_p1 = pnand %p1304_p0, %p1300_p11 }
  0x5b   : > { %1308 = shalt.err (!%p1305_p1)  }
  0x5c   : > { %s3129_s27 = smov 128   ;;  %s132_s26 = sadd.s32 %s1114_s17, %s130_s22 }
  0x5d   : > { %126 = dma.hbm_to_vmem [thread:$0]  %s120_s0, 64, %s122_s4, [#allocation2 + $0x3], %s3129_s27, %s3129_s27, %s3118_s9 }
  0x5e   : > { %s151_s5 = scalar_lea.vmem %s2391_s25, 5 [#allocation5]  ;;  %s133_s11 = scalar_lea.hbm %s3110_s1, %s132_s26 }
  0x5f   : > { %s146_s29 = sshrl.u32 %s2466_s30, 3  ;;  %s136_s16 = sshll.u32 %s133_s11, 4  ;;  %s137_s16 = int_to_ptr.hbm [resolvable:$true] %s136_s16 }
  0x60   : > { %s147_s19 = sand.u32 7, %s2466_s30   ;;  %s1115_s10 = sshll.u32 %s146_s29, 5 }
  0x61   : > { %s1321_s12 = sshra.s32 %s137_s16, 4  ;;  %s1322_s12 = int_to_ptr.hbm [resolvable:$true] %s1321_s12 }
  0x62   : > { %s1323_s18 = scalar_lea.hbm %s1322_s12, 4  ;;  %p1326_p3 = scmp.lt.s32.totalorder %s1322_s12, %s3110_s1 }
  0x63   : > { %p1324_p2 = scmp.ne.s32.totalorder %s1322_s12, %s1323_s18  ;;  %p1327_p5 = scmp.lt.s32.totalorder %s2418_s6, %s1323_s18 }
  0x65   : > { %p1328_p7 = por %p1327_p5, %p1326_p3 }
  0x67   : > { %p1329_p8 = pnand %p1328_p7, %p1324_p2 }
  0x69   : > { %1332 = shalt.err (!%p1329_p8)  }
  0x6a   : > { %143 = dma.hbm_to_vmem [thread:$0]  %s137_s16, 64, %s139_s8, [#allocation2 + $0x4], %s3129_s27, %s3129_s27, %s3118_s9 }
  0x6b   : > { %s149_s4 = sadd.s32 %s1115_s10, %s147_s19  ;;  %s155_s30 = sshll.u32 %s151_s5, 4  ;;  %s156_s30 = int_to_ptr.vmem [resolvable:$true] %s155_s30 }
  0x6c   : > { %s150_s17 = scalar_lea.hbm %s3110_s1, %s149_s4  ;;  %s161_s24 = sadd.s32 6, %s2387_s23 }
  0x6d   : > { %s153_s26 = sshll.u32 %s150_s17, 4  ;;  %s162_s28 = sld [smem:[#allocation4 + %s161_s24]]  ;;  %s154_s26 = int_to_ptr.hbm [resolvable:$true] %s153_s26 }
  0x6e   : > { %s1345_s11 = sshra.s32 %s154_s26, 4  ;;  %s1346_s11 = int_to_ptr.hbm [resolvable:$true] %s1345_s11 }
  0x6f   : > { %s1347_s29 = scalar_lea.hbm %s1346_s11, 4  ;;  %p1350_p10 = scmp.lt.s32.totalorder %s1346_s11, %s3110_s1 }
  0x70   : > { %p1348_p9 = scmp.ne.s32.totalorder %s1346_s11, %s1347_s29  ;;  %p1351_p11 = scmp.lt.s32.totalorder %s2418_s6, %s1347_s29 }
  0x72   : > { %p1352_p12 = por %p1351_p11, %p1350_p10 }
  0x74   : > { %p1353_p13 = pnand %p1352_p12, %p1348_p9 }
  0x76   : > { %1356 = shalt.err (!%p1353_p13)  }
  0x77   : > { %160 = dma.hbm_to_vmem [thread:$0]  %s154_s26, 64, %s156_s30, [#allocation2 + $0x5], %s3129_s27, %s3129_s27, %s3118_s9 }
  0x78   : > { %s168_s8 = scalar_lea.vmem %s2391_s25, 6 [#allocation5]  ;;  %s178_s5 = sadd.s32 7, %s2387_s23 }
  0x79   : > { %s2508_s16 = sshll.u32 %s168_s8, 4  ;;  %s2510_s19 = sld [smem:[#allocation4 + %s178_s5]]  ;;  %s173_s16 = int_to_ptr.vmem [resolvable:$true] %s2508_s16 }
  0x7a   : > { %s185_s10 = scalar_lea.vmem %s2391_s25, 7 [#allocation5]  ;;  %s195_s3 = sadd.s32 8, %s2387_s23 }
  0x7b   : > { %s2514_s7 = sshll.u32 %s185_s10, 4  ;;  %s163_s4 = sshrl.u32 %s162_s28, 3  ;;  %s190_s7 = int_to_ptr.vmem [resolvable:$true] %s2514_s7 }
  0x7c   : > { %s164_s0 = sand.u32 7, %s162_s28   ;;  %s1116_s22 = sshll.u32 %s163_s4, 5 }
  0x7d   : > { %s166_s30 = sadd.s32 %s1116_s22, %s164_s0  ;;  %s2518_s17 = sld [smem:[#allocation4 + %s195_s3]] }
  0x7e   : > { %s167_s11 = scalar_lea.hbm %s3110_s1, %s166_s30 }
  0x7f   : > { %s180_s29 = sshrl.u32 %s2510_s19, 3  ;;  %s170_s12 = sshll.u32 %s167_s11, 4  ;;  %s171_s12 = int_to_ptr.hbm [resolvable:$true] %s170_s12 }
  0x80   : > { %s181_s18 = sand.u32 7, %s2510_s19   ;;  %s1117_s8 = sshll.u32 %s180_s29, 5 }
  0x81   : > { %s1369_s5 = sshra.s32 %s171_s12, 4  ;;  %s1370_s5 = int_to_ptr.hbm [resolvable:$true] %s1369_s5 }
  0x82   : > { %s1371_s10 = scalar_lea.hbm %s1370_s5, 4  ;;  %p1374_p1 = scmp.lt.s32.totalorder %s1370_s5, %s3110_s1 }
  0x83   : > { %p1372_p0 = scmp.ne.s32.totalorder %s1370_s5, %s1371_s10  ;;  %p1375_p2 = scmp.lt.s32.totalorder %s2418_s6, %s1371_s10 }
  0x85   : > { %p1376_p3 = por %p1375_p2, %p1374_p1 }
  0x87   : > { %p1377_p5 = pnand %p1376_p3, %p1372_p0 }
  0x89   : > { %1380 = shalt.err (!%p1377_p5)  }
  0x8a   : > { %s3130_s3 = smov 1   ;;  %s183_s19 = sadd.s32 %s1117_s8, %s181_s18 }
  0x8b   : > { %177 = dma.hbm_to_vmem [thread:$0]  %s171_s12, 64, %s173_s16, [#allocation2 + $0x6], %s3129_s27, %s3129_s27, %s3130_s3 }
  0x8c   : > { %s202_s4 = scalar_lea.vmem %s2391_s25, 32 [#allocation5]  ;;  %s184_s30 = scalar_lea.hbm %s3110_s1, %s183_s19 }
  0x8d   : > { %s197_s9 = sshrl.u32 %s2518_s17, 3  ;;  %s187_s26 = sshll.u32 %s184_s30, 4  ;;  %s188_s26 = int_to_ptr.hbm [resolvable:$true] %s187_s26 }
  0x8e   : > { %s198_s24 = sand.u32 7, %s2518_s17   ;;  %s1118_s11 = sshll.u32 %s197_s9, 5 }
  0x8f   : > { %s1393_s29 = sshra.s32 %s188_s26, 4  ;;  %s1394_s29 = int_to_ptr.hbm [resolvable:$true] %s1393_s29 }
  0x90   : > { %s1395_s5 = scalar_lea.hbm %s1394_s29, 4  ;;  %p1398_p8 = scmp.lt.s32.totalorder %s1394_s29, %s3110_s1 }
  0x91   : > { %p1396_p7 = scmp.ne.s32.totalorder %s1394_s29, %s1395_s5  ;;  %p1399_p9 = scmp.lt.s32.totalorder %s2418_s6, %s1395_s5 }
  0x93   : > { %p1400_p10 = por %p1399_p9, %p1398_p8 }
  0x95   : > { %p1401_p11 = pnand %p1400_p10, %p1396_p7 }
  0x97   : > { %1404 = shalt.err (!%p1401_p11)  }
  0x98   : > { %194 = dma.hbm_to_vmem [thread:$0]  %s188_s26, 64, %s190_s7, [#allocation2 + $0x7], %s3129_s27, %s3129_s27, %s3130_s3 }
  0x99   : > { %s200_s16 = sadd.s32 %s1118_s11, %s198_s24  ;;  %s206_s17 = sshll.u32 %s202_s4, 4  ;;  %s207_s17 = int_to_ptr.vmem [resolvable:$true] %s206_s17 }
  0x9a   : > { %s201_s8 = scalar_lea.hbm %s3110_s1, %s200_s16  ;;  %s212_s0 = sadd.s32 9, %s2387_s23 }
  0x9b   : > { %s204_s19 = sshll.u32 %s201_s8, 4  ;;  %s213_s22 = sld [smem:[#allocation4 + %s212_s0]]  ;;  %s205_s19 = int_to_ptr.hbm [resolvable:$true] %s204_s19 }
  0x9c   : > { %s1417_s30 = sshra.s32 %s205_s19, 4  ;;  %s1418_s30 = int_to_ptr.hbm [resolvable:$true] %s1417_s30 }
  0x9d   : > { %s1419_s9 = scalar_lea.hbm %s1418_s30, 4  ;;  %p1422_p13 = scmp.lt.s32.totalorder %s1418_s30, %s3110_s1 }
  0x9e   : > { %p1420_p12 = scmp.ne.s32.totalorder %s1418_s30, %s1419_s9  ;;  %p1423_p0 = scmp.lt.s32.totalorder %s2418_s6, %s1419_s9 }
  0xa0   : > { %p1424_p1 = por %p1423_p0, %p1422_p13 }
  0xa2   : > { %p1425_p2 = pnand %p1424_p1, %p1420_p12 }
  0xa4   : > { %1428 = shalt.err (!%p1425_p2)  }
  0xa5   : > { %211 = dma.hbm_to_vmem [thread:$0]  %s205_s19, 64, %s207_s17, [#allocation2 + $0x8], %s3129_s27, %s3129_s27, %s3130_s3 }
  0xa6   : > { %s219_s7 = scalar_lea.vmem %s2391_s25, 33 [#allocation5]  ;;  %s229_s4 = sadd.s32 10, %s2387_s23 }
  0xa7   : > { %s2560_s26 = sshll.u32 %s219_s7, 4  ;;  %s2562_s24 = sld [smem:[#allocation4 + %s229_s4]]  ;;  %s224_s26 = int_to_ptr.vmem [resolvable:$true] %s2560_s26 }
  0xa8   : > { %s236_s11 = scalar_lea.vmem %s2391_s25, 34 [#allocation5]  ;;  %s246_s28 = sadd.s32 11, %s2387_s23 }
  0xa9   : > { %s2566_s10 = sshll.u32 %s236_s11, 4  ;;  %s214_s16 = sshrl.u32 %s213_s22, 3  ;;  %s241_s10 = int_to_ptr.vmem [resolvable:$true] %s2566_s10 }
  0xaa   : > { %s215_s12 = sand.u32 7, %s213_s22   ;;  %s1119_s18 = sshll.u32 %s214_s16, 5 }
  0xab   : > { %s217_s17 = sadd.s32 %s1119_s18, %s215_s12  ;;  %s2570_s8 = sld [smem:[#allocation4 + %s246_s28]] }
  0xac   : > { %s218_s30 = scalar_lea.hbm %s3110_s1, %s217_s17 }
  0xad   : > { %s231_s9 = sshrl.u32 %s2562_s24, 3  ;;  %s221_s29 = sshll.u32 %s218_s30, 4  ;;  %s222_s29 = int_to_ptr.hbm [resolvable:$true] %s221_s29 }
  0xae   : > { %s232_s5 = sand.u32 7, %s2562_s24   ;;  %s1120_s7 = sshll.u32 %s231_s9, 5 }
  0xaf   : > { %s1441_s4 = sshra.s32 %s222_s29, 4  ;;  %s1442_s4 = int_to_ptr.hbm [resolvable:$true] %s1441_s4 }
  0xb0   : > { %s1443_s11 = scalar_lea.hbm %s1442_s4, 4  ;;  %p1446_p5 = scmp.lt.s32.totalorder %s1442_s4, %s3110_s1 }
  0xb1   : > { %p1444_p3 = scmp.ne.s32.totalorder %s1442_s4, %s1443_s11  ;;  %p1447_p7 = scmp.lt.s32.totalorder %s2418_s6, %s1443_s11 }
  0xb3   : > { %p1448_p8 = por %p1447_p7, %p1446_p5 }
  0xb5   : > { %p1449_p9 = pnand %p1448_p8, %p1444_p3 }
  0xb7   : > { %1452 = shalt.err (!%p1449_p9)  }
  0xb8   : > { %228 = dma.hbm_to_vmem [thread:$0]  %s222_s29, 64, %s224_s26, [#allocation2 + $0x9], %s3129_s27, %s3129_s27, %s3130_s3 }
  0xb9   : > { %s234_s24 = sadd.s32 %s1120_s7, %s232_s5  ;;  %s253_s28 = scalar_lea.vmem %s2391_s25, 35 [#allocation5] }
  0xba   : > { %s235_s18 = scalar_lea.hbm %s3110_s1, %s234_s24  ;;  %s248_s21 = sshrl.u32 %s2570_s8, 3 }
  0xbb   : > { %s238_s17 = sshll.u32 %s235_s18, 4  ;;  %s249_s19 = sand.u32 7, %s2570_s8   ;;  %s239_s17 = int_to_ptr.hbm [resolvable:$true] %s238_s17 }
  0xbc   : > { %s1121_s0 = sshll.u32 %s248_s21, 5  ;;  %s1465_s30 = sshra.s32 %s239_s17, 4  ;;  %s1466_s30 = int_to_ptr.hbm [resolvable:$true] %s1465_s30 }
  0xbd   : > { %s1467_s9 = scalar_lea.hbm %s1466_s30, 4  ;;  %p1470_p11 = scmp.lt.s32.totalorder %s1466_s30, %s3110_s1 }
  0xbe   : > { %p1468_p10 = scmp.ne.s32.totalorder %s1466_s30, %s1467_s9  ;;  %p1471_p12 = scmp.lt.s32.totalorder %s2418_s6, %s1467_s9 }
  0xc0   : > { %p1472_p13 = por %p1471_p12, %p1470_p11 }
  0xc2   : > { %p1473_p0 = pnand %p1472_p13, %p1468_p10 }
  0xc4   : > { %1476 = shalt.err (!%p1473_p0)  }
  0xc5   : > { %245 = dma.hbm_to_vmem [thread:$0]  %s239_s17, 64, %s241_s10, [#allocation2 + $0xa], %s3129_s27, %s3129_s27, %s3130_s3 }
  0xc6   : > { %s251_s26 = sadd.s32 %s1121_s0, %s249_s19  ;;  %s257_s8 = sshll.u32 %s253_s28, 4  ;;  %s258_s8 = int_to_ptr.vmem [resolvable:$true] %s257_s8 }
  0xc7   : > { %s252_s7 = scalar_lea.hbm %s3110_s1, %s251_s26  ;;  %s263_s24 = sadd.s32 12, %s2387_s23 }
  0xc8   : > { %s255_s22 = sshll.u32 %s252_s7, 4  ;;  %s264_s16 = sld [smem:[#allocation4 + %s263_s24]]  ;;  %s256_s22 = int_to_ptr.hbm [resolvable:$true] %s255_s22 }
  0xc9   : > { %s1489_s12 = sshra.s32 %s256_s22, 4  ;;  %s1490_s12 = int_to_ptr.hbm [resolvable:$true] %s1489_s12 }
  0xca   : > { %s1491_s18 = scalar_lea.hbm %s1490_s12, 4  ;;  %p1494_p2 = scmp.lt.s32.totalorder %s1490_s12, %s3110_s1 }
  0xcb   : > { %p1492_p1 = scmp.ne.s32.totalorder %s1490_s12, %s1491_s18  ;;  %p1495_p3 = scmp.lt.s32.totalorder %s2418_s6, %s1491_s18 }
  0xcd   : > { %p1496_p5 = por %p1495_p3, %p1494_p2 }
  0xcf   : > { %p1497_p7 = pnand %p1496_p5, %p1492_p1 }
  0xd1   : > { %1500 = shalt.err (!%p1497_p7)  }
  0xd2   : > { %262 = dma.hbm_to_vmem [thread:$0]  %s256_s22, 64, %s258_s8, [#allocation2 + $0xb], %s3129_s27, %s3129_s27, %s3130_s3 }
  0xd3   : > { %s270_s10 = scalar_lea.vmem %s2391_s25, 36 [#allocation5]  ;;  %s280_s28 = sadd.s32 13, %s2387_s23 }
  0xd4   : > { %s2612_s17 = sshll.u32 %s270_s10, 4  ;;  %s2614_s19 = sld [smem:[#allocation4 + %s280_s28]]  ;;  %s275_s17 = int_to_ptr.vmem [resolvable:$true] %s2612_s17 }
  0xd5   : > { %s287_s0 = scalar_lea.vmem %s2391_s25, 37 [#allocation5]  ;;  %s297_s4 = sadd.s32 14, %s2387_s23 }
  0xd6   : > { %s2618_s9 = sshll.u32 %s287_s0, 4  ;;  %s265_s11 = sshrl.u32 %s264_s16, 3  ;;  %s292_s9 = int_to_ptr.vmem [resolvable:$true] %s2618_s9 }
  0xd7   : > { %s266_s26 = sand.u32 7, %s264_s16   ;;  %s1122_s29 = sshll.u32 %s265_s11, 5 }
  0xd8   : > { %s268_s8 = sadd.s32 %s1122_s29, %s266_s26  ;;  %s2622_s5 = sld [smem:[#allocation4 + %s297_s4]] }
  0xd9   : > { %s269_s24 = scalar_lea.hbm %s3110_s1, %s268_s8 }
  0xda   : > { %s282_s12 = sshrl.u32 %s2614_s19, 3  ;;  %s272_s18 = sshll.u32 %s269_s24, 4  ;;  %s273_s18 = int_to_ptr.hbm [resolvable:$true] %s272_s18 }
  0xdb   : > { %s283_s21 = sand.u32 7, %s2614_s19   ;;  %s1123_s30 = sshll.u32 %s282_s12, 5 }
  0xdc   : > { %s1513_s10 = sshra.s32 %s273_s18, 4  ;;  %s1514_s10 = int_to_ptr.hbm [resolvable:$true] %s1513_s10 }
  0xdd   : > { %s1515_s28 = scalar_lea.hbm %s1514_s10, 4  ;;  %p1518_p9 = scmp.lt.s32.totalorder %s1514_s10, %s3110_s1 }
  0xde   : > { %p1516_p8 = scmp.ne.s32.totalorder %s1514_s10, %s1515_s28  ;;  %p1519_p10 = scmp.lt.s32.totalorder %s2418_s6, %s1515_s28 }
  0xe0   : > { %p1520_p11 = por %p1519_p10, %p1518_p9 }
  0xe2   : > { %p1521_p12 = pnand %p1520_p11, %p1516_p8 }
  0xe4   : > { %1524 = shalt.err (!%p1521_p12)  }
  0xe5   : > { %279 = dma.hbm_to_vmem [thread:$0]  %s273_s18, 64, %s275_s17, [#allocation2 + $0xc], %s3129_s27, %s3129_s27, %s3130_s3 }
  0xe6   : > { %s285_s19 = sadd.s32 %s1123_s30, %s283_s21  ;;  %s304_s4 = scalar_lea.vmem %s2391_s25, 38 [#allocation5] }
  0xe7   : > { %s286_s29 = scalar_lea.hbm %s3110_s1, %s285_s19  ;;  %s299_s8 = sshrl.u32 %s2622_s5, 3 }
  0xe8   : > { %s289_s7 = sshll.u32 %s286_s29, 4  ;;  %s300_s22 = sand.u32 7, %s2622_s5   ;;  %s290_s7 = int_to_ptr.hbm [resolvable:$true] %s289_s7 }
  0xe9   : > { %s1124_s24 = sshll.u32 %s299_s8, 5  ;;  %s1537_s12 = sshra.s32 %s290_s7, 4  ;;  %s1538_s12 = int_to_ptr.hbm [resolvable:$true] %s1537_s12 }
  0xea   : > { %s1539_s10 = scalar_lea.hbm %s1538_s12, 4  ;;  %p1542_p0 = scmp.lt.s32.totalorder %s1538_s12, %s3110_s1 }
  0xeb   : > { %p1540_p13 = scmp.ne.s32.totalorder %s1538_s12, %s1539_s10  ;;  %p1543_p1 = scmp.lt.s32.totalorder %s2418_s6, %s1539_s10 }
  0xed   : > { %p1544_p2 = por %p1543_p1, %p1542_p0 }
  0xef   : > { %p1545_p3 = pnand %p1544_p2, %p1540_p13 }
  0xf1   : > { %1548 = shalt.err (!%p1545_p3)  }
  0xf2   : > { %296 = dma.hbm_to_vmem [thread:$0]  %s290_s7, 64, %s292_s9, [#allocation2 + $0xd], %s3129_s27, %s3129_s27, %s3130_s3 }
  0xf3   : > { %s302_s17 = sadd.s32 %s1124_s24, %s300_s22  ;;  %s308_s5 = sshll.u32 %s304_s4, 4  ;;  %s309_s5 = int_to_ptr.vmem [resolvable:$true] %s308_s5 }
  0xf4   : > { %s303_s30 = scalar_lea.hbm %s3110_s1, %s302_s17  ;;  %s314_s19 = sadd.s32 15, %s2387_s23 }
  0xf5   : > { %s306_s0 = sshll.u32 %s303_s30, 4  ;;  %s315_s11 = sld [smem:[#allocation4 + %s314_s19]]  ;;  %s307_s0 = int_to_ptr.hbm [resolvable:$true] %s306_s0 }
  0xf6   : > { %s1561_s26 = sshra.s32 %s307_s0, 4  ;;  %s1562_s26 = int_to_ptr.hbm [resolvable:$true] %s1561_s26 }
  0xf7   : > { %s1563_s29 = scalar_lea.hbm %s1562_s26, 4  ;;  %p1566_p7 = scmp.lt.s32.totalorder %s1562_s26, %s3110_s1 }
  0xf8   : > { %p1564_p5 = scmp.ne.s32.totalorder %s1562_s26, %s1563_s29  ;;  %p1567_p8 = scmp.lt.s32.totalorder %s2418_s6, %s1563_s29 }
  0xfa   : > { %p1568_p9 = por %p1567_p8, %p1566_p7 }
  0xfc   : > { %p1569_p10 = pnand %p1568_p9, %p1564_p5 }
  0xfe   : > { %1572 = shalt.err (!%p1569_p10)  }
  0xff   : > { %313 = dma.hbm_to_vmem [thread:$0]  %s307_s0, 64, %s309_s5, [#allocation2 + $0xe], %s3129_s27, %s3129_s27, %s3130_s3 }
 0x100   : > { %s321_s9 = scalar_lea.vmem %s2391_s25, 39 [#allocation5]  ;;  %s331_s4 = sadd.s32 16, %s2387_s23 }
 0x101   : > { %s2664_s7 = sld [smem:[#allocation4 + %s331_s4]]  ;;  %s325_s22 = sshll.u32 %s321_s9, 4  ;;  %s326_s22 = int_to_ptr.vmem [resolvable:$true] %s325_s22 }
 0x102   : > { %s316_s24 = sshrl.u32 %s315_s11, 3  ;;  %s317_s10 = sand.u32 7, %s315_s11  }
 0x103   : > { %s1125_s28 = sshll.u32 %s316_s24, 5 }
 0x104   : > { %s319_s16 = sadd.s32 %s1125_s28, %s317_s10 }
 0x105   : > { %s320_s21 = scalar_lea.hbm %s3110_s1, %s319_s16 }
 0x106   : > { %s323_s30 = sshll.u32 %s320_s21, 4  ;;  %s324_s30 = int_to_ptr.hbm [resolvable:$true] %s323_s30 }
 0x107   : > { %s1585_s19 = sshra.s32 %s324_s30, 4  ;;  %s1586_s19 = int_to_ptr.hbm [resolvable:$true] %s1585_s19 }
 0x108   : > { %s1587_s5 = scalar_lea.hbm %s1586_s19, 4  ;;  %p1590_p12 = scmp.lt.s32.totalorder %s1586_s19, %s3110_s1 }
 0x109   : > { %p1588_p11 = scmp.ne.s32.totalorder %s1586_s19, %s1587_s5  ;;  %p1591_p13 = scmp.lt.s32.totalorder %s2418_s6, %s1587_s5 }
 0x10b   : > { %p1592_p0 = por %p1591_p13, %p1590_p12 }
 0x10d   : > { %p1593_p1 = pnand %p1592_p0, %p1588_p11 }
 0x10f   : > { %1596 = shalt.err (!%p1593_p1)  }
 0x110   : > { %330 = dma.hbm_to_vmem [thread:$0]  %s324_s30, 64, %s326_s22, [#allocation2 + $0xf], %s3129_s27, %s3129_s27, %s3130_s3 }
 0x111   : > { %2227 = dma.done.wait [#allocation2], 64 }
 0x112   : > { %2228 = vsyncadd [#allocation2], 4294967232  ;;  %s349_s11 = sadd.s32 17, %s2387_s23  ;;  %s335_s29 = sshrl.u32 %s2664_s7, 3 }
 0x113   : > { %s2678_s8 = sld [smem:[#allocation4 + %s349_s11]]  ;;  %s336_s12 = sand.u32 7, %s2664_s7  }
 0x114   : > { %s1126_s9 = sshll.u32 %s335_s29, 5  ;;  %s340_s4 = scalar_lea.vmem %s2391_s25, 64 [#allocation5] }
 0x115   : > { %s338_s24 = sadd.s32 %s1126_s9, %s336_s12  ;;  %s343_s10 = sshll.u32 %s340_s4, 4  ;;  %s344_s10 = int_to_ptr.vmem [resolvable:$true] %s343_s10 }
 0x116   : > { %s339_s22 = scalar_lea.hbm %s3110_s1, %s338_s24 }
 0x117   : > { %s341_s17 = sshll.u32 %s339_s22, 4  ;;  %s342_s17 = int_to_ptr.hbm [resolvable:$true] %s341_s17 }
 0x118   : > { %s1609_s18 = sshra.s32 %s342_s17, 4  ;;  %s1610_s18 = int_to_ptr.hbm [resolvable:$true] %s1609_s18 }
 0x119   : > { %s1611_s21 = scalar_lea.hbm %s1610_s18, 4  ;;  %p1614_p3 = scmp.lt.s32.totalorder %s1610_s18, %s3110_s1 }
 0x11a   : > { %p1612_p2 = scmp.ne.s32.totalorder %s1610_s18, %s1611_s21  ;;  %p1615_p5 = scmp.lt.s32.totalorder %s2418_s6, %s1611_s21 }
 0x11c   : > { %p1616_p7 = por %p1615_p5, %p1614_p3 }
 0x11e   : > { %p1617_p8 = pnand %p1616_p7, %p1612_p2 }
 0x120   : > { %1620 = shalt.err (!%p1617_p8)  }
 0x121   : > { %348 = dma.hbm_to_vmem [thread:$0]  %s342_s17, 64, %s344_s10, [#allocation2], %s3129_s27, %s3129_s27, %s3130_s3 }
 0x122   : > { %2229 = dma.done.wait [#allocation2 + $0x1], 64 }
 0x123   : > { %2230 = vsyncadd [#allocation2 + $0x1], 4294967232  ;;  %s367_s7 = sadd.s32 18, %s2387_s23  ;;  %s353_s5 = sshrl.u32 %s2678_s8, 3 }
 0x124   : > { %s2694_s0 = sld [smem:[#allocation4 + %s367_s7]]  ;;  %s354_s26 = sand.u32 7, %s2678_s8  }
 0x125   : > { %s1127_s11 = sshll.u32 %s353_s5, 5  ;;  %s358_s29 = scalar_lea.vmem %s2391_s25, 65 [#allocation5] }
 0x126   : > { %s356_s12 = sadd.s32 %s1127_s11, %s354_s26  ;;  %s361_s9 = sshll.u32 %s358_s29, 4  ;;  %s362_s9 = int_to_ptr.vmem [resolvable:$true] %s361_s9 }
 0x127   : > { %s357_s10 = scalar_lea.hbm %s3110_s1, %s356_s12 }
 0x128   : > { %s359_s28 = sshll.u32 %s357_s10, 4  ;;  %s360_s28 = int_to_ptr.hbm [resolvable:$true] %s359_s28 }
 0x129   : > { %s1633_s16 = sshra.s32 %s360_s28, 4  ;;  %s1634_s16 = int_to_ptr.hbm [resolvable:$true] %s1633_s16 }
 0x12a   : > { %s1635_s22 = scalar_lea.hbm %s1634_s16, 4  ;;  %p1638_p10 = scmp.lt.s32.totalorder %s1634_s16, %s3110_s1 }
 0x12b   : > { %p1636_p9 = scmp.ne.s32.totalorder %s1634_s16, %s1635_s22  ;;  %p1639_p11 = scmp.lt.s32.totalorder %s2418_s6, %s1635_s22 }
 0x12d   : > { %p1640_p12 = por %p1639_p11, %p1638_p10 }
 0x12f   : > { %p1641_p13 = pnand %p1640_p12, %p1636_p9 }
 0x131   : > { %1644 = shalt.err (!%p1641_p13)  }
 0x132   : > { %366 = dma.hbm_to_vmem [thread:$0]  %s360_s28, 64, %s362_s9, [#allocation2 + $0x1], %s3129_s27, %s3129_s27, %s3130_s3 }
 0x133   : > { %2231 = dma.done.wait [#allocation2 + $0x2], 64 }
 0x134   : > { %2232 = vsyncadd [#allocation2 + $0x2], 4294967232  ;;  %s385_s8 = sadd.s32 19, %s2387_s23  ;;  %s371_s21 = sshrl.u32 %s2694_s0, 3 }
 0x135   : > { %s2710_s30 = sld [smem:[#allocation4 + %s385_s8]]  ;;  %s372_s19 = sand.u32 7, %s2694_s0  }
 0x136   : > { %s1128_s7 = sshll.u32 %s371_s21, 5  ;;  %s376_s5 = scalar_lea.vmem %s2391_s25, 66 [#allocation5] }
 0x137   : > { %s374_s26 = sadd.s32 %s1128_s7, %s372_s19  ;;  %s379_s11 = sshll.u32 %s376_s5, 4  ;;  %s380_s11 = int_to_ptr.vmem [resolvable:$true] %s379_s11 }
 0x138   : > { %s375_s9 = scalar_lea.hbm %s3110_s1, %s374_s26 }
 0x139   : > { %s377_s4 = sshll.u32 %s375_s9, 4  ;;  %s378_s4 = int_to_ptr.hbm [resolvable:$true] %s377_s4 }
 0x13a   : > { %s1657_s24 = sshra.s32 %s378_s4, 4  ;;  %s1658_s24 = int_to_ptr.hbm [resolvable:$true] %s1657_s24 }
 0x13b   : > { %s1659_s10 = scalar_lea.hbm %s1658_s24, 4  ;;  %p1662_p1 = scmp.lt.s32.totalorder %s1658_s24, %s3110_s1 }
 0x13c   : > { %p1660_p0 = scmp.ne.s32.totalorder %s1658_s24, %s1659_s10  ;;  %p1663_p2 = scmp.lt.s32.totalorder %s2418_s6, %s1659_s10 }
 0x13e   : > { %p1664_p3 = por %p1663_p2, %p1662_p1 }
 0x140   : > { %p1665_p5 = pnand %p1664_p3, %p1660_p0 }
 0x142   : > { %1668 = shalt.err (!%p1665_p5)  }
 0x143   : > { %384 = dma.hbm_to_vmem [thread:$0]  %s378_s4, 64, %s380_s11, [#allocation2 + $0x2], %s3129_s27, %s3129_s27, %s3130_s3 }
 0x144   : > { %2233 = dma.done.wait [#allocation2 + $0x3], 64 }
 0x145   : > { %2234 = vsyncadd [#allocation2 + $0x3], 4294967232  ;;  %s403_s0 = sadd.s32 20, %s2387_s23  ;;  %s389_s22 = sshrl.u32 %s2710_s30, 3 }
 0x146   : > { %s2726_s17 = sld [smem:[#allocation4 + %s403_s0]]  ;;  %s390_s18 = sand.u32 7, %s2710_s30  }
 0x147   : > { %s1129_s8 = sshll.u32 %s389_s22, 5  ;;  %s394_s21 = scalar_lea.vmem %s2391_s25, 67 [#allocation5] }
 0x148   : > { %s392_s19 = sadd.s32 %s1129_s8, %s390_s18  ;;  %s397_s7 = sshll.u32 %s394_s21, 4  ;;  %s398_s7 = int_to_ptr.vmem [resolvable:$true] %s397_s7 }
 0x149   : > { %s393_s11 = scalar_lea.hbm %s3110_s1, %s392_s19 }
 0x14a   : > { %s395_s29 = sshll.u32 %s393_s11, 4  ;;  %s396_s29 = int_to_ptr.hbm [resolvable:$true] %s395_s29 }
 0x14b   : > { %s1681_s12 = sshra.s32 %s396_s29, 4  ;;  %s1682_s12 = int_to_ptr.hbm [resolvable:$true] %s1681_s12 }
 0x14c   : > { %s1683_s9 = scalar_lea.hbm %s1682_s12, 4  ;;  %p1686_p8 = scmp.lt.s32.totalorder %s1682_s12, %s3110_s1 }
 0x14d   : > { %p1684_p7 = scmp.ne.s32.totalorder %s1682_s12, %s1683_s9  ;;  %p1687_p9 = scmp.lt.s32.totalorder %s2418_s6, %s1683_s9 }
 0x14f   : > { %p1688_p10 = por %p1687_p9, %p1686_p8 }
 0x151   : > { %p1689_p11 = pnand %p1688_p10, %p1684_p7 }
 0x153   : > { %1692 = shalt.err (!%p1689_p11)  }
 0x154   : > { %402 = dma.hbm_to_vmem [thread:$0]  %s396_s29, 64, %s398_s7, [#allocation2 + $0x3], %s3129_s27, %s3129_s27, %s3130_s3 }
 0x155   : > { %2235 = dma.done.wait [#allocation2 + $0x4], 64 }
 0x156   : > { %2236 = vsyncadd [#allocation2 + $0x4], 4294967232  ;;  %s421_s30 = sadd.s32 21, %s2387_s23  ;;  %s407_s10 = sshrl.u32 %s2726_s17, 3 }
 0x157   : > { %s2742_s28 = sld [smem:[#allocation4 + %s421_s30]]  ;;  %s408_s16 = sand.u32 7, %s2726_s17  }
 0x158   : > { %s1130_s0 = sshll.u32 %s407_s10, 5  ;;  %s412_s22 = scalar_lea.vmem %s2391_s25, 68 [#allocation5] }
 0x159   : > { %s410_s18 = sadd.s32 %s1130_s0, %s408_s16  ;;  %s415_s8 = sshll.u32 %s412_s22, 4  ;;  %s416_s8 = int_to_ptr.vmem [resolvable:$true] %s415_s8 }
 0x15a   : > { %s411_s7 = scalar_lea.hbm %s3110_s1, %s410_s18 }
 0x15b   : > { %s413_s5 = sshll.u32 %s411_s7, 4  ;;  %s414_s5 = int_to_ptr.hbm [resolvable:$true] %s413_s5 }
 0x15c   : > { %s1705_s26 = sshra.s32 %s414_s5, 4  ;;  %s1706_s26 = int_to_ptr.hbm [resolvable:$true] %s1705_s26 }
 0x15d   : > { %s1707_s11 = scalar_lea.hbm %s1706_s26, 4  ;;  %p1710_p13 = scmp.lt.s32.totalorder %s1706_s26, %s3110_s1 }
 0x15e   : > { %p1708_p12 = scmp.ne.s32.totalorder %s1706_s26, %s1707_s11  ;;  %p1711_p0 = scmp.lt.s32.totalorder %s2418_s6, %s1707_s11 }
 0x160   : > { %p1712_p1 = por %p1711_p0, %p1710_p13 }
 0x162   : > { %p1713_p2 = pnand %p1712_p1, %p1708_p12 }
 0x164   : > { %1716 = shalt.err (!%p1713_p2)  }
 0x165   : > { %420 = dma.hbm_to_vmem [thread:$0]  %s414_s5, 64, %s416_s8, [#allocation2 + $0x4], %s3129_s27, %s3129_s27, %s3130_s3 }
 0x166   : > { %2237 = dma.done.wait [#allocation2 + $0x5], 64 }
 0x167   : > { %2238 = vsyncadd [#allocation2 + $0x5], 4294967232  ;;  %s439_s17 = sadd.s32 22, %s2387_s23  ;;  %s425_s9 = sshrl.u32 %s2742_s28, 3 }
 0x168   : > { %s2758_s4 = sld [smem:[#allocation4 + %s439_s17]]  ;;  %s426_s24 = sand.u32 7, %s2742_s28  }
 0x169   : > { %s1131_s30 = sshll.u32 %s425_s9, 5  ;;  %s430_s10 = scalar_lea.vmem %s2391_s25, 69 [#allocation5] }
 0x16a   : > { %s428_s16 = sadd.s32 %s1131_s30, %s426_s24  ;;  %s433_s0 = sshll.u32 %s430_s10, 4  ;;  %s434_s0 = int_to_ptr.vmem [resolvable:$true] %s433_s0 }
 0x16b   : > { %s429_s8 = scalar_lea.hbm %s3110_s1, %s428_s16 }
 0x16c   : > { %s431_s21 = sshll.u32 %s429_s8, 4  ;;  %s432_s21 = int_to_ptr.hbm [resolvable:$true] %s431_s21 }
 0x16d   : > { %s1729_s19 = sshra.s32 %s432_s21, 4  ;;  %s1730_s19 = int_to_ptr.hbm [resolvable:$true] %s1729_s19 }
 0x16e   : > { %s1731_s7 = scalar_lea.hbm %s1730_s19, 4  ;;  %p1734_p5 = scmp.lt.s32.totalorder %s1730_s19, %s3110_s1 }
 0x16f   : > { %p1732_p3 = scmp.ne.s32.totalorder %s1730_s19, %s1731_s7  ;;  %p1735_p7 = scmp.lt.s32.totalorder %s2418_s6, %s1731_s7 }
 0x171   : > { %p1736_p8 = por %p1735_p7, %p1734_p5 }
 0x173   : > { %p1737_p9 = pnand %p1736_p8, %p1732_p3 }
 0x175   : > { %1740 = shalt.err (!%p1737_p9)  }
 0x176   : > { %438 = dma.hbm_to_vmem [thread:$0]  %s432_s21, 64, %s434_s0, [#allocation2 + $0x5], %s3129_s27, %s3129_s27, %s3130_s3 }
 0x177   : > { %2239 = dma.done.wait [#allocation2 + $0x6], 64 }
 0x178   : > { %2240 = vsyncadd [#allocation2 + $0x6], 4294967232  ;;  %s457_s28 = sadd.s32 23, %s2387_s23  ;;  %s443_s11 = sshrl.u32 %s2758_s4, 3 }
 0x179   : > { %s458_s29 = sld [smem:[#allocation4 + %s457_s28]]  ;;  %s444_s12 = sand.u32 7, %s2758_s4  }
 0x17a   : > { %s1132_s17 = sshll.u32 %s443_s11, 5  ;;  %s448_s9 = scalar_lea.vmem %s2391_s25, 70 [#allocation5] }
 0x17b   : > { %s446_s24 = sadd.s32 %s1132_s17, %s444_s12  ;;  %s451_s30 = sshll.u32 %s448_s9, 4  ;;  %s452_s30 = int_to_ptr.vmem [resolvable:$true] %s451_s30 }
 0x17c   : > { %s447_s22 = scalar_lea.hbm %s3110_s1, %s446_s24 }
 0x17d   : > { %s449_s0 = sshll.u32 %s447_s22, 4  ;;  %s450_s0 = int_to_ptr.hbm [resolvable:$true] %s449_s0 }
 0x17e   : > { %s1753_s18 = sshra.s32 %s450_s0, 4  ;;  %s1754_s18 = int_to_ptr.hbm [resolvable:$true] %s1753_s18 }
 0x17f   : > { %s1755_s8 = scalar_lea.hbm %s1754_s18, 4  ;;  %p1758_p11 = scmp.lt.s32.totalorder %s1754_s18, %s3110_s1 }
 0x180   : > { %p1756_p10 = scmp.ne.s32.totalorder %s1754_s18, %s1755_s8  ;;  %p1759_p12 = scmp.lt.s32.totalorder %s2418_s6, %s1755_s8 }
 0x182   : > { %p1760_p13 = por %p1759_p12, %p1758_p11 }
 0x184   : > { %p1761_p0 = pnand %p1760_p13, %p1756_p10 }
 0x186   : > { %1764 = shalt.err (!%p1761_p0)  }
 0x187   : > { %456 = dma.hbm_to_vmem [thread:$0]  %s450_s0, 64, %s452_s30, [#allocation2 + $0x6], %s3129_s27, %s3129_s27, %s3130_s3 }
 0x188   : > { %2241 = dma.done.wait [#allocation2 + $0x7], 64 }
 0x189   : > { %2242 = vsyncadd [#allocation2 + $0x7], 4294967232  ;;  %s461_s4 = sshrl.u32 %s458_s29, 3  ;;  %s462_s7 = sand.u32 7, %s458_s29  }
 0x18a   : > { %s1133_s5 = sshll.u32 %s461_s4, 5  ;;  %s466_s26 = scalar_lea.vmem %s2391_s25, 71 [#allocation5] }
 0x18b   : > { %s464_s28 = sadd.s32 %s1133_s5, %s462_s7  ;;  %s469_s11 = sshll.u32 %s466_s26, 4  ;;  %s470_s11 = int_to_ptr.vmem [resolvable:$true] %s469_s11 }
 0x18c   : > { %s465_s9 = scalar_lea.hbm %s3110_s1, %s464_s28 }
 0x18d   : > { %s467_s24 = sshll.u32 %s465_s9, 4  ;;  %s468_s24 = int_to_ptr.hbm [resolvable:$true] %s467_s24 }
 0x18e   : > { %s1777_s10 = sshra.s32 %s468_s24, 4  ;;  %s1778_s10 = int_to_ptr.hbm [resolvable:$true] %s1777_s10 }
 0x18f   : > { %s1779_s30 = scalar_lea.hbm %s1778_s10, 4  ;;  %p1782_p2 = scmp.lt.s32.totalorder %s1778_s10, %s3110_s1 }
 0x190   : > { %p1780_p1 = scmp.ne.s32.totalorder %s1778_s10, %s1779_s30  ;;  %p1783_p3 = scmp.lt.s32.totalorder %s2418_s6, %s1779_s30 }
 0x192   : > { %p1784_p5 = por %p1783_p3, %p1782_p2 }
 0x194   : > { %p1785_p7 = pnand %p1784_p5, %p1780_p1 }
 0x196   : > { %1788 = shalt.err (!%p1785_p7)  }
 0x197   : > { %474 = dma.hbm_to_vmem [thread:$0]  %s468_s24, 64, %s470_s11, [#allocation2 + $0x7], %s3129_s27, %s3129_s27, %s3130_s3 }
 0x198   : > { %2243 = dma.done.wait [#allocation2], 64 }
 0x199   : > { %2244 = vsyncadd [#allocation2], 4294967232 }
 0x19a   : > { %2245 = dma.done.wait [#allocation2 + $0x1], 64 }
 0x19b   : > { %2246 = vsyncadd [#allocation2 + $0x1], 4294967232 }
 0x19c   : > { %2247 = dma.done.wait [#allocation2 + $0x2], 64 }
 0x19d   : > { %2248 = vsyncadd [#allocation2 + $0x2], 4294967232 }
 0x19e   : > { %2249 = dma.done.wait [#allocation2 + $0x3], 64 }
 0x19f   : > { %2250 = vsyncadd [#allocation2 + $0x3], 4294967232 }
 0x1a0   : > { %2251 = dma.done.wait [#allocation2 + $0x4], 64 }
 0x1a1   : > { %2252 = vsyncadd [#allocation2 + $0x4], 4294967232 }
 0x1a2   : > { %2253 = dma.done.wait [#allocation2 + $0x5], 64 }
 0x1a3   : > { %2254 = vsyncadd [#allocation2 + $0x5], 4294967232 }
 0x1a4   : > { %2255 = dma.done.wait [#allocation2 + $0x6], 64 }
 0x1a5   : > { %2256 = vsyncadd [#allocation2 + $0x6], 4294967232 }
 0x1a6   : > { %2257 = dma.done.wait [#allocation2 + $0x7], 64 }
 0x1a7   : > { %2258 = vsyncadd [#allocation2 + $0x7], 4294967232 }
 0x1a8   : > { %2259 = dma.done.wait [#allocation2 + $0x8], 64 }
 0x1a9   : > { %2260 = vsyncadd [#allocation2 + $0x8], 4294967232 }
 0x1aa   : > { %2261 = dma.done.wait [#allocation2 + $0x9], 64 }
 0x1ab   : > { %2262 = vsyncadd [#allocation2 + $0x9], 4294967232 }
 0x1ac   : > { %2263 = dma.done.wait [#allocation2 + $0xa], 64 }
 0x1ad   : > { %2264 = vsyncadd [#allocation2 + $0xa], 4294967232 }
 0x1ae   : > { %2265 = dma.done.wait [#allocation2 + $0xb], 64 }
 0x1af   : > { %2266 = vsyncadd [#allocation2 + $0xb], 4294967232 }
 0x1b0   : > { %2267 = dma.done.wait [#allocation2 + $0xc], 64 }
 0x1b1   : > { %2268 = vsyncadd [#allocation2 + $0xc], 4294967232 }
 0x1b2   : > { %2269 = dma.done.wait [#allocation2 + $0xd], 64 }
 0x1b3   : > { %2270 = vsyncadd [#allocation2 + $0xd], 4294967232 }
 0x1b4   : > { %2271 = dma.done.wait [#allocation2 + $0xe], 64 }
 0x1b5   : > { %2272 = vsyncadd [#allocation2 + $0xe], 4294967232 }
 0x1b6   : > { %2273 = dma.done.wait [#allocation2 + $0xf], 64 }
 0x1b7   : > { %2274 = vsyncadd [#allocation2 + $0xf], 4294967232 }
 0x1b8 PF: > { %p1134_p8 = scmp.ne.s32.totalorder %s2321_s15, 1 }
 0x1b9   : > { %s511_s6 = sld [smem:[#allocation4 + %s2387_s23]] (!%p1134_p8)  ;;  %s519_s27 = sshll.u32 (!%p1134_p8), %s2391_s25, 4  ;;  %s2800_s27 = int_to_ptr.vmem [resolvable:$true] %s519_s27 }
 0x1ba   : > { %510 = sbr.rel (%p1134_p8) target bundleno = 716 (0x2cc), region = 20  ;;  %s525_s3 = sadd.s32 (!%p1134_p8), 1, %s2387_s23 }
 0x1bb   : > { %s2803_s29 = sld [smem:[#allocation4 + %s525_s3]] (!%p1134_p8)  ;;  %s532_s0 = scalar_lea.vmem (!%p1134_p8), %s2391_s25, 1 [#allocation5] }
 0x1bc   : > { %s2806_s18 = sshll.u32 (!%p1134_p8), %s532_s0, 4  ;;  %s542_s8 = sadd.s32 (!%p1134_p8), 2, %s2387_s23  ;;  %s537_s18 = int_to_ptr.vmem [resolvable:$true] %s2806_s18 }
 0x1bd   : > { %s2810_s21 = sld [smem:[#allocation4 + %s542_s8]] (!%p1134_p8)  ;;  %s549_s5 = scalar_lea.vmem (!%p1134_p8), %s2391_s25, 2 [#allocation5] }
 0x1be   : > { %s2813_s28 = sshll.u32 (!%p1134_p8), %s549_s5, 4  ;;  %s2823_s0 = scalar_lea.hbm (!%p1134_p8), %s3110_s1, 160  ;;  %s554_s28 = int_to_ptr.vmem [resolvable:$true] %s2813_s28 }
 0x1bf   : > { %s512_s19 = sshrl.u32 %s511_s6, 3  ;;  %s513_s4 = sand.u32 7, %s511_s6  }
 0x1c0   : > { %s1135_s7 = sshll.u32 %s512_s19, 5 }
 0x1c1   : > { %s515_s26 = sadd.s32 %s1135_s7, %s513_s4  ;;  %s527_s9 = sshrl.u32 %s2803_s29, 3 }
 0x1c2   : > { %s516_s17 = scalar_lea.hbm %s3110_s1, %s515_s26  ;;  %s528_s10 = sand.u32 7, %s2803_s29  }
 0x1c3   : > { %s517_s24 = sshll.u32 %s516_s17, 4  ;;  %s1136_s30 = sshll.u32 %s527_s9, 5  ;;  %s518_s24 = int_to_ptr.hbm [resolvable:$true] %s517_s24 }
 0x1c4   : > { %s1801_s16 = sshra.s32 %s518_s24, 4  ;;  %s1802_s16 = int_to_ptr.hbm [resolvable:$true] %s1801_s16 }
 0x1c5   : > { %s1803_s22 = scalar_lea.hbm %s1802_s16, 4  ;;  %p1806_p10 = scmp.lt.s32.totalorder %s1802_s16, %s3110_s1 }
 0x1c6   : > { %p1804_p9 = scmp.ne.s32.totalorder %s1802_s16, %s1803_s22  ;;  %p1807_p11 = scmp.lt.s32.totalorder %s2823_s0, %s1803_s22 }
 0x1c8   : > { %p1808_p12 = por %p1807_p11, %p1806_p10 }
 0x1ca   : > { %p1809_p13 = pnand %p1808_p12, %p1804_p9 }
 0x1cc   : > { %1812 = shalt.err (!%p1809_p13)  }
 0x1cd   : > { %s2326_s29 = smov 128   ;;  %s2327_s4 = smov 1  }
 0x1ce   : > { %524 = dma.hbm_to_vmem [thread:$0]  %s518_s24, 64, %s2800_s27, [#allocation2], %s2326_s29, %s2326_s29, %s2327_s4 }
 0x1cf   : > { %s530_s7 = sadd.s32 %s1136_s30, %s528_s10  ;;  %s544_s5 = sshrl.u32 %s2810_s21, 3 }
 0x1d0   : > { %s531_s12 = scalar_lea.hbm %s3110_s1, %s530_s7  ;;  %s545_s17 = sand.u32 7, %s2810_s21  }
 0x1d1   : > { %s534_s9 = sshll.u32 %s531_s12, 4  ;;  %s1137_s16 = sshll.u32 %s544_s5, 5  ;;  %s535_s9 = int_to_ptr.hbm [resolvable:$true] %s534_s9 }
 0x1d2   : > { %s547_s22 = sadd.s32 %s1137_s16, %s545_s17  ;;  %s1825_s3 = sshra.s32 %s535_s9, 4  ;;  %s1826_s3 = int_to_ptr.hbm [resolvable:$true] %s1825_s3 }
 0x1d3   : > { %s1827_s6 = scalar_lea.hbm %s1826_s3, 4  ;;  %p1830_p1 = scmp.lt.s32.totalorder %s1826_s3, %s3110_s1 }
 0x1d4   : > { %p1828_p0 = scmp.ne.s32.totalorder %s1826_s3, %s1827_s6  ;;  %p1831_p2 = scmp.lt.s32.totalorder %s2823_s0, %s1827_s6 }
 0x1d6   : > { %p1832_p3 = por %p1831_p2, %p1830_p1 }
 0x1d8   : > { %p1833_p5 = pnand %p1832_p3, %p1828_p0 }
 0x1da   : > { %1836 = shalt.err (!%p1833_p5)  }
 0x1db   : > { %541 = dma.hbm_to_vmem [thread:$0]  %s535_s9, 64, %s537_s18, [#allocation2 + $0x1], %s2326_s29, %s2326_s29, %s2327_s4 }
 0x1dc   : > { %s548_s24 = scalar_lea.hbm %s3110_s1, %s547_s22  ;;  %s559_s30 = sadd.s32 3, %s2387_s23 }
 0x1dd   : > { %s551_s10 = sshll.u32 %s548_s24, 4  ;;  %s560_s7 = sld [smem:[#allocation4 + %s559_s30]]  ;;  %s552_s10 = int_to_ptr.hbm [resolvable:$true] %s551_s10 }
 0x1de   : > { %s1849_s5 = sshra.s32 %s552_s10, 4  ;;  %s1850_s5 = int_to_ptr.hbm [resolvable:$true] %s1849_s5 }
 0x1df   : > { %s1851_s26 = scalar_lea.hbm %s1850_s5, 4  ;;  %p1854_p8 = scmp.lt.s32.totalorder %s1850_s5, %s3110_s1 }
 0x1e0   : > { %p1852_p7 = scmp.ne.s32.totalorder %s1850_s5, %s1851_s26  ;;  %p1855_p9 = scmp.lt.s32.totalorder %s2823_s0, %s1851_s26 }
 0x1e2   : > { %p1856_p10 = por %p1855_p9, %p1854_p8 }
 0x1e4   : > { %p1857_p11 = pnand %p1856_p10, %p1852_p7 }
 0x1e6   : > { %1860 = shalt.err (!%p1857_p11)  }
 0x1e7   : > { %558 = dma.hbm_to_vmem [thread:$0]  %s552_s10, 64, %s554_s28, [#allocation2 + $0x2], %s2326_s29, %s2326_s29, %s2327_s4 }
 0x1e8   : > { %s566_s18 = scalar_lea.vmem %s2391_s25, 3 [#allocation5]  ;;  %s576_s17 = sadd.s32 4, %s2387_s23 }
 0x1e9   : > { %s2861_s9 = sshll.u32 %s566_s18, 4  ;;  %s2863_s16 = sld [smem:[#allocation4 + %s576_s17]]  ;;  %s571_s9 = int_to_ptr.vmem [resolvable:$true] %s2861_s9 }
 0x1ea   : > { %s583_s22 = scalar_lea.vmem %s2391_s25, 4 [#allocation5]  ;;  %s593_s6 = sadd.s32 5, %s2387_s23 }
 0x1eb   : > { %s2867_s3 = sshll.u32 %s583_s22, 4  ;;  %s561_s8 = sshrl.u32 %s560_s7, 3  ;;  %s588_s3 = int_to_ptr.vmem [resolvable:$true] %s2867_s3 }
 0x1ec   : > { %s562_s19 = sand.u32 7, %s560_s7   ;;  %s1138_s27 = sshll.u32 %s561_s8, 5 }
 0x1ed   : > { %s564_s28 = sadd.s32 %s1138_s27, %s562_s19  ;;  %s2871_s21 = sld [smem:[#allocation4 + %s593_s6]] }
 0x1ee   : > { %s565_s30 = scalar_lea.hbm %s3110_s1, %s564_s28 }
 0x1ef   : > { %s578_s5 = sshrl.u32 %s2863_s16, 3  ;;  %s568_s26 = sshll.u32 %s565_s30, 4  ;;  %s569_s26 = int_to_ptr.hbm [resolvable:$true] %s568_s26 }
 0x1f0   : > { %s579_s11 = sand.u32 7, %s2863_s16   ;;  %s1139_s12 = sshll.u32 %s578_s5, 5 }
 0x1f1   : > { %s1873_s18 = sshra.s32 %s569_s26, 4  ;;  %s1874_s18 = int_to_ptr.hbm [resolvable:$true] %s1873_s18 }
 0x1f2   : > { %s1875_s17 = scalar_lea.hbm %s1874_s18, 4  ;;  %p1878_p13 = scmp.lt.s32.totalorder %s1874_s18, %s3110_s1 }
 0x1f3   : > { %p1876_p12 = scmp.ne.s32.totalorder %s1874_s18, %s1875_s17  ;;  %p1879_p0 = scmp.lt.s32.totalorder %s2823_s0, %s1875_s17 }
 0x1f5   : > { %p1880_p1 = por %p1879_p0, %p1878_p13 }
 0x1f7   : > { %p1881_p2 = pnand %p1880_p1, %p1876_p12 }
 0x1f9   : > { %1884 = shalt.err (!%p1881_p2)  }
 0x1fa   : > { %575 = dma.hbm_to_vmem [thread:$0]  %s569_s26, 64, %s571_s9, [#allocation2 + $0x3], %s2326_s29, %s2326_s29, %s2327_s4 }
 0x1fb   : > { %s581_s16 = sadd.s32 %s1139_s12, %s579_s11  ;;  %s600_s6 = scalar_lea.vmem %s2391_s25, 5 [#allocation5] }
 0x1fc   : > { %s582_s27 = scalar_lea.hbm %s3110_s1, %s581_s16  ;;  %s595_s28 = sshrl.u32 %s2871_s21, 3 }
 0x1fd   : > { %s585_s24 = sshll.u32 %s582_s27, 4  ;;  %s596_s10 = sand.u32 7, %s2871_s21   ;;  %s586_s24 = int_to_ptr.hbm [resolvable:$true] %s585_s24 }
 0x1fe   : > { %s1140_s30 = sshll.u32 %s595_s28, 5  ;;  %s1897_s5 = sshra.s32 %s586_s24, 4  ;;  %s1898_s5 = int_to_ptr.hbm [resolvable:$true] %s1897_s5 }
 0x1ff   : > { %s1899_s18 = scalar_lea.hbm %s1898_s5, 4  ;;  %p1902_p5 = scmp.lt.s32.totalorder %s1898_s5, %s3110_s1 }
 0x200   : > { %p1900_p3 = scmp.ne.s32.totalorder %s1898_s5, %s1899_s18  ;;  %p1903_p7 = scmp.lt.s32.totalorder %s2823_s0, %s1899_s18 }
 0x202   : > { %p1904_p8 = por %p1903_p7, %p1902_p5 }
 0x204   : > { %p1905_p9 = pnand %p1904_p8, %p1900_p3 }
 0x206   : > { %1908 = shalt.err (!%p1905_p9)  }
 0x207   : > { %592 = dma.hbm_to_vmem [thread:$0]  %s586_s24, 64, %s588_s3, [#allocation2 + $0x4], %s2326_s29, %s2326_s29, %s2327_s4 }
 0x208   : > { %s598_s9 = sadd.s32 %s1140_s30, %s596_s10  ;;  %s604_s21 = sshll.u32 %s600_s6, 4  ;;  %s605_s21 = int_to_ptr.vmem [resolvable:$true] %s604_s21 }
 0x209   : > { %s599_s12 = scalar_lea.hbm %s3110_s1, %s598_s9  ;;  %s610_s16 = sadd.s32 6, %s2387_s23 }
 0x20a   : > { %s602_s22 = sshll.u32 %s599_s12, 4  ;;  %s611_s8 = sld [smem:[#allocation4 + %s610_s16]]  ;;  %s603_s22 = int_to_ptr.hbm [resolvable:$true] %s602_s22 }
 0x20b   : > { %s1921_s19 = sshra.s32 %s603_s22, 4  ;;  %s1922_s19 = int_to_ptr.hbm [resolvable:$true] %s1921_s19 }
 0x20c   : > { %s1923_s27 = scalar_lea.hbm %s1922_s19, 4  ;;  %p1926_p11 = scmp.lt.s32.totalorder %s1922_s19, %s3110_s1 }
 0x20d   : > { %p1924_p10 = scmp.ne.s32.totalorder %s1922_s19, %s1923_s27  ;;  %p1927_p12 = scmp.lt.s32.totalorder %s2823_s0, %s1923_s27 }
 0x20f   : > { %p1928_p13 = por %p1927_p12, %p1926_p11 }
 0x211   : > { %p1929_p0 = pnand %p1928_p13, %p1924_p10 }
 0x213   : > { %1932 = shalt.err (!%p1929_p0)  }
 0x214   : > { %609 = dma.hbm_to_vmem [thread:$0]  %s603_s22, 64, %s605_s21, [#allocation2 + $0x5], %s2326_s29, %s2326_s29, %s2327_s4 }
 0x215   : > { %s617_s3 = scalar_lea.vmem %s2391_s25, 6 [#allocation5]  ;;  %s627_s6 = sadd.s32 7, %s2387_s23 }
 0x216   : > { %s2913_s24 = sshll.u32 %s617_s3, 4  ;;  %s2915_s10 = sld [smem:[#allocation4 + %s627_s6]]  ;;  %s622_s24 = int_to_ptr.vmem [resolvable:$true] %s2913_s24 }
 0x217   : > { %s634_s30 = scalar_lea.vmem %s2391_s25, 7 [#allocation5]  ;;  %s644_s17 = sadd.s32 8, %s2387_s23 }
 0x218   : > { %s2919_s18 = sshll.u32 %s634_s30, 4  ;;  %s612_s7 = sshrl.u32 %s611_s8, 3  ;;  %s639_s18 = int_to_ptr.vmem [resolvable:$true] %s2919_s18 }
 0x219   : > { %s613_s9 = sand.u32 7, %s611_s8   ;;  %s1141_s26 = sshll.u32 %s612_s7, 5 }
 0x21a   : > { %s615_s21 = sadd.s32 %s1141_s26, %s613_s9  ;;  %s2923_s11 = sld [smem:[#allocation4 + %s644_s17]] }
 0x21b   : > { %s616_s16 = scalar_lea.hbm %s3110_s1, %s615_s21 }
 0x21c   : > { %s629_s19 = sshrl.u32 %s2915_s10, 3  ;;  %s619_s27 = sshll.u32 %s616_s16, 4  ;;  %s620_s27 = int_to_ptr.hbm [resolvable:$true] %s619_s27 }
 0x21d   : > { %s630_s28 = sand.u32 7, %s2915_s10   ;;  %s1142_s5 = sshll.u32 %s629_s19, 5 }
 0x21e   : > { %s1945_s3 = sshra.s32 %s620_s27, 4  ;;  %s1946_s3 = int_to_ptr.hbm [resolvable:$true] %s1945_s3 }
 0x21f   : > { %s1947_s6 = scalar_lea.hbm %s1946_s3, 4  ;;  %p1950_p2 = scmp.lt.s32.totalorder %s1946_s3, %s3110_s1 }
 0x220   : > { %p1948_p1 = scmp.ne.s32.totalorder %s1946_s3, %s1947_s6  ;;  %p1951_p3 = scmp.lt.s32.totalorder %s2823_s0, %s1947_s6 }
 0x222   : > { %p1952_p5 = por %p1951_p3, %p1950_p2 }
 0x224   : > { %p1953_p7 = pnand %p1952_p5, %p1948_p1 }
 0x226   : > { %1956 = shalt.err (!%p1953_p7)  }
 0x227   : > { %626 = dma.hbm_to_vmem [thread:$0]  %s620_s27, 64, %s622_s24, [#allocation2 + $0x6], %s2326_s29, %s2326_s29, %s2327_s4 }
 0x228   : > { %s632_s10 = sadd.s32 %s1142_s5, %s630_s28  ;;  %s651_s17 = scalar_lea.vmem %s2391_s25, 32 [#allocation5] }
 0x229   : > { %s633_s26 = scalar_lea.hbm %s3110_s1, %s632_s10  ;;  %s646_s21 = sshrl.u32 %s2923_s11, 3 }
 0x22a   : > { %s636_s12 = sshll.u32 %s633_s26, 4  ;;  %s647_s22 = sand.u32 7, %s2923_s11   ;;  %s637_s12 = int_to_ptr.hbm [resolvable:$true] %s636_s12 }
 0x22b   : > { %s1143_s16 = sshll.u32 %s646_s21, 5  ;;  %s1969_s19 = sshra.s32 %s637_s12, 4  ;;  %s1970_s19 = int_to_ptr.hbm [resolvable:$true] %s1969_s19 }
 0x22c   : > { %s1971_s3 = scalar_lea.hbm %s1970_s19, 4  ;;  %p1974_p9 = scmp.lt.s32.totalorder %s1970_s19, %s3110_s1 }
 0x22d   : > { %p1972_p8 = scmp.ne.s32.totalorder %s1970_s19, %s1971_s3  ;;  %p1975_p10 = scmp.lt.s32.totalorder %s2823_s0, %s1971_s3 }
 0x22f   : > { %p1976_p11 = por %p1975_p10, %p1974_p9 }
 0x231   : > { %p1977_p12 = pnand %p1976_p11, %p1972_p8 }
 0x233   : > { %1980 = shalt.err (!%p1977_p12)  }
 0x234   : > { %643 = dma.hbm_to_vmem [thread:$0]  %s637_s12, 64, %s639_s18, [#allocation2 + $0x7], %s2326_s29, %s2326_s29, %s2327_s4 }
 0x235   : > { %s649_s24 = sadd.s32 %s1143_s16, %s647_s22  ;;  %s655_s11 = sshll.u32 %s651_s17, 4  ;;  %s656_s11 = int_to_ptr.vmem [resolvable:$true] %s655_s11 }
 0x236   : > { %s650_s5 = scalar_lea.hbm %s3110_s1, %s649_s24  ;;  %s661_s10 = sadd.s32 9, %s2387_s23 }
 0x237   : > { %s653_s30 = sshll.u32 %s650_s5, 4  ;;  %s662_s7 = sld [smem:[#allocation4 + %s661_s10]]  ;;  %s654_s30 = int_to_ptr.hbm [resolvable:$true] %s653_s30 }
 0x238   : > { %s1993_s9 = sshra.s32 %s654_s30, 4  ;;  %s1994_s9 = int_to_ptr.hbm [resolvable:$true] %s1993_s9 }
 0x239   : > { %s1995_s26 = scalar_lea.hbm %s1994_s9, 4  ;;  %p1998_p0 = scmp.lt.s32.totalorder %s1994_s9, %s3110_s1 }
 0x23a   : > { %p1996_p13 = scmp.ne.s32.totalorder %s1994_s9, %s1995_s26  ;;  %p1999_p1 = scmp.lt.s32.totalorder %s2823_s0, %s1995_s26 }
 0x23c   : > { %p2000_p2 = por %p1999_p1, %p1998_p0 }
 0x23e   : > { %p2001_p3 = pnand %p2000_p2, %p1996_p13 }
 0x240   : > { %2004 = shalt.err (!%p2001_p3)  }
 0x241   : > { %660 = dma.hbm_to_vmem [thread:$0]  %s654_s30, 64, %s656_s11, [#allocation2 + $0x8], %s2326_s29, %s2326_s29, %s2327_s4 }
 0x242   : > { %s668_s18 = scalar_lea.vmem %s2391_s25, 33 [#allocation5]  ;;  %s678_s17 = sadd.s32 10, %s2387_s23 }
 0x243   : > { %s2965_s12 = sshll.u32 %s668_s18, 4  ;;  %s2967_s22 = sld [smem:[#allocation4 + %s678_s17]]  ;;  %s673_s12 = int_to_ptr.vmem [resolvable:$true] %s2965_s12 }
 0x244   : > { %s685_s16 = scalar_lea.vmem %s2391_s25, 34 [#allocation5]  ;;  %s695_s6 = sadd.s32 11, %s2387_s23 }
 0x245   : > { %s2971_s3 = sshll.u32 %s685_s16, 4  ;;  %s663_s8 = sshrl.u32 %s662_s7, 3  ;;  %s690_s3 = int_to_ptr.vmem [resolvable:$true] %s2971_s3 }
 0x246   : > { %s664_s24 = sand.u32 7, %s662_s7   ;;  %s1144_s27 = sshll.u32 %s663_s8, 5 }
 0x247   : > { %s666_s11 = sadd.s32 %s1144_s27, %s664_s24  ;;  %s2975_s28 = sld [smem:[#allocation4 + %s695_s6]] }
 0x248   : > { %s667_s10 = scalar_lea.hbm %s3110_s1, %s666_s11 }
 0x249   : > { %s680_s9 = sshrl.u32 %s2967_s22, 3  ;;  %s670_s26 = sshll.u32 %s667_s10, 4  ;;  %s671_s26 = int_to_ptr.hbm [resolvable:$true] %s670_s26 }
 0x24a   : > { %s681_s21 = sand.u32 7, %s2967_s22   ;;  %s1145_s19 = sshll.u32 %s680_s9, 5 }
 0x24b   : > { %s2017_s18 = sshra.s32 %s671_s26, 4  ;;  %s2018_s18 = int_to_ptr.hbm [resolvable:$true] %s2017_s18 }
 0x24c   : > { %s2019_s17 = scalar_lea.hbm %s2018_s18, 4  ;;  %p2022_p7 = scmp.lt.s32.totalorder %s2018_s18, %s3110_s1 }
 0x24d   : > { %p2020_p5 = scmp.ne.s32.totalorder %s2018_s18, %s2019_s17  ;;  %p2023_p8 = scmp.lt.s32.totalorder %s2823_s0, %s2019_s17 }
 0x24f   : > { %p2024_p9 = por %p2023_p8, %p2022_p7 }
 0x251   : > { %p2025_p10 = pnand %p2024_p9, %p2020_p5 }
 0x253   : > { %2028 = shalt.err (!%p2025_p10)  }
 0x254   : > { %677 = dma.hbm_to_vmem [thread:$0]  %s671_s26, 64, %s673_s12, [#allocation2 + $0x9], %s2326_s29, %s2326_s29, %s2327_s4 }
 0x255   : > { %s683_s22 = sadd.s32 %s1145_s19, %s681_s21  ;;  %s702_s6 = scalar_lea.vmem %s2391_s25, 35 [#allocation5] }
 0x256   : > { %s684_s27 = scalar_lea.hbm %s3110_s1, %s683_s22  ;;  %s697_s11 = sshrl.u32 %s2975_s28, 3 }
 0x257   : > { %s687_s5 = sshll.u32 %s684_s27, 4  ;;  %s698_s30 = sand.u32 7, %s2975_s28   ;;  %s688_s5 = int_to_ptr.hbm [resolvable:$true] %s687_s5 }
 0x258   : > { %s1146_s10 = sshll.u32 %s697_s11, 5  ;;  %s2041_s9 = sshra.s32 %s688_s5, 4  ;;  %s2042_s9 = int_to_ptr.hbm [resolvable:$true] %s2041_s9 }
 0x259   : > { %s2043_s18 = scalar_lea.hbm %s2042_s9, 4  ;;  %p2046_p12 = scmp.lt.s32.totalorder %s2042_s9, %s3110_s1 }
 0x25a   : > { %p2044_p11 = scmp.ne.s32.totalorder %s2042_s9, %s2043_s18  ;;  %p2047_p13 = scmp.lt.s32.totalorder %s2823_s0, %s2043_s18 }
 0x25c   : > { %p2048_p0 = por %p2047_p13, %p2046_p12 }
 0x25e   : > { %p2049_p1 = pnand %p2048_p0, %p2044_p11 }
 0x260   : > { %2052 = shalt.err (!%p2049_p1)  }
 0x261   : > { %694 = dma.hbm_to_vmem [thread:$0]  %s688_s5, 64, %s690_s3, [#allocation2 + $0xa], %s2326_s29, %s2326_s29, %s2327_s4 }
 0x262   : > { %s700_s12 = sadd.s32 %s1146_s10, %s698_s30  ;;  %s706_s28 = sshll.u32 %s702_s6, 4  ;;  %s707_s28 = int_to_ptr.vmem [resolvable:$true] %s706_s28 }
 0x263   : > { %s701_s19 = scalar_lea.hbm %s3110_s1, %s700_s12  ;;  %s712_s22 = sadd.s32 12, %s2387_s23 }
 0x264   : > { %s704_s16 = sshll.u32 %s701_s19, 4  ;;  %s713_s8 = sld [smem:[#allocation4 + %s712_s22]]  ;;  %s705_s16 = int_to_ptr.hbm [resolvable:$true] %s704_s16 }
 0x265   : > { %s2065_s24 = sshra.s32 %s705_s16, 4  ;;  %s2066_s24 = int_to_ptr.hbm [resolvable:$true] %s2065_s24 }
 0x266   : > { %s2067_s27 = scalar_lea.hbm %s2066_s24, 4  ;;  %p2070_p3 = scmp.lt.s32.totalorder %s2066_s24, %s3110_s1 }
 0x267   : > { %p2068_p2 = scmp.ne.s32.totalorder %s2066_s24, %s2067_s27  ;;  %p2071_p5 = scmp.lt.s32.totalorder %s2823_s0, %s2067_s27 }
 0x269   : > { %p2072_p7 = por %p2071_p5, %p2070_p3 }
 0x26b   : > { %p2073_p8 = pnand %p2072_p7, %p2068_p2 }
 0x26d   : > { %2076 = shalt.err (!%p2073_p8)  }
 0x26e   : > { %711 = dma.hbm_to_vmem [thread:$0]  %s705_s16, 64, %s707_s28, [#allocation2 + $0xb], %s2326_s29, %s2326_s29, %s2327_s4 }
 0x26f   : > { %s719_s3 = scalar_lea.vmem %s2391_s25, 36 [#allocation5]  ;;  %s729_s6 = sadd.s32 13, %s2387_s23 }
 0x270   : > { %s3017_s5 = sshll.u32 %s719_s3, 4  ;;  %s3019_s30 = sld [smem:[#allocation4 + %s729_s6]]  ;;  %s724_s5 = int_to_ptr.vmem [resolvable:$true] %s3017_s5 }
 0x271   : > { %s736_s10 = scalar_lea.vmem %s2391_s25, 37 [#allocation5]  ;;  %s746_s17 = sadd.s32 14, %s2387_s23 }
 0x272   : > { %s3023_s18 = sshll.u32 %s736_s10, 4  ;;  %s714_s7 = sshrl.u32 %s713_s8, 3  ;;  %s741_s18 = int_to_ptr.vmem [resolvable:$true] %s3023_s18 }
 0x273   : > { %s715_s12 = sand.u32 7, %s713_s8   ;;  %s1147_s26 = sshll.u32 %s714_s7, 5 }
 0x274   : > { %s717_s28 = sadd.s32 %s1147_s26, %s715_s12  ;;  %s3027_s21 = sld [smem:[#allocation4 + %s746_s17]] }
 0x275   : > { %s718_s22 = scalar_lea.hbm %s3110_s1, %s717_s28 }
 0x276   : > { %s731_s24 = sshrl.u32 %s3019_s30, 3  ;;  %s721_s27 = sshll.u32 %s718_s22, 4  ;;  %s722_s27 = int_to_ptr.hbm [resolvable:$true] %s721_s27 }
 0x277   : > { %s732_s11 = sand.u32 7, %s3019_s30   ;;  %s1148_s9 = sshll.u32 %s731_s24, 5 }
 0x278   : > { %s2089_s3 = sshra.s32 %s722_s27, 4  ;;  %s2090_s3 = int_to_ptr.hbm [resolvable:$true] %s2089_s3 }
 0x279   : > { %s2091_s6 = scalar_lea.hbm %s2090_s3, 4  ;;  %p2094_p10 = scmp.lt.s32.totalorder %s2090_s3, %s3110_s1 }
 0x27a   : > { %p2092_p9 = scmp.ne.s32.totalorder %s2090_s3, %s2091_s6  ;;  %p2095_p11 = scmp.lt.s32.totalorder %s2823_s0, %s2091_s6 }
 0x27c   : > { %p2096_p12 = por %p2095_p11, %p2094_p10 }
 0x27e   : > { %p2097_p13 = pnand %p2096_p12, %p2092_p9 }
 0x280   : > { %2100 = shalt.err (!%p2097_p13)  }
 0x281   : > { %728 = dma.hbm_to_vmem [thread:$0]  %s722_s27, 64, %s724_s5, [#allocation2 + $0xc], %s2326_s29, %s2326_s29, %s2327_s4 }
 0x282   : > { %s734_s30 = sadd.s32 %s1148_s9, %s732_s11  ;;  %s753_s17 = scalar_lea.vmem %s2391_s25, 38 [#allocation5] }
 0x283   : > { %s735_s26 = scalar_lea.hbm %s3110_s1, %s734_s30  ;;  %s748_s28 = sshrl.u32 %s3027_s21, 3 }
 0x284   : > { %s738_s19 = sshll.u32 %s735_s26, 4  ;;  %s749_s16 = sand.u32 7, %s3027_s21   ;;  %s739_s19 = int_to_ptr.hbm [resolvable:$true] %s738_s19 }
 0x285   : > { %s1149_s22 = sshll.u32 %s748_s28, 5  ;;  %s2113_s24 = sshra.s32 %s739_s19, 4  ;;  %s2114_s24 = int_to_ptr.hbm [resolvable:$true] %s2113_s24 }
 0x286   : > { %s2115_s3 = scalar_lea.hbm %s2114_s24, 4  ;;  %p2118_p1 = scmp.lt.s32.totalorder %s2114_s24, %s3110_s1 }
 0x287   : > { %p2116_p0 = scmp.ne.s32.totalorder %s2114_s24, %s2115_s3  ;;  %p2119_p2 = scmp.lt.s32.totalorder %s2823_s0, %s2115_s3 }
 0x289   : > { %p2120_p3 = por %p2119_p2, %p2118_p1 }
 0x28b   : > { %p2121_p5 = pnand %p2120_p3, %p2116_p0 }
 0x28d   : > { %2124 = shalt.err (!%p2121_p5)  }
 0x28e   : > { %745 = dma.hbm_to_vmem [thread:$0]  %s739_s19, 64, %s741_s18, [#allocation2 + $0xd], %s2326_s29, %s2326_s29, %s2327_s4 }
 0x28f   : > { %s751_s5 = sadd.s32 %s1149_s22, %s749_s16  ;;  %s757_s21 = sshll.u32 %s753_s17, 4  ;;  %s758_s21 = int_to_ptr.vmem [resolvable:$true] %s757_s21 }
 0x290   : > { %s752_s9 = scalar_lea.hbm %s3110_s1, %s751_s5  ;;  %s763_s30 = sadd.s32 15, %s2387_s23 }
 0x291   : > { %s755_s10 = sshll.u32 %s752_s9, 4  ;;  %s764_s7 = sld [smem:[#allocation4 + %s763_s30]]  ;;  %s756_s10 = int_to_ptr.hbm [resolvable:$true] %s755_s10 }
 0x292   : > { %s2137_s12 = sshra.s32 %s756_s10, 4  ;;  %s2138_s12 = int_to_ptr.hbm [resolvable:$true] %s2137_s12 }
 0x293   : > { %s2139_s26 = scalar_lea.hbm %s2138_s12, 4  ;;  %p2142_p8 = scmp.lt.s32.totalorder %s2138_s12, %s3110_s1 }
 0x294   : > { %p2140_p7 = scmp.ne.s32.totalorder %s2138_s12, %s2139_s26  ;;  %p2143_p9 = scmp.lt.s32.totalorder %s2823_s0, %s2139_s26 }
 0x296   : > { %p2144_p10 = por %p2143_p9, %p2142_p8 }
 0x298   : > { %p2145_p11 = pnand %p2144_p10, %p2140_p7 }
 0x29a   : > { %2148 = shalt.err (!%p2145_p11)  }
 0x29b   : > { %762 = dma.hbm_to_vmem [thread:$0]  %s756_s10, 64, %s758_s21, [#allocation2 + $0xe], %s2326_s29, %s2326_s29, %s2327_s4 }
 0x29c   : > { %s770_s23 = scalar_lea.vmem %s2391_s25, 39 [#allocation5]  ;;  %s765_s17 = sshrl.u32 %s764_s7, 3 }
 0x29d   : > { %s774_s18 = sshll.u32 %s770_s23, 4  ;;  %s766_s19 = sand.u32 7, %s764_s7   ;;  %s775_s18 = int_to_ptr.vmem [resolvable:$true] %s774_s18 }
 0x29e   : > { %s1150_s16 = sshll.u32 %s765_s17, 5 }
 0x29f   : > { %s768_s22 = sadd.s32 %s1150_s16, %s766_s19 }
 0x2a0   : > { %s769_s8 = scalar_lea.hbm %s3110_s1, %s768_s22 }
 0x2a1   : > { %s772_s5 = sshll.u32 %s769_s8, 4  ;;  %s773_s5 = int_to_ptr.hbm [resolvable:$true] %s772_s5 }
 0x2a2   : > { %s2161_s27 = sshra.s32 %s773_s5, 4  ;;  %s2162_s27 = int_to_ptr.hbm [resolvable:$true] %s2161_s27 }
 0x2a3   : > { %s2163_s11 = scalar_lea.hbm %s2162_s27, 4  ;;  %p2166_p13 = scmp.lt.s32.totalorder %s2162_s27, %s3110_s1 }
 0x2a4   : > { %p2164_p12 = scmp.ne.s32.totalorder %s2162_s27, %s2163_s11  ;;  %p2167_p0 = scmp.lt.s32.totalorder %s2823_s0, %s2163_s11 }
 0x2a6   : > { %p2168_p1 = por %p2167_p0, %p2166_p13 }
 0x2a8   : > { %p2169_p2 = pnand %p2168_p1, %p2164_p12 }
 0x2aa   : > { %2172 = shalt.err (!%p2169_p2)  }
 0x2ab   : > { %779 = dma.hbm_to_vmem [thread:$0]  %s773_s5, 64, %s775_s18, [#allocation2 + $0xf], %s2326_s29, %s2326_s29, %s2327_s4 }
 0x2ac   : > { %2275 = dma.done.wait [#allocation2], 64 }
 0x2ad   : > { %2276 = vsyncadd [#allocation2], 4294967232 }
 0x2ae   : > { %2277 = dma.done.wait [#allocation2 + $0x1], 64 }
 0x2af   : > { %2278 = vsyncadd [#allocation2 + $0x1], 4294967232 }
 0x2b0   : > { %2279 = dma.done.wait [#allocation2 + $0x2], 64 }
 0x2b1   : > { %2280 = vsyncadd [#allocation2 + $0x2], 4294967232 }
 0x2b2   : > { %2281 = dma.done.wait [#allocation2 + $0x3], 64 }
 0x2b3   : > { %2282 = vsyncadd [#allocation2 + $0x3], 4294967232 }
 0x2b4   : > { %2283 = dma.done.wait [#allocation2 + $0x4], 64 }
 0x2b5   : > { %2284 = vsyncadd [#allocation2 + $0x4], 4294967232 }
 0x2b6   : > { %2285 = dma.done.wait [#allocation2 + $0x5], 64 }
 0x2b7   : > { %2286 = vsyncadd [#allocation2 + $0x5], 4294967232 }
 0x2b8   : > { %2287 = dma.done.wait [#allocation2 + $0x6], 64 }
 0x2b9   : > { %2288 = vsyncadd [#allocation2 + $0x6], 4294967232 }
 0x2ba   : > { %2289 = dma.done.wait [#allocation2 + $0x7], 64 }
 0x2bb   : > { %2290 = vsyncadd [#allocation2 + $0x7], 4294967232 }
 0x2bc   : > { %2291 = dma.done.wait [#allocation2 + $0x8], 64 }
 0x2bd   : > { %2292 = vsyncadd [#allocation2 + $0x8], 4294967232 }
 0x2be   : > { %2293 = dma.done.wait [#allocation2 + $0x9], 64 }
 0x2bf   : > { %2294 = vsyncadd [#allocation2 + $0x9], 4294967232 }
 0x2c0   : > { %2295 = dma.done.wait [#allocation2 + $0xa], 64 }
 0x2c1   : > { %2296 = vsyncadd [#allocation2 + $0xa], 4294967232 }
 0x2c2   : > { %2297 = dma.done.wait [#allocation2 + $0xb], 64 }
 0x2c3   : > { %2298 = vsyncadd [#allocation2 + $0xb], 4294967232 }
 0x2c4   : > { %2299 = dma.done.wait [#allocation2 + $0xc], 64 }
 0x2c5   : > { %2300 = vsyncadd [#allocation2 + $0xc], 4294967232 }
 0x2c6   : > { %2301 = dma.done.wait [#allocation2 + $0xd], 64 }
 0x2c7   : > { %2302 = vsyncadd [#allocation2 + $0xd], 4294967232 }
 0x2c8   : > { %2303 = dma.done.wait [#allocation2 + $0xe], 64 }
 0x2c9   : > { %2304 = vsyncadd [#allocation2 + $0xe], 4294967232 }
 0x2ca   : > { %2305 = dma.done.wait [#allocation2 + $0xf], 64 }
 0x2cb   : > { %2306 = vsyncadd [#allocation2 + $0xf], 4294967232 }
 0x2cc PF: > { %s1173_s0 = smul.u32 96, %s2321_s15  ;;  %s826_s29 = sshll.u32 %s2391_s25, 4  ;;  %s827_s29 = int_to_ptr.vmem [resolvable:$true] %s826_s29 }
 0x2cd   : > { %s3131_s12 = sand.u32 1, %s2317_s14   ;;  %s2205_s25 = scalar_lea.hbm %s3111_s2, 192 }
 0x2ce   : > { %s825_s30 = scalar_lea.hbm %s3111_s2, %s1173_s0  ;;  %s813_s26 = scalar_lea.sflag [#allocation6], %s3131_s12 }
 0x2cf   : > { %s828_s7 = sshll.u32 %s825_s30, 4  ;;  %s829_s7 = int_to_ptr.hbm [resolvable:$true] %s828_s7 }
 0x2d0   : > { %s2199_s28 = sshra.s32 %s829_s7, 4  ;;  %s2200_s28 = int_to_ptr.hbm [resolvable:$true] %s2199_s28 }
 0x2d1   : > { %s2201_s24 = scalar_lea.hbm %s2200_s28, 96  ;;  %p2206_p8 = scmp.lt.s32.totalorder %s2200_s28, %s3111_s2 }
 0x2d2   : > { %p2202_p3 = scmp.ne.s32.totalorder %s2200_s28, %s2201_s24  ;;  %p2207_p9 = scmp.lt.s32.totalorder %s2205_s25, %s2201_s24 }
 0x2d4   : > { %p2203_p5 = pnand %p2202_p3, %p2376_p4  ;;  %p2208_p10 = por %p2207_p9, %p2206_p8 }
 0x2d6   : > { %p2204_p7 = pneg %p2203_p5 }
 0x2d8   : > { %p2209_p11 = pnand %p2208_p10, %p2204_p7 }
 0x2da   : > { %2212 = shalt.err (!%p2209_p11)
}
 0x2db   : > { %s2328_s16 = smov 512   ;;  %s2329_s22 = smov 32  }
 0x2dc   : > { %1175 = dma.vmem_to_hbm [thread:$0]  (%p2376_p4), %s827_s29, 1536, %s829_s7, %s813_s26, %s2328_s16, %s2328_s16, %s2329_s22  }
 0x2dd PF: > { %p1181_p12 = scmp.ge.s32.totalorder %s2321_s15, 1  ;;  %s843_s6 = sand.u32 1, %s2313_s13  }
 0x2de   : > { %s844_s8 = scalar_lea.sflag [#allocation6], %s843_s6 }
 0x2df   : > { %p1178_p13 = pnand %p1181_p12, %p2380_p6 }
 0x2e1   : > { %p1179_p0 = pneg %p1178_p13 }
 0x2e3   : > { %2308 = dma.done.wait (%p1179_p0), %s844_s8, 1536  }
 0x2e4   : > { %2310 = vsyncadd (%p1179_p0), %s844_s8, 4294965760  ;;  %s3133_s15 = sld [smem:[#allocation89_spill]]  ;;  %s3135_s13 = smov %s2317_s14 }
 0x2e5   : > { %s3134_s5 = sld [smem:[#allocation90_spill]] }
 0x2ea   : > { %p20_p1 = scmp.ge.s32.totalorder %s3133_s15, 3  }
 0x2eb   : > { %s3136_s14 = smov %s3134_s5 }
 0x2ec   :  { %22 = sbr.rel (!%p20_p1) target bundleno = 9 (0x9), region = 175 }
 0x2f1   :  { %850 = vsyncpa [#allocation6], 1 }
 0x2f2   :  { %852 = vsyncpa [#allocation6 + $0x1], 1 }
 0x2f3   :  { %853 = vsyncmov [#allocation2] }
 0x2f6   :  { %s854_s20 = vpop.sfrf %853 }
 0x2f7   :  { %p1155_p4 = scmp.ne.s32.totalorder %s854_s20, 0 }
 0x2f9   :  { %858 = shalt.err (%p1155_p4)  }
 0x2fa   :  { %860 = vsyncmov [#allocation2 + $0x1] }
 0x2fd   :  { %s861_s27 = vpop.sfrf %860 }
 0x2fe   :  { %p1156_p6 = scmp.ne.s32.totalorder %s861_s27, 0 }
 0x300   :  { %865 = shalt.err (%p1156_p6)  }
 0x301   :  { %867 = vsyncmov [#allocation2 + $0x2] }
 0x304   :  { %s868_s11 = vpop.sfrf %867 }
 0x305   :  { %p1157_p2 = scmp.ne.s32.totalorder %s868_s11, 0 }
 0x307   :  { %872 = shalt.err (%p1157_p2)  }
 0x308   :  { %874 = vsyncmov [#allocation2 + $0x3] }
 0x30b   :  { %s875_s9 = vpop.sfrf %874 }
 0x30c   :  { %p1158_p3 = scmp.ne.s32.totalorder %s875_s9, 0 }
 0x30e   :  { %879 = shalt.err (%p1158_p3)  }
 0x30f   :  { %881 = vsyncmov [#allocation2 + $0x4] }
 0x312   :  { %s882_s15 = vpop.sfrf %881 }
 0x313   :  { %p1159_p5 = scmp.ne.s32.totalorder %s882_s15, 0 }
 0x315   :  { %886 = shalt.err (%p1159_p5)  }
 0x316   :  { %888 = vsyncmov [#allocation2 + $0x5] }
 0x319   :  { %s889_s1 = vpop.sfrf %888 }
 0x31a   :  { %p1160_p7 = scmp.ne.s32.totalorder %s889_s1, 0 }
 0x31c   :  { %893 = shalt.err (%p1160_p7)  }
 0x31d   :  { %895 = vsyncmov [#allocation2 + $0x6] }
 0x320   :  { %s896_s2 = vpop.sfrf %895 }
 0x321   :  { %p1161_p8 = scmp.ne.s32.totalorder %s896_s2, 0 }
 0x323   :  { %900 = shalt.err (%p1161_p8)  }
 0x324   :  { %902 = vsyncmov [#allocation2 + $0x7] }
 0x327   :  { %s903_s13 = vpop.sfrf %902 }
 0x328   :  { %p1162_p9 = scmp.ne.s32.totalorder %s903_s13, 0 }
 0x32a   :  { %907 = shalt.err (%p1162_p9)  }
 0x32b   :  { %909 = vsyncmov [#allocation2 + $0x8] }
 0x32e   :  { %s910_s14 = vpop.sfrf %909 }
 0x32f   :  { %p1163_p10 = scmp.ne.s32.totalorder %s910_s14, 0 }
 0x331   :  { %914 = shalt.err (%p1163_p10)  }
 0x332   :  { %916 = vsyncmov [#allocation2 + $0x9] }
 0x335   :  { %s917_s21 = vpop.sfrf %916 }
 0x336   :  { %p1164_p11 = scmp.ne.s32.totalorder %s917_s21, 0 }
 0x338   :  { %921 = shalt.err (%p1164_p11)  }
 0x339   :  { %923 = vsyncmov [#allocation2 + $0xa] }
 0x33c   :  { %s924_s0 = vpop.sfrf %923 }
 0x33d   :  { %p1165_p12 = scmp.ne.s32.totalorder %s924_s0, 0 }
 0x33f   :  { %928 = shalt.err (%p1165_p12)  }
 0x340   :  { %930 = vsyncmov [#allocation2 + $0xb] }
 0x343   :  { %s931_s29 = vpop.sfrf %930 }
 0x344   :  { %p1166_p13 = scmp.ne.s32.totalorder %s931_s29, 0 }
 0x346   :  { %935 = shalt.err (%p1166_p13)  }
 0x347   :  { %937 = vsyncmov [#allocation2 + $0xc] }
 0x34a   :  { %s938_s4 = vpop.sfrf %937 }
 0x34b   :  { %p1167_p0 = scmp.ne.s32.totalorder %s938_s4, 0 }
 0x34d   :  { %942 = shalt.err (%p1167_p0)  }
 0x34e   :  { %944 = vsyncmov [#allocation2 + $0xd] }
 0x351   :  { %s945_s10 = vpop.sfrf %944 }
 0x352   :  { %p1168_p1 = scmp.ne.s32.totalorder %s945_s10, 0 }
 0x354   :  { %949 = shalt.err (%p1168_p1)  }
 0x355   :  { %951 = vsyncmov [#allocation2 + $0xe] }
 0x358   :  { %s952_s30 = vpop.sfrf %951 }
 0x359   :  { %p1169_p4 = scmp.ne.s32.totalorder %s952_s30, 0 }
 0x35b   :  { %956 = shalt.err (%p1169_p4)  }
 0x35c   :  { %958 = vsyncmov [#allocation2 + $0xf] }
 0x35f   :  { %s959_s7 = vpop.sfrf %958 }
 0x360   :  { %p1170_p6 = scmp.ne.s32.totalorder %s959_s7, 0 }
 0x362   :  { %963 = shalt.err (%p1170_p6)  }

</bundles_post_ra>
